<compile_context>
chip_gen: v5e
topology: v5e:2x2
jax: 0.10.0
libtpu: 0.0.40
codegen_flags: <defaults>
</compile_context>

<pallas_src>
import functools

import jax
import jax.numpy as jnp
from jax.experimental import pallas as pl
from jax.experimental.pallas import tpu as pltpu


def _round_up(x, m):
    return (x + m - 1) // m * m


def _centerblock_kernel(x_ref, w_ref, scale_ref, bias_ref, o_ref,
                        xsh_ref, acc_ref, *, n_k):
    """One (batch-tile, Cout-tile, Cin-tile) step of Conv3x3 + BN + ReLU.

    x_ref:     (nb, H, W, tCin)       un-padded NHWC input block (native dtype)
    w_ref:     (9*tCin, tCout)        conv weights, rows ordered (kh, kw, cin)
    scale_ref: (1, tCout)  f32        folded BN scale
    bias_ref:  (1, tCout)  f32        folded BN bias
    o_ref:     (nb, H, W, tCout)      output block
    xsh_ref:   (3, nb, H+2, W, tCin)  VMEM scratch: per-kw shifted, zero-padded
                                      slabs in the MXU compute dtype
    acc_ref:   (nb*H*W, tCout) f32    reduction accumulator (used iff n_k > 1)
    """
    j = pl.program_id(1)
    k = pl.program_id(2)
    nb, H, W, t_cin = x_ref.shape
    t_cout = o_ref.shape[-1]
    m = nb * H * W

    # ---- build the three kw-shifted, halo-padded slabs (once per x block) ----
    # slab[kw][n, i, w, :] == zero-padded-x[n, i, w + kw, :]
    def fill_shifted_slabs():
        xsh_ref[...] = jnp.zeros_like(xsh_ref)
        xin = x_ref[...].astype(xsh_ref.dtype)                  # (nb, H, W, tCin)
        xsh_ref[1, :, 1:H + 1, :, :] = xin                          # kw = 1 (center)
        xsh_ref[0, :, 1:H + 1, 1:W, :] = xin[:, :, 0:W - 1, :]      # kw = 0 (left)
        xsh_ref[2, :, 1:H + 1, 0:W - 1, :] = xin[:, :, 1:W, :]      # kw = 2 (right)

    if n_k == 1:
        # The x block only changes with the batch-tile index; the Pallas
        # pipeline skips its re-DMA across j, so refill only at j == 0.
        @pl.when(j == 0)
        def _():
            fill_shifted_slabs()
    else:
        # A new Cin slice arrives every grid step.
        fill_shifted_slabs()

    # ---- nine accumulating MXU contractions, K = tCin each -------------------
    w = w_ref[...]
    partial = None
    for kh in range(3):
        for kw in range(3):
            t = kh * 3 + kw
            tap = xsh_ref[kw, :, kh:kh + H, :, :].reshape(m, t_cin)
            contrib = jax.lax.dot_general(
                tap, w[t * t_cin:(t + 1) * t_cin, :],
                (((1,), (0,)), ((), ())),
                preferred_element_type=jnp.float32)
            partial = contrib if partial is None else partial + contrib

    # ---- folded BN + ReLU epilogue (f32) -------------------------------------
    def epilogue(acc):
        y = acc * scale_ref[0] + bias_ref[0]
        o_ref[...] = (jnp.maximum(y, 0.0)
                      .reshape(nb, H, W, t_cout)
                      .astype(o_ref.dtype))

    if n_k == 1:
        epilogue(partial)
    else:
        @pl.when(k == 0)
        def _():
            acc_ref[...] = jnp.zeros_like(acc_ref)

        acc_ref[...] += partial

        @pl.when(k == n_k - 1)
        def _():
            epilogue(acc_ref[...])


def _tpu_vmem_and_mxu():
    """Best-effort query of per-core VMEM capacity and MXU width (generation-aware)."""
    vmem_bytes = 64 * 1024 * 1024      # safe on every generation if the query fails
    mxu_n = 256
    try:
        info = pltpu.get_tpu_info()
        for name in ("vmem_capacity_bytes", "vmem_bytes", "vmem_size_bytes"):
            v = getattr(info, name, None)
            if isinstance(v, int) and v > 0:
                vmem_bytes = v
                break
    except Exception:
        pass
    try:
        kind = jax.devices()[0].device_kind.lower()
        # 128x128 MXU generations.
        if any(s in kind for s in ("v2", "v3", "v4", "v5 lite", "v5e", "v5lite", "v5p")):
            mxu_n = 128
    except Exception:
        pass
    return vmem_bytes, mxu_n


def _select_tiling(B, H, W, Cin, Cout, in_bytes, cpt_bytes, mxu_n, vmem_budget):
    cout_pad = _round_up(Cout, 128)
    t_cout = 256 if (mxu_n >= 256 and cout_pad % 256 == 0) else 128
    n_j = cout_pad // t_cout

    # Cin tile candidates: full Cin first (removes the reduction axis -> the
    # input slab is never re-streamed per Cout tile), then large divisors.
    cin_cands = [Cin] + [c for c in (512, 384, 256, 128, 64, 32, 16, 8)
                         if c < Cin and Cin % c == 0]
    nb_cands = [d for d in range(B, 0, -1) if B % d == 0]

    def vmem_usage(nb, t_cin):
        m = nb * H * W
        x_blk = nb * H * W * t_cin * in_bytes            # double buffered
        xsh = 3 * nb * (H + 2) * W * t_cin * cpt_bytes   # shifted-slab scratch
        w_blk = 9 * t_cin * t_cout * cpt_bytes           # double buffered
        o_blk = nb * H * W * t_cout * in_bytes           # double buffered
        acc = m * t_cout * 4 if t_cin < Cin else 0
        tmp = m * t_cin * cpt_bytes + 2 * m * t_cout * 4
        return 2 * x_blk + xsh + 2 * w_blk + 2 * o_blk + acc + tmp + (2 << 20)

    nb, t_cin = 1, cin_cands[-1]
    found = False
    for tc in cin_cands:
        for d in nb_cands:
            if vmem_usage(d, tc) <= vmem_budget:
                nb, t_cin = d, tc
                found = True
                break
        if found:
            break
    # TODO(synk): for very large H*W on v7x (64 MiB VMEM), add an H-row grid
    # axis with a 1-row halo instead of only shrinking t_cin / nb.

    # Keep >= 2 parallel grid tiles so dual-TC chips (v7x) have work on both
    # cores, while still folding as many batches as possible.
    if (B // nb) * n_j < 2 and B > 1:
        for d in nb_cands:
            if (B // d) * n_j >= 2 and vmem_usage(d, t_cin) <= vmem_budget:
                nb = d
                break

    return nb, t_cin, t_cout, cout_pad, n_j


def center_block(x_nchw, weight_oihw, gamma, beta, running_mean, running_var,
                 eps=1e-5, use_bf16_mxu=True):
    """CenterBlock forward: ReLU(BN_eval(Conv3x3(x, stride=1, pad=1, bias=False)))."""
    B, Cin, H, W = x_nchw.shape
    Cout = weight_oihw.shape[0]

    in_dt = x_nchw.dtype
    cpt_dt = jnp.bfloat16 if (use_bf16_mxu and in_dt == jnp.float32) else in_dt
    in_bytes = jnp.dtype(in_dt).itemsize
    cpt_bytes = jnp.dtype(cpt_dt).itemsize

    vmem_cap, mxu_n = _tpu_vmem_and_mxu()
    vmem_limit = min(int(vmem_cap * 0.80), 112 * 1024 * 1024)

    nb, t_cin, t_cout, cout_pad, n_j = _select_tiling(
        B, H, W, Cin, Cout, in_bytes, cpt_bytes, mxu_n, vmem_limit)
    n_k = Cin // t_cin

    # ---------------- layout prep (wrapper side) ----------------
    # TODO(synk): keep the surrounding model NHWC end-to-end so this transpose
    # (a full HBM round trip) disappears; the 1-pixel halo is now built in VMEM
    # inside the kernel, so there is no wrapper-side jnp.pad anymore.
    x_nhwc = jnp.transpose(x_nchw, (0, 2, 3, 1))                 # (B, H, W, Cin)

    # OIHW -> rows ordered (cin_tile, kh, kw, cin_within_tile), cols = Cout_pad,
    # matching the in-kernel tap order (t = kh*3 + kw).
    w = jnp.transpose(weight_oihw, (2, 3, 1, 0))                 # (3, 3, Cin, Cout)
    w = w.reshape(3, 3, n_k, t_cin, Cout).transpose(2, 0, 1, 3, 4)
    w = w.reshape(n_k * 9 * t_cin, Cout)
    w = jnp.pad(w, ((0, 0), (0, cout_pad - Cout))).astype(cpt_dt)

    # Fold BatchNorm (inference) into per-channel scale / bias; f32 epilogue.
    scale = (gamma / jnp.sqrt(running_var + eps)).astype(jnp.float32)
    bias = (beta - running_mean * scale).astype(jnp.float32)
    scale = jnp.pad(scale, (0, cout_pad - Cout)).reshape(1, cout_pad)
    bias = jnp.pad(bias, (0, cout_pad - Cout)).reshape(1, cout_pad)

    acc_shape = (nb * H * W, t_cout) if n_k > 1 else (8, 128)    # dummy if unused
    kernel = functools.partial(_centerblock_kernel, n_k=n_k)

    out_nhwc = pl.pallas_call(
        kernel,
        out_shape=jax.ShapeDtypeStruct((B, H, W, cout_pad), in_dt),
        grid_spec=pltpu.PrefetchScalarGridSpec(
            num_scalar_prefetch=0,
            grid=(B // nb, n_j, n_k),
            in_specs=[
                pl.BlockSpec((nb, H, W, t_cin), lambda b, j, k: (b, 0, 0, k)),
                pl.BlockSpec((9 * t_cin, t_cout), lambda b, j, k: (k, j)),
                pl.BlockSpec((1, t_cout), lambda b, j, k: (0, j)),
                pl.BlockSpec((1, t_cout), lambda b, j, k: (0, j)),
            ],
            out_specs=pl.BlockSpec((nb, H, W, t_cout),
                                   lambda b, j, k: (b, 0, 0, j)),
            scratch_shapes=[
                pltpu.VMEM((3, nb, H + 2, W, t_cin), cpt_dt),
                pltpu.VMEM(acc_shape, jnp.float32),
            ],
        ),
        compiler_params=pltpu.CompilerParams(
            dimension_semantics=("parallel", "parallel", "arbitrary"),
            vmem_limit_bytes=vmem_limit,
        ),
    )(x_nhwc, w, scale, bias)

    out_nhwc = out_nhwc[..., :Cout]              # drop lane-padding channels
    return jnp.transpose(out_nhwc, (0, 3, 1, 2))


if __name__ == "__main__":
    in_channels, out_channels = 4, 8
    B, H, W = 2, 16, 16

    key = jax.random.PRNGKey(0)
    k_x, k_w, k_g, k_b, k_m, k_v = jax.random.split(key, 6)

    x = jax.random.normal(k_x, (B, in_channels, H, W), jnp.float32)
    weight = jax.random.normal(k_w, (out_channels, in_channels, 3, 3),
                               jnp.float32) * 0.1
    gamma = 1.0 + 0.1 * jax.random.normal(k_g, (out_channels,), jnp.float32)
    beta = 0.1 * jax.random.normal(k_b, (out_channels,), jnp.float32)
    running_mean = 0.1 * jax.random.normal(k_m, (out_channels,), jnp.float32)
    running_var = jnp.abs(1.0 + 0.1 * jax.random.normal(k_v, (out_channels,),
                                                        jnp.float32))

    out = center_block(x, weight, gamma, beta, running_mean, running_var)
    out = jax.block_until_ready(out)

    # Pure-JAX f32 reference (Conv2d(bias=False) + BN(eval) + ReLU).
    eps = 1e-5
    ref = jax.lax.conv_general_dilated(
        x, weight, window_strides=(1, 1), padding=((1, 1), (1, 1)),
        dimension_numbers=("NCHW", "OIHW", "NCHW"))
    s = gamma / jnp.sqrt(running_var + eps)
    b = beta - running_mean * s
    ref = jnp.maximum(ref * s.reshape(1, -1, 1, 1) + b.reshape(1, -1, 1, 1), 0.0)

    assert out.shape == (B, out_channels, H, W)
    # bf16 MXU inputs with an f32 accumulator: relaxed tolerance vs the f32 ref.
    assert jnp.allclose(out, ref, rtol=5e-2, atol=5e-2), "mismatch vs reference"

    print("KERNEL_OK")
</pallas_src>

<mosaic_0001>
module attributes {stable_mosaic.version = 11 : i64} {
  func.func @_centerblock_kernel(%arg0: i32, %arg1: i32, %arg2: i32, %arg3: memref<1x16x16x4xf32, #tpu.memory_space<vmem>>, %arg4: memref<36x128xbf16, #tpu.memory_space<vmem>>, %arg5: memref<1x128xf32, #tpu.memory_space<vmem>>, %arg6: memref<1x128xf32, #tpu.memory_space<vmem>>, %arg7: memref<1x16x16x128xf32, #tpu.memory_space<vmem>>, %arg8: memref<3x1x18x16x4xbf16, #tpu.memory_space<vmem>>, %arg9: memref<8x128xf32, #tpu.memory_space<vmem>>) attributes {dimension_semantics = [#tpu.dimension_semantics<parallel>, #tpu.dimension_semantics<parallel>, #tpu.dimension_semantics<arbitrary>], iteration_bounds = array<i64: 2, 1, 1>, scalar_prefetch = 0 : i64, scratch_operands = 2 : i64, tpu.core_type = #tpu.core_type<tc>, window_params = [{transform_indices = @transform_0, window_bounds = array<i64: 1, 16, 16, 4>}, {transform_indices = @transform_1, window_bounds = array<i64: 36, 128>}, {transform_indices = @transform_2, window_bounds = array<i64: 1, 128>}, {transform_indices = @transform_3, window_bounds = array<i64: 1, 128>}, {transform_indices = @transform_4, window_bounds = array<i64: 1, 16, 16, 128>}]} {
    %c0_i32 = arith.constant 0 : i32
    %0 = arith.cmpi eq, %arg1, %c0_i32 : i32
    %1 = arith.extui %0 : i1 to i32
    %c0_i32_0 = arith.constant 0 : i32
    %2 = arith.cmpi ne, %1, %c0_i32_0 : i32
    scf.if %2 {
      %cst_62 = arith.constant 0.000000e+00 : bf16
      %71 = vector.broadcast %cst_62 : bf16 to vector<3x1x18x16x4xbf16>
      %c0_63 = arith.constant 0 : index
      %c0_64 = arith.constant 0 : index
      %c0_65 = arith.constant 0 : index
      %c0_66 = arith.constant 0 : index
      %c0_67 = arith.constant 0 : index
      %72 = vector.load %arg8[%c0_63, %c0_64, %c0_65, %c0_66, %c0_67] : memref<3x1x18x16x4xbf16, #tpu.memory_space<vmem>>, vector<3x1x18x16x4xbf16>
      tpu.vector_store %arg8[%c0_63, %c0_64, %c0_65, %c0_66, %c0_67], %71 {strides = array<i32>} : memref<3x1x18x16x4xbf16, #tpu.memory_space<vmem>>, vector<3x1x18x16x4xbf16>,
      %c0_68 = arith.constant 0 : index
      %c0_69 = arith.constant 0 : index
      %c0_70 = arith.constant 0 : index
      %c0_71 = arith.constant 0 : index
      %73 = vector.load %arg3[%c0_68, %c0_69, %c0_70, %c0_71] : memref<1x16x16x4xf32, #tpu.memory_space<vmem>>, vector<1x16x16x4xf32>
      %74 = arith.truncf %73 : vector<1x16x16x4xf32> to vector<1x16x16x4xbf16>
      %c1_72 = arith.constant 1 : index
      %c0_73 = arith.constant 0 : index
      %c1_74 = arith.constant 1 : index
      %c0_75 = arith.constant 0 : index
      %c0_76 = arith.constant 0 : index
      %75 = vector.load %arg8[%c1_72, %c0_73, %c1_74, %c0_75, %c0_76] : memref<3x1x18x16x4xbf16, #tpu.memory_space<vmem>>, vector<1x1x16x16x4xbf16>
      %76 = vector.shape_cast %75 : vector<1x1x16x16x4xbf16> to vector<1x16x16x4xbf16>
      %77 = vector.shape_cast %74 : vector<1x16x16x4xbf16> to vector<1x1x16x16x4xbf16>
      tpu.vector_store %arg8[%c1_72, %c0_73, %c1_74, %c0_75, %c0_76], %77 {strides = array<i32>} : memref<3x1x18x16x4xbf16, #tpu.memory_space<vmem>>, vector<1x1x16x16x4xbf16>,
      %78 = vector.extract_strided_slice %74 {offsets = [0, 0, 0, 0], sizes = [1, 16, 15, 4], strides = [1, 1, 1, 1]} : vector<1x16x16x4xbf16> to vector<1x16x15x4xbf16>
      %c0_77 = arith.constant 0 : index
      %c0_78 = arith.constant 0 : index
      %c1_79 = arith.constant 1 : index
      %c1_80 = arith.constant 1 : index
      %c0_81 = arith.constant 0 : index
      %79 = vector.load %arg8[%c0_77, %c0_78, %c1_79, %c1_80, %c0_81] : memref<3x1x18x16x4xbf16, #tpu.memory_space<vmem>>, vector<1x1x16x15x4xbf16>
      %80 = vector.shape_cast %79 : vector<1x1x16x15x4xbf16> to vector<1x16x15x4xbf16>
      %81 = vector.shape_cast %78 : vector<1x16x15x4xbf16> to vector<1x1x16x15x4xbf16>
      tpu.vector_store %arg8[%c0_77, %c0_78, %c1_79, %c1_80, %c0_81], %81 {strides = array<i32>} : memref<3x1x18x16x4xbf16, #tpu.memory_space<vmem>>, vector<1x1x16x15x4xbf16>,
      %82 = vector.extract_strided_slice %74 {offsets = [0, 0, 1, 0], sizes = [1, 16, 15, 4], strides = [1, 1, 1, 1]} : vector<1x16x16x4xbf16> to vector<1x16x15x4xbf16>
      %c2_82 = arith.constant 2 : index
      %c0_83 = arith.constant 0 : index
      %c1_84 = arith.constant 1 : index
      %c0_85 = arith.constant 0 : index
      %c0_86 = arith.constant 0 : index
      %83 = vector.load %arg8[%c2_82, %c0_83, %c1_84, %c0_85, %c0_86] : memref<3x1x18x16x4xbf16, #tpu.memory_space<vmem>>, vector<1x1x16x15x4xbf16>
      %84 = vector.shape_cast %83 : vector<1x1x16x15x4xbf16> to vector<1x16x15x4xbf16>
      %85 = vector.shape_cast %82 : vector<1x16x15x4xbf16> to vector<1x1x16x15x4xbf16>
      tpu.vector_store %arg8[%c2_82, %c0_83, %c1_84, %c0_85, %c0_86], %85 {strides = array<i32>} : memref<3x1x18x16x4xbf16, #tpu.memory_space<vmem>>, vector<1x1x16x15x4xbf16>,
    } else {
    }
    %c0 = arith.constant 0 : index
    %c0_1 = arith.constant 0 : index
    %3 = vector.load %arg4[%c0, %c0_1] : memref<36x128xbf16, #tpu.memory_space<vmem>>, vector<36x128xbf16>
    %c0_2 = arith.constant 0 : index
    %c0_3 = arith.constant 0 : index
    %c0_4 = arith.constant 0 : index
    %c0_5 = arith.constant 0 : index
    %c0_6 = arith.constant 0 : index
    %4 = vector.load %arg8[%c0_2, %c0_3, %c0_4, %c0_5, %c0_6] : memref<3x1x18x16x4xbf16, #tpu.memory_space<vmem>>, vector<1x1x16x16x4xbf16>
    %5 = vector.shape_cast %4 : vector<1x1x16x16x4xbf16> to vector<1x16x16x4xbf16>
    %6 = vector.shape_cast %5 : vector<1x16x16x4xbf16> to vector<256x4xbf16>
    %7 = vector.extract_strided_slice %3 {offsets = [0, 0], sizes = [4, 128], strides = [1, 1]} : vector<36x128xbf16> to vector<4x128xbf16>
    %cst = arith.constant dense<0.000000e+00> : vector<256x128xf32>
    %8 = tpu.matmul %6, %7, %cst {dimension_numbers = #tpu.dot_dimension_numbers<[1], [0], [0], [1], [0, 0, 1, 1], [], []>} : vector<256x4xbf16>, vector<4x128xbf16>, vector<256x128xf32> -> vector<256x128xf32>
    %c1 = arith.constant 1 : index
    %c0_7 = arith.constant 0 : index
    %c0_8 = arith.constant 0 : index
    %c0_9 = arith.constant 0 : index
    %c0_10 = arith.constant 0 : index
    %9 = vector.load %arg8[%c1, %c0_7, %c0_8, %c0_9, %c0_10] : memref<3x1x18x16x4xbf16, #tpu.memory_space<vmem>>, vector<1x1x16x16x4xbf16>
    %10 = vector.shape_cast %9 : vector<1x1x16x16x4xbf16> to vector<1x16x16x4xbf16>
    %11 = vector.shape_cast %10 : vector<1x16x16x4xbf16> to vector<256x4xbf16>
    %12 = vector.extract_strided_slice %3 {offsets = [4, 0], sizes = [4, 128], strides = [1, 1]} : vector<36x128xbf16> to vector<4x128xbf16>
    %cst_11 = arith.constant dense<0.000000e+00> : vector<256x128xf32>
    %13 = tpu.matmul %11, %12, %cst_11 {dimension_numbers = #tpu.dot_dimension_numbers<[1], [0], [0], [1], [0, 0, 1, 1], [], []>} : vector<256x4xbf16>, vector<4x128xbf16>, vector<256x128xf32> -> vector<256x128xf32>
    %14 = arith.addf %8, %13 : vector<256x128xf32>
    %c2 = arith.constant 2 : index
    %c0_12 = arith.constant 0 : index
    %c0_13 = arith.constant 0 : index
    %c0_14 = arith.constant 0 : index
    %c0_15 = arith.constant 0 : index
    %15 = vector.load %arg8[%c2, %c0_12, %c0_13, %c0_14, %c0_15] : memref<3x1x18x16x4xbf16, #tpu.memory_space<vmem>>, vector<1x1x16x16x4xbf16>
    %16 = vector.shape_cast %15 : vector<1x1x16x16x4xbf16> to vector<1x16x16x4xbf16>
    %17 = vector.shape_cast %16 : vector<1x16x16x4xbf16> to vector<256x4xbf16>
    %18 = vector.extract_strided_slice %3 {offsets = [8, 0], sizes = [4, 128], strides = [1, 1]} : vector<36x128xbf16> to vector<4x128xbf16>
    %cst_16 = arith.constant dense<0.000000e+00> : vector<256x128xf32>
    %19 = tpu.matmul %17, %18, %cst_16 {dimension_numbers = #tpu.dot_dimension_numbers<[1], [0], [0], [1], [0, 0, 1, 1], [], []>} : vector<256x4xbf16>, vector<4x128xbf16>, vector<256x128xf32> -> vector<256x128xf32>
    %20 = arith.addf %14, %19 : vector<256x128xf32>
    %c0_17 = arith.constant 0 : index
    %c0_18 = arith.constant 0 : index
    %c1_19 = arith.constant 1 : index
    %c0_20 = arith.constant 0 : index
    %c0_21 = arith.constant 0 : index
    %21 = vector.load %arg8[%c0_17, %c0_18, %c1_19, %c0_20, %c0_21] : memref<3x1x18x16x4xbf16, #tpu.memory_space<vmem>>, vector<1x1x16x16x4xbf16>
    %22 = vector.shape_cast %21 : vector<1x1x16x16x4xbf16> to vector<1x16x16x4xbf16>
    %23 = vector.shape_cast %22 : vector<1x16x16x4xbf16> to vector<256x4xbf16>
    %24 = vector.extract_strided_slice %3 {offsets = [12, 0], sizes = [4, 128], strides = [1, 1]} : vector<36x128xbf16> to vector<4x128xbf16>
    %cst_22 = arith.constant dense<0.000000e+00> : vector<256x128xf32>
    %25 = tpu.matmul %23, %24, %cst_22 {dimension_numbers = #tpu.dot_dimension_numbers<[1], [0], [0], [1], [0, 0, 1, 1], [], []>} : vector<256x4xbf16>, vector<4x128xbf16>, vector<256x128xf32> -> vector<256x128xf32>
    %26 = arith.addf %20, %25 : vector<256x128xf32>
    %c1_23 = arith.constant 1 : index
    %c0_24 = arith.constant 0 : index
    %c1_25 = arith.constant 1 : index
    %c0_26 = arith.constant 0 : index
    %c0_27 = arith.constant 0 : index
    %27 = vector.load %arg8[%c1_23, %c0_24, %c1_25, %c0_26, %c0_27] : memref<3x1x18x16x4xbf16, #tpu.memory_space<vmem>>, vector<1x1x16x16x4xbf16>
    %28 = vector.shape_cast %27 : vector<1x1x16x16x4xbf16> to vector<1x16x16x4xbf16>
    %29 = vector.shape_cast %28 : vector<1x16x16x4xbf16> to vector<256x4xbf16>
    %30 = vector.extract_strided_slice %3 {offsets = [16, 0], sizes = [4, 128], strides = [1, 1]} : vector<36x128xbf16> to vector<4x128xbf16>
    %cst_28 = arith.constant dense<0.000000e+00> : vector<256x128xf32>
    %31 = tpu.matmul %29, %30, %cst_28 {dimension_numbers = #tpu.dot_dimension_numbers<[1], [0], [0], [1], [0, 0, 1, 1], [], []>} : vector<256x4xbf16>, vector<4x128xbf16>, vector<256x128xf32> -> vector<256x128xf32>
    %32 = arith.addf %26, %31 : vector<256x128xf32>
    %c2_29 = arith.constant 2 : index
    %c0_30 = arith.constant 0 : index
    %c1_31 = arith.constant 1 : index
    %c0_32 = arith.constant 0 : index
    %c0_33 = arith.constant 0 : index
    %33 = vector.load %arg8[%c2_29, %c0_30, %c1_31, %c0_32, %c0_33] : memref<3x1x18x16x4xbf16, #tpu.memory_space<vmem>>, vector<1x1x16x16x4xbf16>
    %34 = vector.shape_cast %33 : vector<1x1x16x16x4xbf16> to vector<1x16x16x4xbf16>
    %35 = vector.shape_cast %34 : vector<1x16x16x4xbf16> to vector<256x4xbf16>
    %36 = vector.extract_strided_slice %3 {offsets = [20, 0], sizes = [4, 128], strides = [1, 1]} : vector<36x128xbf16> to vector<4x128xbf16>
    %cst_34 = arith.constant dense<0.000000e+00> : vector<256x128xf32>
    %37 = tpu.matmul %35, %36, %cst_34 {dimension_numbers = #tpu.dot_dimension_numbers<[1], [0], [0], [1], [0, 0, 1, 1], [], []>} : vector<256x4xbf16>, vector<4x128xbf16>, vector<256x128xf32> -> vector<256x128xf32>
    %38 = arith.addf %32, %37 : vector<256x128xf32>
    %c0_35 = arith.constant 0 : index
    %c0_36 = arith.constant 0 : index
    %c2_37 = arith.constant 2 : index
    %c0_38 = arith.constant 0 : index
    %c0_39 = arith.constant 0 : index
    %39 = vector.load %arg8[%c0_35, %c0_36, %c2_37, %c0_38, %c0_39] : memref<3x1x18x16x4xbf16, #tpu.memory_space<vmem>>, vector<1x1x16x16x4xbf16>
    %40 = vector.shape_cast %39 : vector<1x1x16x16x4xbf16> to vector<1x16x16x4xbf16>
    %41 = vector.shape_cast %40 : vector<1x16x16x4xbf16> to vector<256x4xbf16>
    %42 = vector.extract_strided_slice %3 {offsets = [24, 0], sizes = [4, 128], strides = [1, 1]} : vector<36x128xbf16> to vector<4x128xbf16>
    %cst_40 = arith.constant dense<0.000000e+00> : vector<256x128xf32>
    %43 = tpu.matmul %41, %42, %cst_40 {dimension_numbers = #tpu.dot_dimension_numbers<[1], [0], [0], [1], [0, 0, 1, 1], [], []>} : vector<256x4xbf16>, vector<4x128xbf16>, vector<256x128xf32> -> vector<256x128xf32>
    %44 = arith.addf %38, %43 : vector<256x128xf32>
    %c1_41 = arith.constant 1 : index
    %c0_42 = arith.constant 0 : index
    %c2_43 = arith.constant 2 : index
    %c0_44 = arith.constant 0 : index
    %c0_45 = arith.constant 0 : index
    %45 = vector.load %arg8[%c1_41, %c0_42, %c2_43, %c0_44, %c0_45] : memref<3x1x18x16x4xbf16, #tpu.memory_space<vmem>>, vector<1x1x16x16x4xbf16>
    %46 = vector.shape_cast %45 : vector<1x1x16x16x4xbf16> to vector<1x16x16x4xbf16>
    %47 = vector.shape_cast %46 : vector<1x16x16x4xbf16> to vector<256x4xbf16>
    %48 = vector.extract_strided_slice %3 {offsets = [28, 0], sizes = [4, 128], strides = [1, 1]} : vector<36x128xbf16> to vector<4x128xbf16>
    %cst_46 = arith.constant dense<0.000000e+00> : vector<256x128xf32>
    %49 = tpu.matmul %47, %48, %cst_46 {dimension_numbers = #tpu.dot_dimension_numbers<[1], [0], [0], [1], [0, 0, 1, 1], [], []>} : vector<256x4xbf16>, vector<4x128xbf16>, vector<256x128xf32> -> vector<256x128xf32>
    %50 = arith.addf %44, %49 : vector<256x128xf32>
    %c2_47 = arith.constant 2 : index
    %c0_48 = arith.constant 0 : index
    %c2_49 = arith.constant 2 : index
    %c0_50 = arith.constant 0 : index
    %c0_51 = arith.constant 0 : index
    %51 = vector.load %arg8[%c2_47, %c0_48, %c2_49, %c0_50, %c0_51] : memref<3x1x18x16x4xbf16, #tpu.memory_space<vmem>>, vector<1x1x16x16x4xbf16>
    %52 = vector.shape_cast %51 : vector<1x1x16x16x4xbf16> to vector<1x16x16x4xbf16>
    %53 = vector.shape_cast %52 : vector<1x16x16x4xbf16> to vector<256x4xbf16>
    %54 = vector.extract_strided_slice %3 {offsets = [32, 0], sizes = [4, 128], strides = [1, 1]} : vector<36x128xbf16> to vector<4x128xbf16>
    %cst_52 = arith.constant dense<0.000000e+00> : vector<256x128xf32>
    %55 = tpu.matmul %53, %54, %cst_52 {dimension_numbers = #tpu.dot_dimension_numbers<[1], [0], [0], [1], [0, 0, 1, 1], [], []>} : vector<256x4xbf16>, vector<4x128xbf16>, vector<256x128xf32> -> vector<256x128xf32>
    %56 = arith.addf %50, %55 : vector<256x128xf32>
    %c0_53 = arith.constant 0 : index
    %c0_54 = arith.constant 0 : index
    %57 = vector.load %arg5[%c0_53, %c0_54] : memref<1x128xf32, #tpu.memory_space<vmem>>, vector<1x128xf32>
    %58 = vector.shape_cast %57 : vector<1x128xf32> to vector<128xf32>
    %59 = vector.shape_cast %58 : vector<128xf32> to vector<1x128xf32>
    %60 = vector.broadcast %59 : vector<1x128xf32> to vector<256x128xf32>
    %61 = arith.mulf %56, %60 : vector<256x128xf32>
    %c0_55 = arith.constant 0 : index
    %c0_56 = arith.constant 0 : index
    %62 = vector.load %arg6[%c0_55, %c0_56] : memref<1x128xf32, #tpu.memory_space<vmem>>, vector<1x128xf32>
    %63 = vector.shape_cast %62 : vector<1x128xf32> to vector<128xf32>
    %64 = vector.shape_cast %63 : vector<128xf32> to vector<1x128xf32>
    %65 = vector.broadcast %64 : vector<1x128xf32> to vector<256x128xf32>
    %66 = arith.addf %61, %65 : vector<256x128xf32>
    %cst_57 = arith.constant 0.000000e+00 : f32
    %67 = vector.broadcast %cst_57 : f32 to vector<256x128xf32>
    %68 = arith.maximumf %66, %67 : vector<256x128xf32>
    %69 = vector.shape_cast %68 : vector<256x128xf32> to vector<1x16x16x128xf32>
    %c0_58 = arith.constant 0 : index
    %c0_59 = arith.constant 0 : index
    %c0_60 = arith.constant 0 : index
    %c0_61 = arith.constant 0 : index
    %70 = vector.load %arg7[%c0_58, %c0_59, %c0_60, %c0_61] : memref<1x16x16x128xf32, #tpu.memory_space<vmem>>, vector<1x16x16x128xf32>
    tpu.vector_store %arg7[%c0_58, %c0_59, %c0_60, %c0_61], %69 {strides = array<i32>} : memref<1x16x16x128xf32, #tpu.memory_space<vmem>>, vector<1x16x16x128xf32>,
    return
  }
  func.func @transform_0(%arg0: i32, %arg1: i32, %arg2: i32) -> (i32, i32, i32, i32) {
    %c0_i32 = arith.constant 0 : i32
    %c0_i32_0 = arith.constant 0 : i32
    %c0_i32_1 = arith.constant 0 : i32
    return %arg0, %c0_i32, %c0_i32_0, %arg2 : i32, i32, i32, i32
  }
  func.func @transform_1(%arg0: i32, %arg1: i32, %arg2: i32) -> (i32, i32) {
    %c0_i32 = arith.constant 0 : i32
    return %arg2, %arg1 : i32, i32
  }
  func.func @transform_2(%arg0: i32, %arg1: i32, %arg2: i32) -> (i32, i32) {
    %c0_i32 = arith.constant 0 : i32
    %c0_i32_0 = arith.constant 0 : i32
    return %c0_i32, %arg1 : i32, i32
  }
  func.func @transform_3(%arg0: i32, %arg1: i32, %arg2: i32) -> (i32, i32) {
    %c0_i32 = arith.constant 0 : i32
    %c0_i32_0 = arith.constant 0 : i32
    return %c0_i32, %arg1 : i32, i32
  }
  func.func @transform_4(%arg0: i32, %arg1: i32, %arg2: i32) -> (i32, i32, i32, i32) {
    %c0_i32 = arith.constant 0 : i32
    %c0_i32_0 = arith.constant 0 : i32
    %c0_i32_1 = arith.constant 0 : i32
    return %arg0, %c0_i32, %c0_i32_0, %arg1 : i32, i32, i32, i32
  }
}

</mosaic_0001>

<bundles_post_ra>
// kernel: tpu_custom_call.1
= control target key start
LH: loop header
LB: loop body
LE: loop exit
PB: predicated region body
PF: predicated region fallthrough
CT: control target
= control target key end

     0   :  { %9 = vsyncpa [#allocation5], 0  ;;  %s6175_s0 = inlined_call_operand.vmem [shape: f32[2,16,16,4], index: 0, kind: input, shape index: {}]   ;;  %s6176_s1 = inlined_call_operand.vmem [shape: bf16[36,128], index: 1, kind: input, shape index: {}]   ;;  %s6177_s2 = inlined_call_operand.vmem [shape: f32[1,128], index: 2, kind: input, shape index: {}]   ;;  %s6178_s3 = inlined_call_operand.vmem [shape: f32[1,128], index: 3, kind: input, shape index: {}]   ;;  %s6179_s4 = inlined_call_operand.hbm [shape: f32[2,16,16,128], index: 4, kind: output, shape index: {}]  }
   0x1   :  { %11 = vsyncpa [#allocation5 + $0x1], 0  ;;  %s4956_s15 = smov 0   ;;  %s4958_s16 = smov 0  }
   0x2   :  { %s4960_s17 = smov 0   ;;  %s4962_s18 = smov 0  }
   0x3   :  { %s4964_s19 = smov 0   ;;  %s4966_s20 = smov 0  }
   0x4 LB: > { %s3903_s21 = sadd.s32 4294967295, %s4926_s20   ;;  %s3904_s22 = sadd.s32 4294967294, %s4926_s20   ;;  %s4926_s20 = sphi %s4966_s20, %s17_s20   ;;  %s4922_s19 = sphi %s4964_s19, %s6210_s19   ;;  %s4918_s18 = sphi %s4962_s18, %s6209_s18   ;;  %s4914_s17 = sphi %s4960_s17, %s6208_s17   ;;  %s4910_s16 = sphi %s4958_s16, %s6207_s16   ;;  %s4906_s15 = sphi %s4956_s15, %s6206_s15  }
   0x5   : > { %s36_s23 = sadd.s32 1, %s4922_s19  ;;  %s153_s24 = sadd.s32 1, %s4914_s17 }
   0x6   : > { %p38_p0 = scmp.ge.s32.totalorder %s36_s23, 2  ;;  %p163_p1 = scmp.ne.s32.totalorder %s4914_s17, %s4910_s16 }
   0x7   : > { %p164_p2 = scmp.eq.s32.totalorder %s3903_s21, 1  ;;  %p169_p3 = scmp.ne.s32.totalorder %s4910_s16, %s4906_s15 }
   0x8   : > { %s6212_s23 = smov (%p38_p0, %s36_s23), 0  ;;  %p170_p5 = scmp.eq.s32.totalorder %s3904_s22, 1 }
   0x9   : > { %p4996_p4 = por %p164_p2, %p163_p1  ;;  %s148_s26 = ssub.s32 %s4922_s19, %s6212_s23 }
   0xa   : > { %p3910_p6 = scmp.ge.s32.totalorder %s4926_s20, 1  ;;  %p151_p7 = scmp.eq.s32.totalorder %s148_s26, 0 }
   0xb   : > { %p5003_p8 = por %p170_p5, %p169_p3  ;;  %p223_p9 = scmp.lt.s32.totalorder %s4926_s20, 3 }
   0xc   : > { %s5009_s28 = scalar_select %p151_p7, %s4914_s17, %s153_s24  }
   0xd   : > { %p224_p10 = pnand %p3910_p6, %p223_p9 }
   0xf   : > { %227 = sbr.rel (%p224_p10) target bundleno = 856 (0x358), region = 36 }
  0x14   : > { %v5014_v0 = vld [vmem:[%s6176_s1] sm:$0xf]  ;;  %p266_p11 = scmp.lt.s32.totalorder %s4918_s18, 1  ;;  %vm294_vm0 = vcmask 27648   ;;  %v4928_v2 = vmov 0   ;;  %vm1307_vm1 = vcmask 1041408  }
  0x15   : > { %v1255_v1 = vunpack.c.l.b16 %v5014_v0  ;;  %339 = vst.msk [vmem:[#allocation2 + $0xb0] sm:$0xf] %vm294_vm0, %v4928_v2  ;;  %vm1258_vm2 = vcmask 31744   ;;  %v1105_v11 = vld [vmem:[%s6176_s1 + $0x4] sm:$0xf]  ;;  %v1529_v15 = vsel %vm1307_vm1, %v5014_v0, 0 }
  0x16   : > { %s267_s5 = scalar_select %p266_p11, %s4918_s18, 1  ;;  %340 = vst.msk [vmem:[#allocation2 + $0xb4] sm:$0xf] %vm294_vm0, %v4928_v2  ;;  %v1782_v13 = vsel %vm1307_vm1, %v1105_v11, 0  ;;  %v2019_v14 = vunpack.c.l.b16 %v1105_v11  ;;  %v5227_v16 = vld [vmem:[%s6176_s1 + $0x8] sm:$0xf] }
  0x17   : > { %v1256_v3 = vpack.c.b16 %v1255_v1, %v1255_v1  ;;  %295 = vst.msk [vmem:[#allocation2] sm:$0xf] %vm294_vm0, %v4928_v2  ;;  %v2356_v17 = vsel %vm1307_vm1, %v5227_v16, 0  ;;  %vm500_vm3 = vsmask.f32 256  ;;  %s263_s30 = sand.u32 1, %s4910_s16  }
  0x18   : > { %s4639_s6 = sshll.u32 %s267_s5, 8  ;;  %296 = vst.msk [vmem:[#allocation2 + $0x4] sm:$0xf] %vm294_vm0, %v4928_v2  ;;  %v2020_v18 = vpack.c.b16 %v2019_v14, %v2019_v14  ;;  %vm501_vm4 = vsmask.f32 4368  ;;  %s3911_s7 = sshll.u32 %s263_s30, 8 }
  0x19   : > { %v1257_v4 = vrot.slane %v1256_v3, 2  ;;  %s5030_s9 = scalar_lea.vmem %s6175_s0, %s4639_s6  ;;  %297 = vst.msk [vmem:[#allocation2 + $0x8] sm:$0xf] %vm294_vm0, %v4928_v2  ;;  %vm5419_vm5 = vmor %vm500_vm3, %vm501_vm4  ;;  %vm793_vm6 = vsmask.f32 7938  ;;  %s5971_s8 = scalar_lea.vmem [#allocation4], %s3911_s7 }
  0x1a   : > { %v409_v5 = vld [vmem:[%s5030_s9 + $0x30] sm:$0xff]  ;;  %v410_v6 = vld [vmem:[%s5030_s9 + $0x38] sm:$0xff]  ;;  %298 = vst.msk [vmem:[#allocation2 + $0xc] sm:$0xf] %vm294_vm0, %v4928_v2  ;;  %v2021_v19 = vrot.slane %v2020_v18, 2  ;;  %v411_v27 = vld [vmem:[%s5030_s9 + $0x40] sm:$0xff] }
  0x1b   : > { %v1309_v7 = vsel %vm1307_vm1, %v1257_v4, 0  ;;  %v5039_v8 = vpack.c.bf16 %v409_v5, %v409_v5  ;;  %v5041_v9 = vpack.c.bf16 %v410_v6, %v410_v6  ;;  %299 = vst.msk [vmem:[#allocation2 + $0x10] sm:$0xf] %vm294_vm0, %v4928_v2  ;;  %v417_v21 = vld [vmem:[%s5030_s9 + $0x70] sm:$0xff]  ;;  %v418_v22 = vld [vmem:[%s5030_s9 + $0x78] sm:$0xff]  ;;  %v412_v29 = vld [vmem:[%s5030_s9 + $0x48] sm:$0xff]  ;;  %v5284_v32 = vpack.c.bf16 %v411_v27, %v411_v27 }
  0x1c   : > { %4785 = vmatpush.bf16.msra.mxu1 %v1309_v7  ;;  %4786 = vmatpush.bf16.msra.mxu2 %v1309_v7  ;;  %300 = vst.msk [vmem:[#allocation2 + $0x14] sm:$0xf] %vm294_vm0, %v4928_v2  ;;  %v2071_v20 = vsel %vm1307_vm1, %v2021_v19, 0  ;;  %v425_v23 = vld [vmem:[%s5030_s9 + $0xb0] sm:$0xff]  ;;  %v5264_v24 = vpack.c.bf16 %v417_v21, %v417_v21  ;;  %v426_v25 = vld [vmem:[%s5030_s9 + $0xb8] sm:$0xff]  ;;  %v5269_v26 = vpack.c.bf16 %v418_v22, %v418_v22  ;;  %v419_v31 = vld [vmem:[%s5030_s9 + $0x80] sm:$0xff] }
  0x1d   : > { %4787 = vmatpush.bf16.msra.mxu3 %v1309_v7  ;;  %1318 = vmatpush.bf16.msra.mxu0 %v1309_v7  ;;  %474 = vst.msk [vmem:[#allocation2 + $0xb0] sm:$0xf] %vm294_vm0, %v5039_v8  ;;  %v5274_v28 = vpack.c.bf16 %v425_v23, %v425_v23  ;;  %v5279_v30 = vpack.c.bf16 %v426_v25, %v426_v25  ;;  %v420_v33 = vld [vmem:[%s5030_s9 + $0x88] sm:$0xff]  ;;  %v427_v35 = vld [vmem:[%s5030_s9 + $0xc0] sm:$0xff]  ;;  %v413_v43 = vld [vmem:[%s5030_s9 + $0x50] sm:$0xff]  ;;  %s3777_s13 = sshll.u32 %s5971_s8, 4  ;;  %s3778_s13 = int_to_ptr.vmem [resolvable:$true] %s3777_s13 }
  0x1e   : > { %475 = vst.msk [vmem:[#allocation2 + $0xb4] sm:$0xf] %vm294_vm0, %v5041_v9  ;;  %v5289_v34 = vpack.c.bf16 %v412_v29, %v412_v29  ;;  %v5294_v36 = vpack.c.bf16 %v419_v31, %v419_v31  ;;  %v428_v37 = vld [vmem:[%s5030_s9 + $0xc8] sm:$0xff]  ;;  %v5299_v38 = vpack.c.bf16 %v420_v33, %v420_v33  ;;  %v403_v39 = vld [vmem:[%s5030_s9] sm:$0xff]  ;;  %v5304_v40 = vpack.c.bf16 %v427_v35, %v427_v35  ;;  %v414_v45 = vld [vmem:[%s5030_s9 + $0x58] sm:$0xff]  ;;  %s4868_s29 = scalar_lea.hbm %s6179_s4, 512 }
  0x1f   : > { %301 = vst.msk [vmem:[#allocation2 + $0x18] sm:$0xf] %vm294_vm0, %v4928_v2  ;;  %v404_v41 = vld [vmem:[%s5030_s9 + $0x8] sm:$0xff]  ;;  %v5309_v42 = vpack.c.bf16 %v428_v37, %v428_v37  ;;  %v5314_v44 = vpack.c.bf16 %v403_v39, %v403_v39  ;;  %v421_v47 = vld [vmem:[%s5030_s9 + $0x90] sm:$0xff]  ;;  %v5324_v49 = vpack.c.bf16 %v413_v43, %v413_v43  ;;  %v422_v50 = vld [vmem:[%s5030_s9 + $0x98] sm:$0xff]  ;;  %v5329_v51 = vpack.c.bf16 %v414_v45, %v414_v45 }
  0x20   : > { %302 = vst.msk [vmem:[#allocation2 + $0x1c] sm:$0xf] %vm294_vm0, %v4928_v2  ;;  %1791 = vmatpush.bf16.msrb.mxu2 %v1782_v13  ;;  %1538 = vmatpush.bf16.msrb.mxu1 %v1529_v15  ;;  %v5319_v46 = vpack.c.bf16 %v404_v41, %v404_v41  ;;  %v429_v52 = vld [vmem:[%s5030_s9 + $0xd0] sm:$0xff]  ;;  %v5335_v54 = vpack.c.bf16 %v421_v47, %v421_v47  ;;  %v430_v55 = vld [vmem:[%s5030_s9 + $0xd8] sm:$0xff]  ;;  %v415_v63 = vld [vmem:[%s5030_s9 + $0x60] sm:$0xff]  ;;  %v2593_v35 = vunpack.c.l.b16 %v5227_v16 }
  0x21   : > { %303 = vst.msk [vmem:[#allocation2 + $0x20] sm:$0xf] %vm294_vm0, %v4928_v2  ;;  %2365 = vmatpush.bf16.msrb.mxu0 %v2356_v17  ;;  %2080 = vmatpush.bf16.msrb.mxu3 %v2071_v20  ;;  %v5340_v56 = vpack.c.bf16 %v422_v50, %v422_v50  ;;  %v405_v57 = vld [vmem:[%s5030_s9 + $0x10] sm:$0xff]  ;;  %v5346_v59 = vpack.c.bf16 %v429_v52, %v429_v52  ;;  %v406_v60 = vld [vmem:[%s5030_s9 + $0x18] sm:$0xff]  ;;  %v416_v0 = vld [vmem:[%s5030_s9 + $0x68] sm:$0xff]  ;;  %v504_v21 = vshrl.u32 %v5314_v44, 16 }
  0x22   : > { %304 = vst.msk [vmem:[#allocation2 + $0x24] sm:$0xf] %vm294_vm0, %v4928_v2  ;;  %v5351_v61 = vpack.c.bf16 %v430_v55, %v430_v55  ;;  %v5356_v62 = vpack.c.bf16 %v405_v57, %v405_v57  ;;  %v5362_v1 = vpack.c.bf16 %v406_v60, %v406_v60  ;;  %v5367_v3 = vpack.c.bf16 %v415_v63, %v415_v63  ;;  %v424_v4 = vld [vmem:[%s5030_s9 + $0xa8] sm:$0xff]  ;;  %v431_v6 = vld [vmem:[%s5030_s9 + $0xe0] sm:$0xff]  ;;  %vm5424_vm7 = vmand %vm294_vm0, %vm793_vm6 }
  0x23   : > { %305 = vst.msk [vmem:[#allocation2 + $0x28] sm:$0xf] %vm294_vm0, %v4928_v2  ;;  %v5372_v5 = vpack.c.bf16 %v416_v0, %v416_v0  ;;  %v432_v11 = vld [vmem:[%s5030_s9 + $0xe8] sm:$0xff]  ;;  %v5387_v13 = vpack.c.bf16 %v431_v6, %v431_v6  ;;  %v407_v14 = vld [vmem:[%s5030_s9 + $0x20] sm:$0xff]  ;;  %v512_v22 = vshrl.u32 %v5319_v46, 16  ;;  %v506_v27 = vrot.slane %v504_v21, 7 }
  0x24   : > { %306 = vst.msk [vmem:[#allocation2 + $0x2c] sm:$0xf] %vm294_vm0, %v4928_v2  ;;  %v5392_v15 = vpack.c.bf16 %v432_v11, %v432_v11  ;;  %v408_v18 = vld [vmem:[%s5030_s9 + $0x28] sm:$0xff]  ;;  %v5399_v19 = vpack.c.bf16 %v407_v14, %v407_v14  ;;  %v507_v29 = vshll.u32 %v5314_v44, 16  ;;  %v515_v33 = vshll.u32 %v5319_v46, 16 }
  0x25   : > { %v4660_v10 = vld [vmem:[#allocation2 + $0xb0] sm:$0xff]  ;;  %307 = vst.msk [vmem:[#allocation2 + $0x30] sm:$0xf] %vm294_vm0, %v4928_v2  ;;  %v5407_v23 = vpack.c.bf16 %v408_v18, %v408_v18  ;;  %v514_v31 = vrot.slane %v512_v22, 7  ;;  %v510_v41 = vrot.slane %v506_v27, 4  ;;  %v520_v57 = vshrl.u32 %v5356_v62, 16 }
  0x26   : > { %308 = vst.msk [vmem:[#allocation2 + $0x34] sm:$0xf] %vm294_vm0, %v4928_v2  ;;  %3982 = vmatmul.msk.bf16.vlgmr.msra.gmra.mxu1 %vm1258_vm2, %v4660_v10  ;;  %v509_v39 = vor.u32 %v507_v29, %v506_v27  ;;  %v795_v45 = vld [vmem:[#allocation2 + $0x8] sm:$0xf]  ;;  %v1107_v60 = vld [vmem:[%s6176_s1 + $0xc] sm:$0xf] }
  0x27   : > { %309 = vst.msk [vmem:[#allocation2 + $0x38] sm:$0xf] %vm294_vm0, %v4928_v2  ;;  %v862_v0 = vrot.slane %v504_v21, 4  ;;  %v1108_v6 = vld [vmem:[%s6176_s1 + $0x10] sm:$0x3]  ;;  %v866_v11 = vrot.slane %v515_v33, 5 }
  0x28   : > { %310 = vst.msk [vmem:[#allocation2 + $0x3c] sm:$0xf] %vm294_vm0, %v4928_v2  ;;  %v796_v47 = vsel %vm5424_vm7, %v509_v39, %v795_v45  ;;  %v3504_v14 = vsel %vm1307_vm1, %v1108_v6, 0  ;;  %vm859_vm8 = vsmask.f32 3328  ;;  %v522_v21 = vrot.slane %v520_v57, 7 }
  0x29   : > { %311 = vst.msk [vmem:[#allocation2 + $0x40] sm:$0xf] %vm294_vm0, %v4928_v2  ;;  %vm860_vm9 = vsmask.f32 7440  ;;  %vm5457_vm11 = vmand %vm294_vm0, %vm859_vm8  ;;  %v799_v45 = vld [vmem:[#allocation2 + $0x10] sm:$0xf] }
  0x2a   : > { %312 = vst.msk [vmem:[#allocation2 + $0x44] sm:$0xf] %vm294_vm0, %v4928_v2  ;;  %vm5450_vm10 = vmor %vm859_vm8, %vm860_vm9 }
  0x2b   : > { %313 = vst.msk [vmem:[#allocation2 + $0x48] sm:$0xf] %vm294_vm0, %v4928_v2 }
  0x2c   : > { %314 = vst.msk [vmem:[#allocation2 + $0x4c] sm:$0xf] %vm294_vm0, %v4928_v2 }
  0x2d   : > { %315 = vst.msk [vmem:[#allocation2 + $0x50] sm:$0xf] %vm294_vm0, %v4928_v2 }
  0x2e   : > { %316 = vst.msk [vmem:[#allocation2 + $0x54] sm:$0xf] %vm294_vm0, %v4928_v2 }
  0x2f   : > { %317 = vst.msk [vmem:[#allocation2 + $0x58] sm:$0xf] %vm294_vm0, %v4928_v2 }
  0x30   : > { %318 = vst.msk [vmem:[#allocation2 + $0x5c] sm:$0xf] %vm294_vm0, %v4928_v2 }
  0x31   : > { %319 = vst.msk [vmem:[#allocation2 + $0x60] sm:$0xf] %vm294_vm0, %v4928_v2 }
  0x32   : > { %320 = vst.msk [vmem:[#allocation2 + $0x64] sm:$0xf] %vm294_vm0, %v4928_v2 }
  0x33   : > { %321 = vst.msk [vmem:[#allocation2 + $0x68] sm:$0xf] %vm294_vm0, %v4928_v2 }
  0x34   : > { %322 = vst.msk [vmem:[#allocation2 + $0x6c] sm:$0xf] %vm294_vm0, %v4928_v2 }
  0x35   : > { %323 = vst.msk [vmem:[#allocation2 + $0x70] sm:$0xf] %vm294_vm0, %v4928_v2 }
  0x36   : > { %324 = vst.msk [vmem:[#allocation2 + $0x74] sm:$0xf] %vm294_vm0, %v4928_v2 }
  0x37   : > { %325 = vst.msk [vmem:[#allocation2 + $0x78] sm:$0xf] %vm294_vm0, %v4928_v2 }
  0x38   : > { %326 = vst.msk [vmem:[#allocation2 + $0x7c] sm:$0xf] %vm294_vm0, %v4928_v2 }
  0x39   : > { %327 = vst.msk [vmem:[#allocation2 + $0x80] sm:$0xf] %vm294_vm0, %v4928_v2 }
  0x3a   : > { %328 = vst.msk [vmem:[#allocation2 + $0x84] sm:$0xf] %vm294_vm0, %v4928_v2 }
  0x3b   : > { %329 = vst.msk [vmem:[#allocation2 + $0x88] sm:$0xf] %vm294_vm0, %v4928_v2 }
  0x3c   : > { %330 = vst.msk [vmem:[#allocation2 + $0x8c] sm:$0xf] %vm294_vm0, %v4928_v2 }
  0x3d   : > { %331 = vst.msk [vmem:[#allocation2 + $0x90] sm:$0xf] %vm294_vm0, %v4928_v2 }
  0x3e   : > { %332 = vst.msk [vmem:[#allocation2 + $0x94] sm:$0xf] %vm294_vm0, %v4928_v2 }
  0x3f   : > { %333 = vst.msk [vmem:[#allocation2 + $0x98] sm:$0xf] %vm294_vm0, %v4928_v2 }
  0x40   : > { %334 = vst.msk [vmem:[#allocation2 + $0x9c] sm:$0xf] %vm294_vm0, %v4928_v2 }
  0x41   : > { %335 = vst.msk [vmem:[#allocation2 + $0xa0] sm:$0xf] %vm294_vm0, %v4928_v2 }
  0x42   : > { %336 = vst.msk [vmem:[#allocation2 + $0xa4] sm:$0xf] %vm294_vm0, %v4928_v2 }
  0x43   : > { %337 = vst.msk [vmem:[#allocation2 + $0xa8] sm:$0xf] %vm294_vm0, %v4928_v2 }
  0x44   : > { %338 = vst.msk [vmem:[#allocation2 + $0xac] sm:$0xf] %vm294_vm0, %v4928_v2 }
  0x45   : > { %341 = vst.msk [vmem:[#allocation2 + $0xb8] sm:$0xf] %vm294_vm0, %v4928_v2  ;;  %v4656_v12 = vld [vmem:[#allocation2 + $0x90] sm:$0xff] }
  0x46   : > { %342 = vst.msk [vmem:[#allocation2 + $0xbc] sm:$0xf] %vm294_vm0, %v4928_v2  ;;  %3978 = vmatmul.msk.bf16.vlgmr.msra.gmra.mxu0 %vm1258_vm2, %v4656_v12  ;;  %v5382_v12 = vpack.c.bf16 %v424_v4, %v424_v4  ;;  %v3167_v4 = vunpack.c.l.b16 %v1107_v60 }
  0x47   : > { %343 = vst.msk [vmem:[#allocation2 + $0xc0] sm:$0xf] %vm294_vm0, %v4928_v2  ;;  %3513 = vmatpush.bf16.msra.mxu0 %v3504_v14 }
  0x48   : > { %344 = vst.msk [vmem:[#allocation2 + $0xc4] sm:$0xf] %vm294_vm0, %v4928_v2  ;;  %v3168_v18 = vpack.c.b16 %v3167_v4, %v3167_v4  ;;  %v871_v4 = vrot.slane %v520_v57, 4 }
  0x49   : > { %345 = vst.msk [vmem:[#allocation2 + $0xc8] sm:$0xf] %vm294_vm0, %v4928_v2 }
  0x4a   : > { %346 = vst.msk [vmem:[#allocation2 + $0xcc] sm:$0xf] %vm294_vm0, %v4928_v2  ;;  %v3169_v39 = vrot.slane %v3168_v18, 2 }
  0x4b   : > { %347 = vst.msk [vmem:[#allocation2 + $0xd0] sm:$0xf] %vm294_vm0, %v4928_v2 }
  0x4c   : > { %348 = vst.msk [vmem:[#allocation2 + $0xd4] sm:$0xf] %vm294_vm0, %v4928_v2 }
  0x4d   : > { %349 = vst.msk [vmem:[#allocation2 + $0xd8] sm:$0xf] %vm294_vm0, %v4928_v2 }
  0x4e   : > { %350 = vst.msk [vmem:[#allocation2 + $0xdc] sm:$0xf] %vm294_vm0, %v4928_v2 }
  0x4f   : > { %351 = vst.msk [vmem:[#allocation2 + $0xe0] sm:$0xf] %vm294_vm0, %v4928_v2 }
  0x50   : > { %352 = vst.msk [vmem:[#allocation2 + $0xe4] sm:$0xf] %vm294_vm0, %v4928_v2 }
  0x51   : > { %353 = vst.msk [vmem:[#allocation2 + $0xe8] sm:$0xf] %vm294_vm0, %v4928_v2 }
  0x52   : > { %354 = vst.msk [vmem:[#allocation2 + $0xec] sm:$0xf] %vm294_vm0, %v4928_v2 }
  0x53   : > { %355 = vst.msk [vmem:[#allocation2 + $0xf0] sm:$0xf] %vm294_vm0, %v4928_v2 }
  0x54   : > { %356 = vst.msk [vmem:[#allocation2 + $0xf4] sm:$0xf] %vm294_vm0, %v4928_v2 }
  0x55   : > { %357 = vst.msk [vmem:[#allocation2 + $0xf8] sm:$0xf] %vm294_vm0, %v4928_v2 }
  0x56   : > { %358 = vst.msk [vmem:[#allocation2 + $0xfc] sm:$0xf] %vm294_vm0, %v4928_v2 }
  0x57   : > { %359 = vst.msk [vmem:[#allocation2 + $0x100] sm:$0xf] %vm294_vm0, %v4928_v2 }
  0x58   : > { %360 = vst.msk [vmem:[#allocation2 + $0x104] sm:$0xf] %vm294_vm0, %v4928_v2 }
  0x59   : > { %361 = vst.msk [vmem:[#allocation2 + $0x108] sm:$0xf] %vm294_vm0, %v4928_v2 }
  0x5a   : > { %362 = vst.msk [vmem:[#allocation2 + $0x10c] sm:$0xf] %vm294_vm0, %v4928_v2 }
  0x5b   : > { %363 = vst.msk [vmem:[#allocation2 + $0x110] sm:$0xf] %vm294_vm0, %v4928_v2 }
  0x5c   : > { %364 = vst.msk [vmem:[#allocation2 + $0x114] sm:$0xf] %vm294_vm0, %v4928_v2 }
  0x5d   : > { %365 = vst.msk [vmem:[#allocation2 + $0x118] sm:$0xf] %vm294_vm0, %v4928_v2 }
  0x5e   : > { %366 = vst.msk [vmem:[#allocation2 + $0x11c] sm:$0xf] %vm294_vm0, %v4928_v2 }
  0x5f   : > { %367 = vst.msk [vmem:[#allocation2 + $0x120] sm:$0xf] %vm294_vm0, %v4928_v2 }
  0x60   : > { %368 = vst.msk [vmem:[#allocation2 + $0x124] sm:$0xf] %vm294_vm0, %v4928_v2 }
  0x61   : > { %369 = vst.msk [vmem:[#allocation2 + $0x128] sm:$0xf] %vm294_vm0, %v4928_v2 }
  0x62   : > { %370 = vst.msk [vmem:[#allocation2 + $0x12c] sm:$0xf] %vm294_vm0, %v4928_v2 }
  0x63   : > { %371 = vst.msk [vmem:[#allocation2 + $0x130] sm:$0xf] %vm294_vm0, %v4928_v2 }
  0x64   : > { %372 = vst.msk [vmem:[#allocation2 + $0x134] sm:$0xf] %vm294_vm0, %v4928_v2 }
  0x65   : > { %373 = vst.msk [vmem:[#allocation2 + $0x138] sm:$0xf] %vm294_vm0, %v4928_v2 }
  0x66   : > { %374 = vst.msk [vmem:[#allocation2 + $0x13c] sm:$0xf] %vm294_vm0, %v4928_v2 }
  0x67   : > { %375 = vst.msk [vmem:[#allocation2 + $0x140] sm:$0xf] %vm294_vm0, %v4928_v2 }
  0x68   : > { %376 = vst.msk [vmem:[#allocation2 + $0x144] sm:$0xf] %vm294_vm0, %v4928_v2 }
  0x69   : > { %377 = vst.msk [vmem:[#allocation2 + $0x148] sm:$0xf] %vm294_vm0, %v4928_v2 }
  0x6a   : > { %378 = vst.msk [vmem:[#allocation2 + $0x14c] sm:$0xf] %vm294_vm0, %v4928_v2 }
  0x6b   : > { %379 = vst.msk [vmem:[#allocation2 + $0x150] sm:$0xf] %vm294_vm0, %v4928_v2 }
  0x6c   : > { %380 = vst.msk [vmem:[#allocation2 + $0x154] sm:$0xf] %vm294_vm0, %v4928_v2 }
  0x6d   : > { %381 = vst.msk [vmem:[#allocation2 + $0x158] sm:$0xf] %vm294_vm0, %v4928_v2 }
  0x6e   : > { %382 = vst.msk [vmem:[#allocation2 + $0x15c] sm:$0xf] %vm294_vm0, %v4928_v2 }
  0x6f   : > { %383 = vst.msk [vmem:[#allocation2 + $0x160] sm:$0xf] %vm294_vm0, %v4928_v2 }
  0x70   : > { %384 = vst.msk [vmem:[#allocation2 + $0x164] sm:$0xf] %vm294_vm0, %v4928_v2 }
  0x71   : > { %385 = vst.msk [vmem:[#allocation2 + $0x168] sm:$0xf] %vm294_vm0, %v4928_v2 }
  0x72   : > { %386 = vst.msk [vmem:[#allocation2 + $0x16c] sm:$0xf] %vm294_vm0, %v4928_v2 }
  0x73   : > { %387 = vst.msk [vmem:[#allocation2 + $0x170] sm:$0xf] %vm294_vm0, %v4928_v2 }
  0x74   : > { %388 = vst.msk [vmem:[#allocation2 + $0x174] sm:$0xf] %vm294_vm0, %v4928_v2 }
  0x75   : > { %389 = vst.msk [vmem:[#allocation2 + $0x178] sm:$0xf] %vm294_vm0, %v4928_v2 }
  0x76   : > { %390 = vst.msk [vmem:[#allocation2 + $0x17c] sm:$0xf] %vm294_vm0, %v4928_v2 }
  0x77   : > { %391 = vst.msk [vmem:[#allocation2 + $0x180] sm:$0xf] %vm294_vm0, %v4928_v2 }
  0x78   : > { %392 = vst.msk [vmem:[#allocation2 + $0x184] sm:$0xf] %vm294_vm0, %v4928_v2 }
  0x79   : > { %393 = vst.msk [vmem:[#allocation2 + $0x188] sm:$0xf] %vm294_vm0, %v4928_v2 }
  0x7a   : > { %394 = vst.msk [vmem:[#allocation2 + $0x18c] sm:$0xf] %vm294_vm0, %v4928_v2 }
  0x7b   : > { %395 = vst.msk [vmem:[#allocation2 + $0x190] sm:$0xf] %vm294_vm0, %v4928_v2 }
  0x7c   : > { %396 = vst.msk [vmem:[#allocation2 + $0x194] sm:$0xf] %vm294_vm0, %v4928_v2 }
  0x7d   : > { %397 = vst.msk [vmem:[#allocation2 + $0x198] sm:$0xf] %vm294_vm0, %v4928_v2 }
  0x7e   : > { %398 = vst.msk [vmem:[#allocation2 + $0x19c] sm:$0xf] %vm294_vm0, %v4928_v2 }
  0x7f   : > { %399 = vst.msk [vmem:[#allocation2 + $0x1a0] sm:$0xf] %vm294_vm0, %v4928_v2 }
  0x80   : > { %400 = vst.msk [vmem:[#allocation2 + $0x1a4] sm:$0xf] %vm294_vm0, %v4928_v2 }
  0x81   : > { %401 = vst.msk [vmem:[#allocation2 + $0x1a8] sm:$0xf] %vm294_vm0, %v4928_v2 }
  0x82   : > { %402 = vst.msk [vmem:[#allocation2 + $0x1ac] sm:$0xf] %vm294_vm0, %v4928_v2  ;;  %v423_v2 = vld [vmem:[%s5030_s9 + $0xa0] sm:$0xff] }
  0x83   : > { %482 = vst.msk [vmem:[#allocation2 + $0xd0] sm:$0xf] %vm294_vm0, %v5264_v24  ;;  %v5377_v10 = vpack.c.bf16 %v423_v2, %v423_v2  ;;  %v2930_v2 = vsel %vm1307_vm1, %v1107_v60, 0 }
  0x84   : > { %483 = vst.msk [vmem:[#allocation2 + $0xd4] sm:$0xf] %vm294_vm0, %v5269_v26 }
  0x85   : > { %490 = vst.msk [vmem:[#allocation2 + $0xf0] sm:$0xf] %vm294_vm0, %v5274_v28 }
  0x86   : > { %491 = vst.msk [vmem:[#allocation2 + $0xf4] sm:$0xf] %vm294_vm0, %v5279_v30 }
  0x87   : > { %476 = vst.msk [vmem:[#allocation2 + $0xb8] sm:$0xf] %vm294_vm0, %v5284_v32 }
  0x88   : > { %477 = vst.msk [vmem:[#allocation2 + $0xbc] sm:$0xf] %vm294_vm0, %v5289_v34 }
  0x89   : > { %484 = vst.msk [vmem:[#allocation2 + $0xd8] sm:$0xf] %vm294_vm0, %v5294_v36 }
  0x8a   : > { %485 = vst.msk [vmem:[#allocation2 + $0xdc] sm:$0xf] %vm294_vm0, %v5299_v38 }
  0x8b   : > { %v4664_v48 = vld [vmem:[#allocation2 + $0xd0] sm:$0xff]  ;;  %492 = vst.msk [vmem:[#allocation2 + $0xf8] sm:$0xf] %vm294_vm0, %v5304_v40 }
  0x8c   : > { %493 = vst.msk [vmem:[#allocation2 + $0xfc] sm:$0xf] %vm294_vm0, %v5309_v42  ;;  %3986 = vmatmul.msk.bf16.vlgmr.msra.gmra.mxu2 %vm1258_vm2, %v4664_v48  ;;  %v2594_v48 = vpack.c.b16 %v2593_v35, %v2593_v35 }
  0x8d   : > { %v4668_v53 = vld [vmem:[#allocation2 + $0xf0] sm:$0xff]  ;;  %468 = vst.msk [vmem:[#allocation2 + $0x98] sm:$0xf] %vm294_vm0, %v5314_v44  ;;  %v517_v44 = vor.u32 %v515_v33, %v514_v31  ;;  %2939 = vmatpush.bf16.msra.mxu2 %v2930_v2  ;;  %v1041_v33 = vld [vmem:[#allocation2 + $0x12c] sm:$0xf]  ;;  %v544_v2 = vshrl.u32 %v5407_v23, 16 }
  0x8e   : > { %469 = vst.msk [vmem:[#allocation2 + $0x9c] sm:$0xf] %vm294_vm0, %v5319_v46  ;;  %3990 = vmatmul.msk.bf16.vlgmr.msra.gmra.mxu3 %vm1258_vm2, %v4668_v53  ;;  %v2595_v52 = vrot.slane %v2594_v48, 2  ;;  %v3219_v48 = vsel %vm1307_vm1, %v3169_v39, 0 }
  0x8f   : > { %v4661_v58 = vld [vmem:[#allocation2 + $0xb8] sm:$0xff]  ;;  %478 = vst.msk [vmem:[#allocation2 + $0xc0] sm:$0xf] %vm294_vm0, %v5324_v49  ;;  %v518_v16 = vsel %vm5419_vm5, %v510_v41, %v517_v44  ;;  %v526_v44 = vrot.slane %v522_v21, 4  ;;  %3228 = vmatpush.bf16.msra.mxu3 %v3219_v48  ;;  %v560_v48 = vshrl.u32 %v5041_v9, 16 }
  0x90   : > { %479 = vst.msk [vmem:[#allocation2 + $0xc4] sm:$0xf] %vm294_vm0, %v5329_v51  ;;  %3983 = vmatmul.msk.bf16.gmra.mxu1 %vm1258_vm2, %v4661_v58  ;;  %v528_v58 = vshrl.u32 %v5362_v1, 16  ;;  %v2645_v63 = vsel %vm1307_vm1, %v2595_v52, 0 }
  0x91   : > { %486 = vst.msk [vmem:[#allocation2 + $0xe0] sm:$0xf] %vm294_vm0, %v5335_v54  ;;  %v4665_v17 = vld [vmem:[#allocation2 + $0xd8] sm:$0xff]  ;;  %2654 = vmatpush.bf16.msra.mxu1 %v2645_v63  ;;  %v536_v63 = vshrl.u32 %v5399_v19, 16 }
  0x92   : > { %487 = vst.msk [vmem:[#allocation2 + $0xe4] sm:$0xf] %vm294_vm0, %v5340_v56  ;;  %v530_v35 = vrot.slane %v528_v58, 7 }
  0x93   : > { %494 = vst.msk [vmem:[#allocation2 + $0x100] sm:$0xf] %vm294_vm0, %v5346_v59  ;;  %v4669_v20 = vld [vmem:[#allocation2 + $0xf8] sm:$0xff]  ;;  %v538_v18 = vrot.slane %v536_v63, 7 }
  0x94   : > { %495 = vst.msk [vmem:[#allocation2 + $0x104] sm:$0xf] %vm294_vm0, %v5351_v61 }
  0x95   : > { %v4657_v7 = vld [vmem:[#allocation2 + $0x98] sm:$0xff]  ;;  %470 = vst.msk [vmem:[#allocation2 + $0xa0] sm:$0xf] %vm294_vm0, %v5356_v62 }
  0x96   : > { %471 = vst.msk [vmem:[#allocation2 + $0xa4] sm:$0xf] %vm294_vm0, %v5362_v1  ;;  %3979 = vmatmul.msk.bf16.gmra.mxu0 %vm1258_vm2, %v4657_v7  ;;  %v863_v7 = vrot.slane %v507_v29, 5 }
  0x97   : > { %480 = vst.msk [vmem:[#allocation2 + $0xc8] sm:$0xf] %vm294_vm0, %v5367_v3  ;;  %v4662_v25 = vld [vmem:[#allocation2 + $0xc0] sm:$0xff] }
  0x98   : > { %481 = vst.msk [vmem:[#allocation2 + $0xcc] sm:$0xf] %vm294_vm0, %v5372_v5 }
  0x99   : > { %488 = vst.msk [vmem:[#allocation2 + $0xe8] sm:$0xf] %vm294_vm0, %v5377_v10  ;;  %v4666_v50 = vld [vmem:[#allocation2 + $0xe0] sm:$0xff] }
  0x9a   : > { %489 = vst.msk [vmem:[#allocation2 + $0xec] sm:$0xf] %vm294_vm0, %v5382_v12 }
  0x9b   : > { %496 = vst.msk [vmem:[#allocation2 + $0x108] sm:$0xf] %vm294_vm0, %v5387_v13  ;;  %v4670_v53 = vld [vmem:[#allocation2 + $0x100] sm:$0xff] }
  0x9c   : > { %497 = vst.msk [vmem:[#allocation2 + $0x10c] sm:$0xf] %vm294_vm0, %v5392_v15  ;;  %3987 = vmatmul.msk.bf16.gmra.mxu2 %vm1258_vm2, %v4665_v17  ;;  %v868_v17 = vrot.slane %v512_v22, 4 }
  0x9d   : > { %472 = vst.msk [vmem:[#allocation2 + $0xa8] sm:$0xf] %vm294_vm0, %v5399_v19  ;;  %v4658_v37 = vld [vmem:[#allocation2 + $0xa0] sm:$0xff] }
  0x9e   : > { %3991 = vmatmul.msk.bf16.gmra.mxu3 %vm1258_vm2, %v4669_v20  ;;  %473 = vst.msk [vmem:[#allocation2 + $0xac] sm:$0xf] %vm294_vm0, %v5407_v23  ;;  %v864_v20 = vor.u32 %v863_v7, %v862_v0  ;;  %v869_v29 = vor.u32 %v868_v17, %v866_v11  ;;  %v4640_v0 = vld [vmem:[#allocation2] sm:$0xff] }
  0x9f   : > { %797 = vst [vmem:[#allocation2 + $0x8] sm:$0xf] %v796_v47  ;;  %v4663_v55 = vld [vmem:[#allocation2 + $0xc8] sm:$0xff] }
  0xa0   : > { %3984 = vmatmul.msk.bf16.gmra.mxu1 %vm1258_vm2, %v4662_v25  ;;  %798 = vst.msk [vmem:[#allocation2 + $0xc] sm:$0xf] %vm294_vm0, %v518_v16  ;;  %v523_v25 = vshll.u32 %v5356_v62, 16  ;;  %v865_v41 = vrot.slane %v864_v20, 4  ;;  %v870_v16 = vrot.slane %v869_v29, 4  ;;  %v539_v20 = vshll.u32 %v5399_v19, 16 }
  0xa1   : > { %v547_v29 = vshll.u32 %v5407_v23, 16 }
  0xa2   : > { %v525_v62 = vor.u32 %v523_v25, %v522_v21  ;;  %v1042_v52 = vsel %vm5457_vm11, %v870_v16, %v1041_v33  ;;  %v872_v6 = vrot.slane %v523_v25, 5  ;;  %v1045_v21 = vld [vmem:[#allocation2 + $0x134] sm:$0xf]  ;;  %v4704_v33 = vld [vmem:[#allocation2 + $0x98] sm:$0xff]  ;;  %v552_v16 = vshrl.u32 %v5039_v8, 16 }
  0xa3   : > { %1043 = vst [vmem:[#allocation2 + $0x12c] sm:$0xf] %v1042_v52  ;;  %v4671_v60 = vld [vmem:[#allocation2 + $0x108] sm:$0xff]  ;;  %v803_v25 = vld [vmem:[#allocation2 + $0x18] sm:$0xf]  ;;  %v884_v52 = vrot.slane %v547_v29, 5 }
  0xa4   : > { %v873_v14 = vor.u32 %v872_v6, %v871_v4  ;;  %v555_v4 = vshll.u32 %v5039_v8, 16  ;;  %v1049_v6 = vld [vmem:[#allocation2 + $0x13c] sm:$0xf] }
  0xa5   : > { %v4659_v27 = vld [vmem:[#allocation2 + $0xa8] sm:$0xff] }
  0xa6   : > { %3980 = vmatmul.msk.bf16.gmra.mxu0 %vm1258_vm2, %v4658_v37  ;;  %v531_v37 = vshll.u32 %v5362_v1, 16  ;;  %v800_v1 = vsel %vm5424_vm7, %v525_v62, %v799_v45  ;;  %v542_v62 = vrot.slane %v538_v18, 4 }
  0xa7   : > { %801 = vst [vmem:[#allocation2 + $0x10] sm:$0xf] %v800_v1  ;;  %v4688_v45 = vld [vmem:[#allocation2 + $0x8] sm:$0xff]  ;;  %v881_v1 = vrot.slane %v539_v20, 5 }
  0xa8   : > { %v533_v47 = vor.u32 %v531_v37, %v530_v35  ;;  %v875_v7 = vrot.slane %v531_v37, 5  ;;  %v874_v35 = vrot.slane %v873_v14, 4  ;;  %v4705_v14 = vld [vmem:[#allocation2 + $0xa0] sm:$0xff] }
  0xac   : > { %3988 = vmatmul.msk.bf16.gmra.mxu2 %vm1258_vm2, %v4666_v50  ;;  %v867_v50 = vsel %vm5450_vm10, %v865_v41, %v866_v11  ;;  %v877_v11 = vrot.slane %v528_v58, 4  ;;  %v541_v41 = vor.u32 %v539_v20, %v538_v18  ;;  %v876_v58 = vsel %vm5450_vm10, %v874_v35, %v875_v7  ;;  %v807_v20 = vld [vmem:[#allocation2 + $0x20] sm:$0xf] }
  0xad   : > { %1039 = vst.msk [vmem:[#allocation2 + $0x128] sm:$0xf] %vm294_vm0, %v867_v50  ;;  %v880_v50 = vrot.slane %v536_v63, 4 }
  0xae   : > { %3992 = vmatmul.msk.bf16.gmra.mxu3 %vm1258_vm2, %v4670_v53  ;;  %v534_v53 = vsel %vm5419_vm5, %v526_v44, %v533_v47  ;;  %v878_v17 = vor.u32 %v877_v11, %v875_v7  ;;  %v804_v19 = vsel %vm5424_vm7, %v541_v41, %v803_v25  ;;  %1044 = vst.msk [vmem:[#allocation2 + $0x130] sm:$0xf] %vm294_vm0, %v876_v58  ;;  %v4672_v44 = vld [vmem:[#allocation2 + $0x120] sm:$0xff]  ;;  %v4641_v47 = vld [vmem:[#allocation2 + $0x8] sm:$0xff]  ;;  %v562_v7 = vrot.slane %v560_v48, 7 }
  0xaf   : > { %802 = vst.msk [vmem:[#allocation2 + $0x14] sm:$0xf] %vm294_vm0, %v534_v53  ;;  %v886_v53 = vrot.slane %v544_v2, 4  ;;  %v563_v11 = vshll.u32 %v5041_v9, 16  ;;  %v890_v25 = vrot.slane %v555_v4, 5 }
  0xb0   : > { %3985 = vmatmul.msk.bf16.gmra.mxu1 %vm1258_vm2, %v4663_v55  ;;  %v4667_v55 = vld [vmem:[#allocation2 + $0xe8] sm:$0xff]  ;;  %v879_v39 = vrot.slane %v878_v17, 4  ;;  %805 = vst [vmem:[#allocation2 + $0x18] sm:$0xf] %v804_v19 }
  0xb1   : > { %v565_v63 = vor.u32 %v563_v11, %v562_v7  ;;  %v893_v58 = vrot.slane %v563_v11, 5 }
  0xb2   : > { %v1046_v37 = vsel %vm5457_vm11, %v879_v39, %v1045_v21  ;;  %v568_v39 = vshrl.u32 %v5284_v32, 16 }
  0xb3   : > { %1047 = vst [vmem:[#allocation2 + $0x134] sm:$0xf] %v1046_v37  ;;  %v895_v37 = vrot.slane %v560_v48, 4 }
  0xb6   : > { %3981 = vmatmul.msk.bf16.gmra.mxu0 %vm1258_vm2, %v4659_v27  ;;  %v546_v27 = vrot.slane %v544_v2, 7  ;;  %v4689_v35 = vld [vmem:[#allocation2 + $0x10] sm:$0xff] }
  0xb7   : > { %v4642_v41 = vld [vmem:[#allocation2 + $0x10] sm:$0xff] }
  0xb8   : > { %v549_v57 = vor.u32 %v547_v29, %v546_v27 }
  0xba   : > { %v550_v23 = vsel %vm5419_vm5, %v542_v62, %v549_v57  ;;  %v576_v62 = vshrl.u32 %v5289_v34, 16  ;;  %v889_v57 = vrot.slane %v552_v16, 4  ;;  %v4674_v7 = vld [vmem:[#allocation2 + $0x130] sm:$0xff] }
  0xbb   : > { %806 = vst.msk [vmem:[#allocation2 + $0x1c] sm:$0xf] %vm294_vm0, %v550_v23  ;;  %v896_v23 = vor.u32 %v895_v37, %v893_v58 }
  0xbc   : > { %3989 = vmatmul.msk.bf16.gmra.mxu2 %vm1258_vm2, %v4667_v55  ;;  %v882_v55 = vor.u32 %v881_v1, %v880_v50  ;;  %v891_v19 = vor.u32 %v890_v25, %v889_v57  ;;  %v578_v50 = vrot.slane %v576_v62, 7  ;;  %v579_v1 = vshll.u32 %v5289_v34, 16 }
  0xbe   : > { %3993 = vmatmul.msk.bf16.gmra.mxu3 %vm1258_vm2, %v4671_v60  ;;  %v887_v60 = vor.u32 %v886_v53, %v884_v52  ;;  %v883_v17 = vrot.slane %v882_v55, 4  ;;  %v892_v53 = vrot.slane %v891_v19, 4  ;;  %v897_v55 = vrot.slane %v896_v23, 4  ;;  %v1057_v19 = vld [vmem:[#allocation2 + $0x14c] sm:$0xf] }
  0xbf   : > { %v815_v23 = vld [vmem:[#allocation2 + $0x30] sm:$0xf] }
  0xc0   : > { %4058 = vmatmul.msk.bf16.vlgmr.msrb.gmra.mxu1 %vm1258_vm2, %v4640_v0  ;;  %v554_v0 = vrot.slane %v552_v16, 7  ;;  %v888_v18 = vrot.slane %v887_v60, 4  ;;  %v885_v2 = vsel %vm5450_vm10, %v883_v17, %v884_v52  ;;  %v4706_v52 = vld [vmem:[#allocation2 + $0xa8] sm:$0xff]  ;;  %v581_v16 = vor.u32 %v579_v1, %v578_v50 }
  0xc1   : > { %1048 = vst.msk [vmem:[#allocation2 + $0x138] sm:$0xf] %vm294_vm0, %v885_v2  ;;  %v894_v48 = vsel %vm5450_vm10, %v892_v53, %v893_v58  ;;  %v608_v53 = vshrl.u32 %v5372_v5, 16 }
  0xc2   : > { %v557_v21 = vor.u32 %v555_v4, %v554_v0  ;;  %v558_v27 = vrot.slane %v554_v0, 4  ;;  %v1050_v29 = vsel %vm5457_vm11, %v888_v18, %v1049_v6  ;;  %v811_v4 = vld [vmem:[#allocation2 + $0x28] sm:$0xf]  ;;  %1052 = vst.msk [vmem:[#allocation2 + $0x140] sm:$0xf] %vm294_vm0, %v894_v48  ;;  %v4690_v11 = vld [vmem:[#allocation2 + $0x18] sm:$0xff] }
  0xc3   : > { %1051 = vst [vmem:[#allocation2 + $0x13c] sm:$0xf] %v1050_v29  ;;  %v4643_v17 = vld [vmem:[#allocation2 + $0x18] sm:$0xff]  ;;  %v592_v18 = vshrl.u32 %v5329_v51, 16 }
  0xc4   : > { %v808_v8 = vsel %vm5424_vm7, %v557_v21, %v807_v20  ;;  %v566_v9 = vsel %vm5419_vm5, %v558_v27, %v565_v63  ;;  %v898_v21 = vrot.slane %v568_v39, 4  ;;  %v902_v63 = vrot.slane %v579_v1, 5 }
  0xc5   : > { %809 = vst [vmem:[#allocation2 + $0x20] sm:$0xf] %v808_v8  ;;  %v904_v20 = vrot.slane %v576_v62, 4  ;;  %v600_v1 = vshrl.u32 %v5367_v3, 16 }
  0xc6   : > { %4298 = vmatmul.msk.bf16.vlgmr.msrb.gmra.mxu0 %vm1258_vm2, %v4704_v33  ;;  %v4673_v33 = vld [vmem:[#allocation2 + $0x128] sm:$0xff]  ;;  %810 = vst.msk [vmem:[#allocation2 + $0x24] sm:$0xf] %vm294_vm0, %v566_v9  ;;  %v587_v9 = vshll.u32 %v5324_v49, 16 }
  0xc7   : > { %v905_v29 = vor.u32 %v904_v20, %v902_v63 }
  0xc9   : > { %v906_v25 = vrot.slane %v905_v29, 4  ;;  %v819_v29 = vld [vmem:[#allocation2 + $0x38] sm:$0xf] }
  0xcc   : > { %4138 = vmatmul.msk.bf16.vlgmr.msrb.gmra.mxu2 %vm1258_vm2, %v4672_v44  ;;  %v570_v44 = vrot.slane %v568_v39, 7 }
  0xcd   : > { %v4691_v50 = vld [vmem:[#allocation2 + $0x20] sm:$0xff] }
  0xce   : > { %4218 = vmatmul.msk.bf16.vlgmr.msrb.gmra.mxu3 %vm1258_vm2, %v4688_v45  ;;  %v571_v45 = vshll.u32 %v5284_v32, 16  ;;  %v574_v0 = vrot.slane %v570_v44, 4 }
  0xd0   : > { %4059 = vmatmul.msk.bf16.gmra.mxu1 %vm1258_vm2, %v4641_v47  ;;  %v1053_v47 = vld [vmem:[#allocation2 + $0x144] sm:$0xf]  ;;  %v573_v60 = vor.u32 %v571_v45, %v570_v44  ;;  %v582_v34 = vsel %vm5419_vm5, %v574_v0, %v581_v16  ;;  %v899_v27 = vrot.slane %v571_v45, 5  ;;  %v1058_v44 = vsel %vm5457_vm11, %v906_v25, %v1057_v19  ;;  %v4675_v45 = vld [vmem:[#allocation2 + $0x138] sm:$0xff] }
  0xd1   : > { %v1054_v6 = vsel %vm5457_vm11, %v897_v55, %v1053_v47  ;;  %814 = vst.msk [vmem:[#allocation2 + $0x2c] sm:$0xf] %vm294_vm0, %v582_v34  ;;  %v5545_v47 = vpop.f32.mrf.mxu1  ;;  %v913_v16 = vrot.slane %v592_v18, 4  ;;  %v603_v34 = vshll.u32 %v5367_v3, 16  ;;  %v916_v19 = vrot.slane %v600_v1, 4 }
  0xd2   : > { %v812_v32 = vsel %vm5424_vm7, %v573_v60, %v811_v4  ;;  %1055 = vst [vmem:[#allocation2 + $0x144] sm:$0xf] %v1054_v6  ;;  %v900_v2 = vor.u32 %v899_v27, %v898_v21  ;;  %v908_v60 = vrot.slane %v587_v9, 5  ;;  %v5551_v4 = vpop.f32.mrf.mxu0 }
  0xd3   : > { %813 = vst [vmem:[#allocation2 + $0x28] sm:$0xf] %v812_v32  ;;  %v602_v32 = vrot.slane %v600_v1, 7 }
  0xd4   : > { %v901_v57 = vrot.slane %v900_v2, 4  ;;  %1059 = vst [vmem:[#allocation2 + $0x14c] sm:$0xf] %v1058_v44 }
  0xd6   : > { %4299 = vmatmul.msk.bf16.gmra.mxu0 %vm1258_vm2, %v4705_v14  ;;  %v584_v14 = vshrl.u32 %v5324_v49, 16  ;;  %v903_v62 = vsel %vm5450_vm10, %v901_v57, %v902_v63  ;;  %v605_v63 = vor.u32 %v603_v34, %v602_v32  ;;  %v616_v57 = vshrl.u32 %v5264_v24, 16 }
  0xd7   : > { %1056 = vst.msk [vmem:[#allocation2 + $0x148] sm:$0xf] %vm294_vm0, %v903_v62  ;;  %v922_v62 = vrot.slane %v608_v53, 4 }
  0xd8   : > { %v586_v8 = vrot.slane %v584_v14, 7  ;;  %v907_v55 = vrot.slane %v584_v14, 4  ;;  %v606_v14 = vrot.slane %v602_v32, 4  ;;  %v820_v3 = vsel %vm5424_vm7, %v605_v63, %v819_v29  ;;  %v1065_v32 = vld [vmem:[#allocation2 + $0x15c] sm:$0xf] }
  0xd9   : > { %v5556_v20 = vpop.f32.mrf.mxu1  ;;  %821 = vst [vmem:[#allocation2 + $0x38] sm:$0xf] %v820_v3  ;;  %v640_v29 = vshrl.u32 %v5299_v38, 16 }
  0xda   : > { %v589_v58 = vor.u32 %v587_v9, %v586_v8  ;;  %v590_v37 = vrot.slane %v586_v8, 4  ;;  %v909_v48 = vor.u32 %v908_v60, %v907_v55  ;;  %v4645_v25 = vld [vmem:[#allocation2 + $0x28] sm:$0xff]  ;;  %v627_v60 = vshll.u32 %v5269_v26, 16 }
  0xdc   : > { %4139 = vmatmul.msk.bf16.gmra.mxu2 %vm1258_vm2, %v4673_v33  ;;  %v594_v33 = vrot.slane %v592_v18, 7  ;;  %v816_v49 = vsel %vm5424_vm7, %v589_v58, %v815_v23  ;;  %v910_v21 = vrot.slane %v909_v48, 4  ;;  %v1061_v18 = vld [vmem:[#allocation2 + $0x154] sm:$0xf]  ;;  %v624_v58 = vshrl.u32 %v5269_v26, 16 }
  0xdd   : > { %817 = vst [vmem:[#allocation2 + $0x30] sm:$0xf] %v816_v49 }
  0xde   : > { %4219 = vmatmul.msk.bf16.gmra.mxu3 %vm1258_vm2, %v4689_v35  ;;  %v595_v35 = vshll.u32 %v5329_v51, 16  ;;  %v626_v55 = vrot.slane %v624_v58, 7  ;;  %v4677_v63 = vld [vmem:[#allocation2 + $0x148] sm:$0xff]  ;;  %v931_v3 = vrot.slane %v624_v58, 4 }
  0xe0   : > { %4060 = vmatmul.msk.bf16.gmra.mxu1 %vm1258_vm2, %v4642_v41  ;;  %v4707_v41 = vld [vmem:[#allocation2 + $0xb0] sm:$0xff]  ;;  %v597_v39 = vor.u32 %v595_v35, %v594_v33  ;;  %v911_v0 = vrot.slane %v595_v35, 5  ;;  %v4676_v33 = vld [vmem:[#allocation2 + $0x140] sm:$0xff]  ;;  %v5569_v35 = vpop.f32.mrf.mxu0 }
  0xe2   : > { %v598_v51 = vsel %vm5419_vm5, %v590_v37, %v597_v39  ;;  %v914_v6 = vor.u32 %v913_v16, %v911_v0  ;;  %v912_v8 = vsel %vm5450_vm10, %v910_v21, %v911_v0  ;;  %v917_v39 = vrot.slane %v603_v34, 5  ;;  %v4709_v0 = vld [vmem:[#allocation2 + $0xc0] sm:$0xff] }
  0xe3   : > { %818 = vst.msk [vmem:[#allocation2 + $0x34] sm:$0xf] %vm294_vm0, %v598_v51  ;;  %v629_v34 = vor.u32 %v627_v60, %v626_v55 }
  0xe4   : > { %v915_v27 = vrot.slane %v914_v6, 4  ;;  %1060 = vst.msk [vmem:[#allocation2 + $0x150] sm:$0xf] %vm294_vm0, %v912_v8  ;;  %v918_v49 = vor.u32 %v917_v39, %v916_v19  ;;  %v635_v19 = vshll.u32 %v5294_v36, 16  ;;  %v929_v39 = vrot.slane %v627_v60, 5 }
  0xe6   : > { %4300 = vmatmul.msk.bf16.gmra.mxu0 %vm1258_vm2, %v4706_v52  ;;  %v4644_v52 = vld [vmem:[#allocation2 + $0x20] sm:$0xff]  ;;  %v1062_v9 = vsel %vm5457_vm11, %v915_v27, %v1061_v18  ;;  %v919_v16 = vrot.slane %v918_v49, 4  ;;  %v632_v18 = vshrl.u32 %v5294_v36, 16  ;;  %v932_v58 = vor.u32 %v931_v3, %v929_v39 }
  0xe7   : > { %1063 = vst [vmem:[#allocation2 + $0x154] sm:$0xf] %v1062_v9  ;;  %v925_v9 = vrot.slane %v616_v57, 4 }
  0xe8   : > { %v933_v55 = vrot.slane %v932_v58, 4  ;;  %v934_v3 = vrot.slane %v632_v18, 4 }
  0xec   : > { %4140 = vmatmul.msk.bf16.gmra.mxu2 %vm1258_vm2, %v4674_v7  ;;  %v610_v7 = vrot.slane %v608_v53, 7 }
  0xee   : > { %4220 = vmatmul.msk.bf16.gmra.mxu3 %vm1258_vm2, %v4690_v11  ;;  %v611_v11 = vshll.u32 %v5372_v5, 16 }
  0xf0   : > { %4061 = vmatmul.msk.bf16.gmra.mxu1 %vm1258_vm2, %v4643_v17  ;;  %v4708_v17 = vld [vmem:[#allocation2 + $0xb8] sm:$0xff]  ;;  %v613_v2 = vor.u32 %v611_v11, %v610_v7  ;;  %v920_v23 = vrot.slane %v611_v11, 5  ;;  %v823_v7 = vld [vmem:[#allocation2 + $0x40] sm:$0xf] }
  0xf2   : > { %v614_v5 = vsel %vm5419_vm5, %v606_v14, %v613_v2  ;;  %v923_v51 = vor.u32 %v922_v62, %v920_v23  ;;  %v921_v11 = vsel %vm5450_vm10, %v919_v16, %v920_v23  ;;  %v4693_v2 = vld [vmem:[#allocation2 + $0x30] sm:$0xff]  ;;  %v642_v23 = vrot.slane %v640_v29, 7 }
  0xf3   : > { %822 = vst.msk [vmem:[#allocation2 + $0x3c] sm:$0xf] %vm294_vm0, %v614_v5  ;;  %v4646_v5 = vld [vmem:[#allocation2 + $0x30] sm:$0xff]  ;;  %v643_v62 = vshll.u32 %v5299_v38, 16 }
  0xf4   : > { %v924_v1 = vrot.slane %v923_v51, 4  ;;  %1064 = vst.msk [vmem:[#allocation2 + $0x158] sm:$0xf] %vm294_vm0, %v921_v11 }
  0xf5   : > { %v645_v60 = vor.u32 %v643_v62, %v642_v23  ;;  %v938_v58 = vrot.slane %v643_v62, 5 }
  0xf6   : > { %4301 = vmatmul.msk.bf16.gmra.mxu0 %vm1258_vm2, %v4707_v41  ;;  %v4692_v41 = vld [vmem:[#allocation2 + $0x28] sm:$0xff] }
  0xfc   : > { %4141 = vmatmul.msk.bf16.gmra.mxu2 %vm1258_vm2, %v4675_v45  ;;  %v618_v45 = vrot.slane %v616_v57, 7 }
  0xfe   : > { %4221 = vmatmul.msk.bf16.gmra.mxu3 %vm1258_vm2, %v4691_v50  ;;  %v619_v50 = vshll.u32 %v5264_v24, 16  ;;  %v622_v6 = vrot.slane %v618_v45, 4  ;;  %v1066_v24 = vsel %vm5457_vm11, %v924_v1, %v1065_v32  ;;  %v1069_v1 = vld [vmem:[#allocation2 + $0x164] sm:$0xf] }
  0xff   : > { %1067 = vst [vmem:[#allocation2 + $0x15c] sm:$0xf] %v1066_v24  ;;  %v4678_v24 = vld [vmem:[#allocation2 + $0x150] sm:$0xff] }
 0x100   : > { %4062 = vmatmul.msk.bf16.gmra.mxu1 %vm1258_vm2, %v4644_v52  ;;  %v621_v48 = vor.u32 %v619_v50, %v618_v45  ;;  %v630_v21 = vsel %vm5419_vm5, %v622_v6, %v629_v34  ;;  %v4710_v45 = vld [vmem:[#allocation2 + $0xc8] sm:$0xff]  ;;  %v1070_v6 = vsel %vm5457_vm11, %v933_v55, %v1069_v1 }
 0x101   : > { %826 = vst.msk [vmem:[#allocation2 + $0x44] sm:$0xf] %vm294_vm0, %v630_v21  ;;  %v648_v21 = vshrl.u32 %v5335_v54, 16 }
 0x102   : > { %1071 = vst [vmem:[#allocation2 + $0x164] sm:$0xf] %v1070_v6  ;;  %v831_v6 = vld [vmem:[#allocation2 + $0x50] sm:$0xf] }
 0x103   : > { %v650_v23 = vrot.slane %v648_v21, 7 }
 0x106   : > { %4302 = vmatmul.msk.bf16.gmra.mxu0 %vm1258_vm2, %v4708_v17  ;;  %v824_v17 = vsel %vm5424_vm7, %v621_v48, %v823_v7  ;;  %v827_v48 = vld [vmem:[#allocation2 + $0x48] sm:$0xf] }
 0x107   : > { %825 = vst [vmem:[#allocation2 + $0x40] sm:$0xf] %v824_v17 }
 0x10c   : > { %4142 = vmatmul.msk.bf16.gmra.mxu2 %vm1258_vm2, %v4676_v33  ;;  %v926_v33 = vrot.slane %v619_v50, 5 }
 0x10d   : > { %v5574_v37 = vpop.f32.mrf.mxu1 }
 0x10e   : > { %4222 = vmatmul.msk.bf16.gmra.mxu3 %vm1258_vm2, %v4692_v41  ;;  %v927_v57 = vor.u32 %v926_v33, %v925_v9  ;;  %v940_v33 = vrot.slane %v640_v29, 4 }
 0x10f   : > { %v5577_v44 = vpop.f32.mrf.mxu2 }
 0x110   : > { %4063 = vmatmul.msk.bf16.gmra.mxu1 %vm1258_vm2, %v4645_v25  ;;  %v634_v25 = vrot.slane %v632_v18, 7  ;;  %v928_v50 = vrot.slane %v927_v57, 4  ;;  %v651_v57 = vshll.u32 %v5335_v54, 16  ;;  %v941_v29 = vor.u32 %v940_v33, %v938_v58 }
 0x111   : > { %v5581_v52 = vpop.f32.mrf.mxu3 }
 0x112   : > { %6190 = vst [vmem:[#allocation7_spill] sm:$0xff] %v5581_v52  ;;  %v638_v16 = vrot.slane %v634_v25, 4  ;;  %v930_v38 = vsel %vm5450_vm10, %v928_v50, %v929_v39  ;;  %v659_v50 = vshll.u32 %v5340_v56, 16  ;;  %v942_v1 = vrot.slane %v941_v29, 4 }
 0x113   : > { %v5584_v53 = vpop.f32.mrf.mxu0  ;;  %1068 = vst.msk [vmem:[#allocation2 + $0x160] sm:$0xf] %vm294_vm0, %v930_v38  ;;  %v1073_v38 = vld [vmem:[#allocation2 + $0x16c] sm:$0xf]  ;;  %v944_v29 = vrot.slane %v651_v57, 5 }
 0x114   : > { %v646_v7 = vsel %vm5419_vm5, %v638_v16, %v645_v60  ;;  %v653_v60 = vor.u32 %v651_v57, %v650_v23 }
 0x115   : > { %v5592_v26 = vpop.f32.mrf.mxu1  ;;  %830 = vst.msk [vmem:[#allocation2 + $0x4c] sm:$0xf] %vm294_vm0, %v646_v7 }
 0x116   : > { %4303 = vmatmul.msk.bf16.gmra.mxu0 %vm1258_vm2, %v4709_v0  ;;  %v637_v0 = vor.u32 %v635_v19, %v634_v25  ;;  %v4647_v25 = vld [vmem:[#allocation2 + $0x38] sm:$0xff]  ;;  %v832_v7 = vsel %vm5424_vm7, %v653_v60, %v831_v6  ;;  %v675_v6 = vshll.u32 %v5382_v12, 16 }
 0x117   : > { %v5598_v27 = vpop.f32.mrf.mxu2  ;;  %833 = vst [vmem:[#allocation2 + $0x50] sm:$0xf] %v832_v7 }
 0x118   : > { %v828_v32 = vsel %vm5424_vm7, %v637_v0, %v827_v48  ;;  %v4711_v0 = vld [vmem:[#allocation2 + $0xd0] sm:$0xff]  ;;  %v654_v48 = vrot.slane %v650_v23, 4  ;;  %v4695_v23 = vld [vmem:[#allocation2 + $0x40] sm:$0xff] }
 0x119   : > { %v5601_v14 = vpop.f32.mrf.mxu3  ;;  %829 = vst [vmem:[#allocation2 + $0x48] sm:$0xf] %v828_v32  ;;  %v1074_v32 = vsel %vm5457_vm11, %v942_v1, %v1073_v38  ;;  %v947_v38 = vrot.slane %v659_v50, 5 }
 0x11a   : > { %6191 = vst [vmem:[#allocation8_spill] sm:$0xff] %v5601_v14 }
 0x11b   : > { %v5605_v8 = vpop.f32.mrf.mxu0  ;;  %1075 = vst [vmem:[#allocation2 + $0x16c] sm:$0xf] %v1074_v32  ;;  %v4712_v32 = vld [vmem:[#allocation2 + $0xd8] sm:$0xff] }
 0x11c   : > { %4143 = vmatmul.msk.bf16.gmra.mxu2 %vm1258_vm2, %v4677_v63  ;;  %v4694_v63 = vld [vmem:[#allocation2 + $0x38] sm:$0xff] }
 0x11d   : > { %v5608_v41 = vpop.f32.mrf.mxu1 }
 0x11e   : > { %4223 = vmatmul.msk.bf16.gmra.mxu3 %vm1258_vm2, %v4693_v2  ;;  %v656_v2 = vshrl.u32 %v5340_v56, 16 }
 0x11f   : > { %v5613_v49 = vpop.f32.mrf.mxu2 }
 0x120   : > { %4064 = vmatmul.msk.bf16.gmra.mxu1 %vm1258_vm2, %v4646_v5  ;;  %v935_v5 = vrot.slane %v635_v19, 5 }
 0x121   : > { %v5616_v51 = vpop.f32.mrf.mxu3 }
 0x122   : > { %6192 = vst [vmem:[#allocation9_spill] sm:$0xff] %v5616_v51  ;;  %v936_v18 = vor.u32 %v935_v5, %v934_v3  ;;  %v4679_v5 = vld [vmem:[#allocation2 + $0x158] sm:$0xff] }
 0x123   : > { %v5618_v36 = vpop.f32.mrf.mxu0 }
 0x124   : > { %v937_v16 = vrot.slane %v936_v18, 4  ;;  %v943_v18 = vrot.slane %v648_v21, 4 }
 0x125   : > { %v5626_v34 = vpop.f32.mrf.mxu1 }
 0x126   : > { %4304 = vmatmul.msk.bf16.gmra.mxu0 %vm1258_vm2, %v4710_v45  ;;  %v658_v45 = vrot.slane %v656_v2, 7  ;;  %v939_v56 = vsel %vm5450_vm10, %v937_v16, %v938_v58  ;;  %v672_v58 = vshrl.u32 %v5382_v12, 16  ;;  %v949_v16 = vrot.slane %v656_v2, 4 }
 0x127   : > { %v5632_v11 = vpop.f32.mrf.mxu2  ;;  %1072 = vst.msk [vmem:[#allocation2 + $0x168] sm:$0xf] %vm294_vm0, %v939_v56  ;;  %v945_v21 = vor.u32 %v944_v29, %v943_v18 }
 0x128   : > { %v661_v62 = vor.u32 %v659_v50, %v658_v45  ;;  %v950_v57 = vor.u32 %v949_v16, %v947_v38  ;;  %v835_v50 = vld [vmem:[#allocation2 + $0x58] sm:$0xf] }
 0x129   : > { %v5635_v17 = vpop.f32.mrf.mxu3  ;;  %v946_v7 = vrot.slane %v945_v21, 4  ;;  %v4696_v21 = vld [vmem:[#allocation2 + $0x48] sm:$0xff] }
 0x12a   : > { %6193 = vst [vmem:[#allocation10_spill] sm:$0xff] %v5635_v17 }
 0x12b   : > { %v5639_v9 = vpop.f32.mrf.mxu0  ;;  %v948_v12 = vsel %vm5450_vm10, %v946_v7, %v947_v38  ;;  %v4680_v38 = vld [vmem:[#allocation2 + $0x160] sm:$0xff] }
 0x12c   : > { %4144 = vmatmul.msk.bf16.gmra.mxu2 %vm1258_vm2, %v4678_v24  ;;  %1076 = vst.msk [vmem:[#allocation2 + $0x170] sm:$0xf] %vm294_vm0, %v948_v12 }
 0x12d   : > { %v5642_v39 = vpop.f32.mrf.mxu1 }
 0x12e   : > { %4224 = vmatmul.msk.bf16.gmra.mxu3 %vm1258_vm2, %v4694_v63  ;;  %v662_v63 = vsel %vm5419_vm5, %v654_v48, %v661_v62  ;;  %v667_v48 = vshll.u32 %v5377_v10, 16  ;;  %v674_v62 = vrot.slane %v672_v58, 7 }
 0x12f   : > { %v5647_v55 = vpop.f32.mrf.mxu2  ;;  %834 = vst.msk [vmem:[#allocation2 + $0x54] sm:$0xf] %vm294_vm0, %v662_v63  ;;  %v951_v63 = vrot.slane %v950_v57, 4  ;;  %v688_v57 = vshrl.u32 %v5279_v30, 16 }
 0x130   : > { %4065 = vmatmul.msk.bf16.gmra.mxu1 %vm1258_vm2, %v4647_v25  ;;  %v664_v25 = vshrl.u32 %v5377_v10, 16 }
 0x131   : > { %v5650_v19 = vpop.f32.mrf.mxu3 }
 0x132   : > { %6194 = vst [vmem:[#allocation11_spill] sm:$0xff] %v5650_v19  ;;  %v666_v60 = vrot.slane %v664_v25, 7  ;;  %v1077_v19 = vld [vmem:[#allocation2 + $0x174] sm:$0xf] }
 0x133   : > { %v5652_v54 = vpop.f32.mrf.mxu0  ;;  %v1078_v17 = vsel %vm5457_vm11, %v951_v63, %v1077_v19  ;;  %v953_v63 = vrot.slane %v667_v48, 5 }
 0x134   : > { %1079 = vst [vmem:[#allocation2 + $0x174] sm:$0xf] %v1078_v17  ;;  %v683_v17 = vshll.u32 %v5274_v28, 16 }
 0x135   : > { %v5660_v24 = vpop.f32.mrf.mxu1 }
 0x136   : > { %4305 = vmatmul.msk.bf16.gmra.mxu0 %vm1258_vm2, %v4711_v0  ;;  %v4648_v0 = vld [vmem:[#allocation2 + $0x40] sm:$0xff] }
 0x137   : > { %v5666_v3 = vpop.f32.mrf.mxu2 }
 0x139   : > { %v5669_v33 = vpop.f32.mrf.mxu3 }
 0x13a   : > { %6195 = vst [vmem:[#allocation12_spill] sm:$0xff] %v5669_v33  ;;  %v670_v33 = vrot.slane %v666_v60, 4 }
 0x13b   : > { %v5673_v45 = vpop.f32.mrf.mxu0 }
 0x13c   : > { %4145 = vmatmul.msk.bf16.gmra.mxu2 %vm1258_vm2, %v4679_v5  ;;  %v669_v5 = vor.u32 %v667_v48, %v666_v60 }
 0x13d   : > { %v1540_v1 = vpop.f32.mrf.mxu1 }
 0x13e   : > { %4225 = vmatmul.msk.bf16.gmra.mxu3 %vm1258_vm2, %v4695_v23  ;;  %v677_v23 = vor.u32 %v675_v6, %v674_v62  ;;  %v836_v18 = vsel %vm5424_vm7, %v669_v5, %v835_v50  ;;  %v680_v62 = vshrl.u32 %v5274_v28, 16  ;;  %v1541_v50 = vadd.f32 %v1540_v1, %v5551_v4 }
 0x13f   : > { %v5679_v56 = vpop.f32.mrf.mxu2  ;;  %837 = vst [vmem:[#allocation2 + $0x58] sm:$0xf] %v836_v18  ;;  %v956_v18 = vrot.slane %v675_v6, 5  ;;  %v839_v6 = vld [vmem:[#allocation2 + $0x60] sm:$0xf] }
 0x140   : > { %4066 = vmatmul.msk.bf16.gmra.mxu1 %vm1258_vm2, %v4648_v0  ;;  %v678_v16 = vsel %vm5419_vm5, %v670_v33, %v677_v23  ;;  %v952_v33 = vrot.slane %v664_v25, 4  ;;  %v682_v23 = vrot.slane %v680_v62, 7 }
 0x141   : > { %v5682_v2 = vpop.f32.mrf.mxu3  ;;  %838 = vst.msk [vmem:[#allocation2 + $0x5c] sm:$0xf] %vm294_vm0, %v678_v16  ;;  %v691_v16 = vshll.u32 %v5279_v30, 16 }
 0x142   : > { %6196 = vst [vmem:[#allocation13_spill] sm:$0xff] %v5682_v2  ;;  %v4713_v2 = vld [vmem:[#allocation2 + $0xe0] sm:$0xff]  ;;  %v685_v4 = vor.u32 %v683_v17, %v682_v23  ;;  %v686_v52 = vrot.slane %v682_v23, 4 }
 0x143   : > { %v2367_v10 = vpop.f32.mrf.mxu0 }
 0x145   : > { %v1542_v29 = vpop.f32.mrf.mxu1 }
 0x146   : > { %4306 = vmatmul.msk.bf16.gmra.mxu0 %vm1258_vm2, %v4712_v32  ;;  %v1543_v0 = vadd.f32 %v1542_v29, %v5569_v35  ;;  %v958_v32 = vrot.slane %v672_v58, 4  ;;  %v4649_v35 = vld [vmem:[#allocation2 + $0x48] sm:$0xff]  ;;  %v690_v29 = vrot.slane %v688_v57, 7  ;;  %v954_v58 = vor.u32 %v953_v63, %v952_v33 }
 0x147   : > { %v5695_v60 = vpop.f32.mrf.mxu2  ;;  %v840_v33 = vsel %vm5424_vm7, %v685_v4, %v839_v6  ;;  %v699_v4 = vshll.u32 %v5304_v40, 16 }
 0x148   : > { %v955_v51 = vrot.slane %v954_v58, 4  ;;  %841 = vst [vmem:[#allocation2 + $0x60] sm:$0xf] %v840_v33  ;;  %v962_v58 = vrot.slane %v683_v17, 5 }
 0x149   : > { %v5698_v19 = vpop.f32.mrf.mxu3 }
 0x14a   : > { %6197 = vst [vmem:[#allocation14_spill] sm:$0xff] %v5698_v19  ;;  %v957_v30 = vsel %vm5450_vm10, %v955_v51, %v956_v18 }
 0x14b   : > { %v2369_v7 = vpop.f32.mrf.mxu0  ;;  %1080 = vst.msk [vmem:[#allocation2 + $0x178] sm:$0xf] %vm294_vm0, %v957_v30  ;;  %v707_v30 = vshll.u32 %v5309_v42, 16 }
 0x14c   : > { %4146 = vmatmul.msk.bf16.gmra.mxu2 %vm1258_vm2, %v4680_v38  ;;  %v959_v38 = vor.u32 %v958_v32, %v956_v18 }
 0x14d   : > { %v1545_v5 = vpop.f32.mrf.mxu1 }
 0x14e   : > { %4226 = vmatmul.msk.bf16.gmra.mxu3 %vm1258_vm2, %v4696_v21  ;;  %v1546_v12 = vadd.f32 %v1545_v5, %v5584_v53  ;;  %v960_v14 = vrot.slane %v959_v38, 4  ;;  %v1081_v21 = vld [vmem:[#allocation2 + $0x17c] sm:$0xf]  ;;  %v693_v53 = vor.u32 %v691_v16, %v690_v29  ;;  %v4697_v29 = vld [vmem:[#allocation2 + $0x50] sm:$0xff] }
 0x14f   : > { %v1793_v25 = vpop.f32.mrf.mxu2 }
 0x150   : > { %v1873_v48 = vadd.f32 %v1793_v25, %v1541_v50  ;;  %4067 = vmatmul.msk.bf16.gmra.mxu1 %vm1258_vm2, %v4649_v35  ;;  %v1082_v5 = vsel %vm5457_vm11, %v960_v14, %v1081_v21  ;;  %v694_v32 = vsel %vm5419_vm5, %v686_v52, %v693_v53  ;;  %v4681_v14 = vld [vmem:[#allocation2 + $0x168] sm:$0xff]  ;;  %v704_v25 = vshrl.u32 %v5309_v42, 16 }
 0x151   : > { %v2082_v19 = vpop.f32.mrf.mxu3  ;;  %1083 = vst [vmem:[#allocation2 + $0x17c] sm:$0xf] %v1082_v5  ;;  %v961_v52 = vrot.slane %v680_v62, 4  ;;  %v965_v53 = vrot.slane %v691_v16, 5  ;;  %v843_v16 = vld [vmem:[#allocation2 + $0x68] sm:$0xf] }
 0x152   : > { %v2162_v28 = vadd.f32 %v2082_v19, %v1873_v48  ;;  %842 = vst.msk [vmem:[#allocation2 + $0x64] sm:$0xf] %vm294_vm0, %v694_v32  ;;  %v706_v6 = vrot.slane %v704_v25, 7 }
 0x153   : > { %v2372_v1 = vpop.f32.mrf.mxu0 }
 0x154   : > { %v5715_v63 = vadd.f32 %v2367_v10, %v2162_v28  ;;  %v696_v10 = vshrl.u32 %v5304_v40, 16 }
 0x155   : > { %v1547_v19 = vpop.f32.mrf.mxu1 }
 0x156   : > { %4307 = vmatmul.msk.bf16.gmra.mxu0 %vm1258_vm2, %v4713_v2  ;;  %v1548_v35 = vadd.f32 %v1547_v19, %v5605_v8  ;;  %v967_v2 = vrot.slane %v688_v57, 4  ;;  %v4650_v8 = vld [vmem:[#allocation2 + $0x50] sm:$0xff]  ;;  %v698_v28 = vrot.slane %v696_v10, 7  ;;  %v963_v57 = vor.u32 %v962_v58, %v961_v52  ;;  %v4714_v19 = vld [vmem:[#allocation2 + $0xe8] sm:$0xff] }
 0x157   : > { %v1795_v51 = vpop.f32.mrf.mxu2 }
 0x158   : > { %v1874_v23 = vadd.f32 %v1795_v51, %v1543_v0  ;;  %v968_v5 = vor.u32 %v967_v2, %v965_v53  ;;  %v964_v32 = vrot.slane %v963_v57, 4  ;;  %v701_v40 = vor.u32 %v699_v4, %v698_v28 }
 0x159   : > { %v2084_v50 = vpop.f32.mrf.mxu3 }
 0x15a   : > { %v2163_v18 = vadd.f32 %v2084_v50, %v1874_v23  ;;  %v969_v51 = vrot.slane %v968_v5, 4  ;;  %v702_v50 = vrot.slane %v698_v28, 4  ;;  %v966_v42 = vsel %vm5450_vm10, %v964_v32, %v965_v53  ;;  %v4682_v28 = vld [vmem:[#allocation2 + $0x170] sm:$0xff] }
 0x15b   : > { %v2374_v48 = vpop.f32.mrf.mxu0  ;;  %1084 = vst.msk [vmem:[#allocation2 + $0x180] sm:$0xf] %vm294_vm0, %v966_v42  ;;  %v970_v5 = vrot.slane %v696_v10, 4 }
 0x15c   : > { %4147 = vmatmul.msk.bf16.gmra.mxu2 %vm1258_vm2, %v4681_v14  ;;  %v5726_v38 = vadd.f32 %v2369_v7, %v2163_v18  ;;  %v1085_v14 = vld [vmem:[#allocation2 + $0x184] sm:$0xf]  ;;  %v844_v18 = vsel %vm5424_vm7, %v701_v40, %v843_v16 }
 0x15d   : > { %v1550_v0 = vpop.f32.mrf.mxu1  ;;  %845 = vst [vmem:[#allocation2 + $0x68] sm:$0xf] %v844_v18 }
 0x15e   : > { %4227 = vmatmul.msk.bf16.gmra.mxu3 %vm1258_vm2, %v4697_v29  ;;  %v1551_v21 = vadd.f32 %v1550_v0, %v5618_v36  ;;  %v709_v36 = vor.u32 %v707_v30, %v706_v6 }
 0x15f   : > { %v1798_v62 = vpop.f32.mrf.mxu2 }
 0x160   : > { %v1875_v17 = vadd.f32 %v1798_v62, %v1546_v12  ;;  %4068 = vmatmul.msk.bf16.gmra.mxu1 %vm1258_vm2, %v4650_v8  ;;  %v1086_v12 = vsel %vm5457_vm11, %v969_v51, %v1085_v14  ;;  %v710_v58 = vsel %vm5419_vm5, %v702_v50, %v709_v36  ;;  %v4698_v62 = vld [vmem:[#allocation2 + $0x58] sm:$0xff]  ;;  %v715_v51 = vshll.u32 %v5346_v59, 16 }
 0x161   : > { %v2087_v7 = vpop.f32.mrf.mxu3  ;;  %1087 = vst [vmem:[#allocation2 + $0x184] sm:$0xf] %v1086_v12  ;;  %v974_v14 = vrot.slane %v707_v30, 5  ;;  %v723_v36 = vshll.u32 %v5351_v61, 16  ;;  %v4715_v12 = vld [vmem:[#allocation2 + $0xf0] sm:$0xff] }
 0x162   : > { %v2164_v33 = vadd.f32 %v2087_v7, %v1875_v17  ;;  %846 = vst.msk [vmem:[#allocation2 + $0x6c] sm:$0xf] %vm294_vm0, %v710_v58  ;;  %v720_v17 = vshrl.u32 %v5351_v61, 16  ;;  %v971_v7 = vrot.slane %v699_v4, 5  ;;  %v847_v30 = vld [vmem:[#allocation2 + $0x70] sm:$0xf] }
 0x163   : > { %v2377_v23 = vpop.f32.mrf.mxu0 }
 0x164   : > { %v5739_v29 = vadd.f32 %v2372_v1, %v2164_v33  ;;  %v712_v1 = vshrl.u32 %v5346_v59, 16  ;;  %v976_v33 = vrot.slane %v704_v25, 4  ;;  %v722_v50 = vrot.slane %v720_v17, 7 }
 0x165   : > { %v1552_v52 = vpop.f32.mrf.mxu1  ;;  %v972_v25 = vor.u32 %v971_v7, %v970_v5 }
 0x166   : > { %4308 = vmatmul.msk.bf16.gmra.mxu0 %vm1258_vm2, %v4714_v19  ;;  %v1553_v2 = vadd.f32 %v1552_v52, %v5639_v9  ;;  %v4651_v9 = vld [vmem:[#allocation2 + $0x58] sm:$0xff]  ;;  %v714_v32 = vrot.slane %v712_v1, 7  ;;  %v977_v16 = vor.u32 %v976_v33, %v974_v14 }
 0x167   : > { %v1800_v8 = vpop.f32.mrf.mxu2  ;;  %v973_v18 = vrot.slane %v972_v25, 4  ;;  %v980_v25 = vrot.slane %v715_v51, 5 }
 0x168   : > { %v1876_v0 = vadd.f32 %v1800_v8, %v1548_v35  ;;  %v978_v52 = vrot.slane %v977_v16, 4  ;;  %v717_v59 = vor.u32 %v715_v51, %v714_v32  ;;  %v1089_v8 = vld [vmem:[#allocation2 + $0x18c] sm:$0xf]  ;;  %v985_v16 = vrot.slane %v720_v17, 4 }
 0x169   : > { %v2089_v53 = vpop.f32.mrf.mxu3  ;;  %v975_v61 = vsel %vm5450_vm10, %v973_v18, %v974_v14  ;;  %v4699_v14 = vld [vmem:[#allocation2 + $0x60] sm:$0xff]  ;;  %v983_v18 = vrot.slane %v723_v36, 5 }
 0x16a   : > { %v2165_v6 = vadd.f32 %v2089_v53, %v1876_v0  ;;  %v718_v0 = vrot.slane %v714_v32, 4  ;;  %1088 = vst.msk [vmem:[#allocation2 + $0x188] sm:$0xf] %vm294_vm0, %v975_v61 }
 0x16b   : > { %v2379_v57 = vpop.f32.mrf.mxu0  ;;  %v986_v17 = vor.u32 %v985_v16, %v983_v18  ;;  %v4700_v16 = vld [vmem:[#allocation2 + $0x68] sm:$0xff] }
 0x16c   : > { %4148 = vmatmul.msk.bf16.gmra.mxu2 %vm1258_vm2, %v4682_v28  ;;  %v5750_v19 = vadd.f32 %v2374_v48, %v2165_v6  ;;  %v848_v28 = vsel %vm5424_vm7, %v717_v59, %v847_v30  ;;  %v739_v59 = vshll.u32 %v5392_v15, 16 }
 0x16d   : > { %v1555_v35 = vpop.f32.mrf.mxu1  ;;  %849 = vst [vmem:[#allocation2 + $0x70] sm:$0xf] %v848_v28  ;;  %v987_v61 = vrot.slane %v986_v17, 4 }
 0x16e   : > { %4228 = vmatmul.msk.bf16.gmra.mxu3 %vm1258_vm2, %v4698_v62  ;;  %v1556_v40 = vadd.f32 %v1555_v35, %v5652_v54  ;;  %v725_v54 = vor.u32 %v723_v36, %v722_v50  ;;  %v736_v50 = vshrl.u32 %v5392_v15, 16 }
 0x16f   : > { %v1803_v10 = vpop.f32.mrf.mxu2 }
 0x170   : > { %v1877_v4 = vadd.f32 %v1803_v10, %v1551_v21  ;;  %4069 = vmatmul.msk.bf16.gmra.mxu1 %vm1258_vm2, %v4651_v9  ;;  %v1090_v21 = vsel %vm5457_vm11, %v978_v52, %v1089_v8  ;;  %v726_v62 = vsel %vm5419_vm5, %v718_v0, %v725_v54  ;;  %v4683_v9 = vld [vmem:[#allocation2 + $0x178] sm:$0xff]  ;;  %v738_v52 = vrot.slane %v736_v50, 7 }
 0x171   : > { %v2092_v48 = vpop.f32.mrf.mxu3  ;;  %1091 = vst [vmem:[#allocation2 + $0x18c] sm:$0xf] %v1090_v21 }
 0x172   : > { %v2166_v42 = vadd.f32 %v2092_v48, %v1877_v4  ;;  %850 = vst.msk [vmem:[#allocation2 + $0x74] sm:$0xf] %vm294_vm0, %v726_v62  ;;  %v979_v4 = vrot.slane %v712_v1, 4  ;;  %v741_v36 = vor.u32 %v739_v59, %v738_v52  ;;  %v851_v62 = vld [vmem:[#allocation2 + $0x78] sm:$0xf]  ;;  %v433_v52 = vld [vmem:[%s5030_s9 + $0xf0] sm:$0xff] }
 0x173   : > { %v2382_v58 = vpop.f32.mrf.mxu0  ;;  %v5798_v17 = vpack.c.bf16 %v433_v52, %v433_v52 }
 0x174   : > { %v5763_v53 = vadd.f32 %v2377_v23, %v2166_v42  ;;  %v728_v23 = vshrl.u32 %v5387_v13, 16  ;;  %v981_v1 = vor.u32 %v980_v25, %v979_v4  ;;  %v4684_v4 = vld [vmem:[#allocation2 + $0x180] sm:$0xff] }
 0x175   : > { %v1557_v6 = vpop.f32.mrf.mxu1  ;;  %498 = vst.msk [vmem:[#allocation2 + $0x110] sm:$0xf] %vm294_vm0, %v5798_v17 }
 0x176   : > { %4309 = vmatmul.msk.bf16.gmra.mxu0 %vm1258_vm2, %v4715_v12  ;;  %v1558_v5 = vadd.f32 %v1557_v6, %v5673_v45  ;;  %v4652_v45 = vld [vmem:[#allocation2 + $0x60] sm:$0xff]  ;;  %v730_v42 = vrot.slane %v728_v23, 7  ;;  %v731_v12 = vshll.u32 %v5387_v13, 16  ;;  %v982_v30 = vrot.slane %v981_v1, 4  ;;  %v1093_v13 = vld [vmem:[#allocation2 + $0x194] sm:$0xf] }
 0x177   : > { %v1805_v7 = vpop.f32.mrf.mxu2  ;;  %v4653_v1 = vld [vmem:[#allocation2 + $0x68] sm:$0xff] }
 0x178   : > { %v1878_v33 = vadd.f32 %v1805_v7, %v1553_v2  ;;  %v733_v21 = vor.u32 %v731_v12, %v730_v42  ;;  %v734_v6 = vrot.slane %v730_v42, 4  ;;  %v984_v15 = vsel %vm5450_vm10, %v982_v30, %v983_v18 }
 0x179   : > { %v2094_v35 = vpop.f32.mrf.mxu3  ;;  %1092 = vst.msk [vmem:[#allocation2 + $0x190] sm:$0xf] %vm294_vm0, %v984_v15  ;;  %v989_v42 = vrot.slane %v731_v12, 5  ;;  %v744_v12 = vshrl.u32 %v5798_v17, 16  ;;  %v4654_v43 = vld [vmem:[#allocation2 + $0x70] sm:$0xff] }
 0x17a   : > { %v2167_v32 = vadd.f32 %v2094_v35, %v1878_v33  ;;  %v852_v7 = vsel %vm5424_vm7, %v733_v21, %v851_v62  ;;  %v742_v35 = vsel %vm5419_vm5, %v734_v6, %v741_v36  ;;  %v4717_v62 = vld [vmem:[#allocation2 + $0x100] sm:$0xff] }
 0x17b   : > { %v2384_v10 = vpop.f32.mrf.mxu0  ;;  %853 = vst [vmem:[#allocation2 + $0x78] sm:$0xf] %v852_v7 }
 0x17c   : > { %4149 = vmatmul.msk.bf16.gmra.mxu2 %vm1258_vm2, %v4683_v9  ;;  %v5774_v48 = vadd.f32 %v2379_v57, %v2167_v32  ;;  %v4716_v57 = vld [vmem:[#allocation2 + $0xf8] sm:$0xff]  ;;  %854 = vst.msk [vmem:[#allocation2 + $0x7c] sm:$0xf] %vm294_vm0, %v742_v35 }
 0x17d   : > { %v1560_v2 = vpop.f32.mrf.mxu1 }
 0x17e   : > { %4229 = vmatmul.msk.bf16.gmra.mxu3 %vm1258_vm2, %v4699_v14 }
 0x17f   : > { %v1808_v8 = vpop.f32.mrf.mxu2 }
 0x180   : > { %v1879_v0 = vadd.f32 %v1808_v8, %v1556_v40  ;;  %4070 = vmatmul.msk.bf16.gmra.mxu1 %vm1258_vm2, %v4652_v45  ;;  %v1094_v40 = vsel %vm5457_vm11, %v987_v61, %v1093_v13  ;;  %v988_v45 = vrot.slane %v728_v23, 4  ;;  %v434_v8 = vld [vmem:[%s5030_s9 + $0xf8] sm:$0xff]  ;;  %v992_v23 = vrot.slane %v739_v59, 5  ;;  %s4784_s9 = sshll.u32 %s4918_s18, 8  ;;  %s3764_s18 = scalar_lea.sflag [#allocation5], %s263_s30 }
 0x181   : > { %v2097_v51 = vpop.f32.mrf.mxu3  ;;  %1095 = vst [vmem:[#allocation2 + $0x194] sm:$0xf] %v1094_v40  ;;  %v747_v59 = vshll.u32 %v5798_v17, 16  ;;  %v1101_v17 = vld [vmem:[#allocation2 + $0x1a4] sm:$0xf]  ;;  %s3776_s12 = scalar_lea.hbm %s6179_s4, %s4784_s9 }
 0x182   : > { %v2168_v54 = vadd.f32 %v2097_v51, %v1879_v0  ;;  %v994_v0 = vrot.slane %v736_v50, 4  ;;  %v5800_v51 = vpack.c.bf16 %v434_v8, %v434_v8  ;;  %s3779_s14 = sshll.u32 %s3776_s12, 4  ;;  %s3780_s14 = int_to_ptr.hbm [resolvable:$true] %s3779_s14 }
 0x183   : > { %v5780_v28 = vpop.f32.mrf.mxu0  ;;  %s4862_s21 = sshra.s32 %s3780_s14, 4  ;;  %s4863_s21 = int_to_ptr.hbm [resolvable:$true] %s4862_s21 }
 0x184   : > { %v5788_v33 = vadd.f32 %v2382_v58, %v2168_v54  ;;  %v752_v30 = vshrl.u32 %v5800_v51, 16  ;;  %499 = vst.msk [vmem:[#allocation2 + $0x114] sm:$0xf] %vm294_vm0, %v5800_v51  ;;  %v995_v21 = vor.u32 %v994_v0, %v992_v23  ;;  %v755_v6 = vshll.u32 %v5800_v51, 16  ;;  %s4864_s22 = scalar_lea.hbm %s4863_s21, 256  ;;  %p4869_p1 = scmp.lt.s32.totalorder %s4863_s21, %s6179_s4 }
 0x185   : > { %v1562_v9 = vpop.f32.mrf.mxu1  ;;  %p4865_p12 = scmp.ne.s32.totalorder %s4863_s21, %s4864_s22  ;;  %p4870_p2 = scmp.lt.s32.totalorder %s4868_s29, %s4864_s22 }
 0x186   : > { %4310 = vmatmul.msk.bf16.gmra.mxu0 %vm1258_vm2, %v4716_v57  ;;  %v1561_v57 = vadd.f32 %v1560_v2, %v5545_v47  ;;  %v746_v47 = vrot.slane %v744_v12, 7  ;;  %v754_v13 = vrot.slane %v752_v30, 7  ;;  %v996_v40 = vrot.slane %v995_v21, 4 }
 0x187   : > { %v1810_v32 = vpop.f32.mrf.mxu2  ;;  %v1563_v0 = vadd.f32 %v1562_v9, %v5556_v20  ;;  %p4866_p13 = pnand %p4865_p12, %p4996_p4  ;;  %p4871_p3 = por %p4870_p2, %p4869_p1 }
 0x188   : > { %v1880_v14 = vadd.f32 %v1810_v32, %v1558_v5  ;;  %v750_v7 = vrot.slane %v746_v47, 4  ;;  %v1097_v32 = vld [vmem:[#allocation2 + $0x19c] sm:$0xf]  ;;  %v4733_v31 = vld [vmem:[#allocation2 + $0x190] sm:$0xff] }
 0x189   : > { %v2099_v25 = vpop.f32.mrf.mxu3  ;;  %p4867_p0 = pneg %p4866_p13 }
 0x18a   : > { %v2169_v58 = vadd.f32 %v2099_v25, %v1880_v14  ;;  %v749_v14 = vor.u32 %v747_v59, %v746_v47  ;;  %v855_v25 = vld [vmem:[#allocation2 + $0x80] sm:$0xf] }
 0x18b   : > { %v2389_v18 = vpop.f32.mrf.mxu0  ;;  %p4872_p5 = pnand %p4871_p3, %p4867_p0 }
 0x18c   : > { %4150 = vmatmul.msk.bf16.gmra.mxu2 %vm1258_vm2, %v4684_v4  ;;  %v5802_v5 = vadd.f32 %v2384_v10, %v2169_v58  ;;  %v990_v10 = vor.u32 %v989_v42, %v988_v45  ;;  %v757_v4 = vor.u32 %v755_v6, %v754_v13  ;;  %v856_v8 = vsel %vm5424_vm7, %v749_v14, %v855_v25 }
 0x18d   : > { %v1565_v54 = vpop.f32.mrf.mxu1  ;;  %857 = vst [vmem:[#allocation2 + $0x80] sm:$0xf] %v856_v8 }
 0x18e   : > { %4230 = vmatmul.msk.bf16.gmra.mxu3 %vm1258_vm2, %v4700_v16  ;;  %v991_v15 = vrot.slane %v990_v10, 4  ;;  %v1098_v16 = vsel %vm5457_vm11, %v996_v40, %v1097_v32  ;;  %v758_v52 = vsel %vm5419_vm5, %v750_v7, %v757_v4  ;;  %v1566_v20 = vadd.f32 %v1565_v54, %v5574_v37  ;;  %v4686_v37 = vld [vmem:[#allocation2 + $0x190] sm:$0xff]  ;;  %v4702_v4 = vld [vmem:[#allocation2 + $0x78] sm:$0xff] }
 0x18f   : > { %v1813_v50 = vpop.f32.mrf.mxu2  ;;  %1099 = vst [vmem:[#allocation2 + $0x19c] sm:$0xf] %v1098_v16 }
 0x190   : > { %v1881_v61 = vadd.f32 %v1813_v50, %v1561_v57  ;;  %4071 = vmatmul.msk.bf16.gmra.mxu1 %vm1258_vm2, %v4653_v1  ;;  %v993_v58 = vsel %vm5450_vm10, %v991_v15, %v992_v23  ;;  %v4685_v23 = vld [vmem:[#allocation2 + $0x188] sm:$0xff]  ;;  %858 = vst.msk [vmem:[#allocation2 + $0x84] sm:$0xf] %vm294_vm0, %v758_v52 }
 0x191   : > { %v2102_v2 = vpop.f32.mrf.mxu3  ;;  %1096 = vst.msk [vmem:[#allocation2 + $0x198] sm:$0xf] %vm294_vm0, %v993_v58  ;;  %v4655_v58 = vld [vmem:[#allocation2 + $0x78] sm:$0xff] }
 0x192   : > { %v2170_v36 = vadd.f32 %v2102_v2, %v1881_v61  ;;  %v4701_v61 = vld [vmem:[#allocation2 + $0x70] sm:$0xff] }
 0x193   : > { %v2392_v35 = vpop.f32.mrf.mxu0 }
 0x194   : > { %v5828_v45 = vadd.f32 %v5780_v28, %v2170_v36  ;;  %v4718_v36 = vld [vmem:[#allocation2 + $0x108] sm:$0xff] }
 0x195   : > { %v1567_v42 = vpop.f32.mrf.mxu1 }
 0x196   : > { %4311 = vmatmul.msk.bf16.gmra.mxu0 %vm1258_vm2, %v4717_v62  ;;  %v1568_v7 = vadd.f32 %v1567_v42, %v5592_v26 }
 0x197   : > { %v1815_v1 = vpop.f32.mrf.mxu2 }
 0x198   : > { %v1882_v57 = vadd.f32 %v1815_v1, %v1563_v0  ;;  %v4719_v1 = vld [vmem:[#allocation2 + $0x110] sm:$0xff] }
 0x199   : > { %v2104_v28 = vpop.f32.mrf.mxu3 }
 0x19a   : > { %v2171_v50 = vadd.f32 %v2104_v28, %v1882_v57 }
 0x19b   : > { %v2394_v10 = vpop.f32.mrf.mxu0 }
 0x19c   : > { %4151 = vmatmul.msk.bf16.gmra.mxu2 %vm1258_vm2, %v4685_v23  ;;  %v5839_v46 = vadd.f32 %v2389_v18, %v2171_v50 }
 0x19d   : > { %v1570_v21 = vpop.f32.mrf.mxu1 }
 0x19e   : > { %4231 = vmatmul.msk.bf16.gmra.mxu3 %vm1258_vm2, %v4701_v61 }
 0x19f   : > { %v1818_v9 = vpop.f32.mrf.mxu2 }
 0x1a0   : > { %v1883_v47 = vadd.f32 %v1818_v9, %v1566_v20  ;;  %4072 = vmatmul.msk.bf16.gmra.mxu1 %vm1258_vm2, %v4654_v43  ;;  %v4703_v20 = vld [vmem:[#allocation2 + $0x80] sm:$0xff] }
 0x1a1   : > { %v2107_v2 = vpop.f32.mrf.mxu3 }
 0x1a2   : > { %v2172_v13 = vadd.f32 %v2107_v2, %v1883_v47  ;;  %v4720_v47 = vld [vmem:[#allocation2 + $0x128] sm:$0xff] }
 0x1a3   : > { %v2397_v62 = vpop.f32.mrf.mxu0 }
 0x1a4   : > { %v5844_v15 = vadd.f32 %v2392_v35, %v2172_v13  ;;  %v1571_v35 = vadd.f32 %v1570_v21, %v5608_v41  ;;  %v4687_v41 = vld [vmem:[#allocation2 + $0x198] sm:$0xff] }
 0x1a5   : > { %v1572_v40 = vpop.f32.mrf.mxu1 }
 0x1a6   : > { %4312 = vmatmul.msk.bf16.gmra.mxu0 %vm1258_vm2, %v4718_v36  ;;  %v1573_v50 = vadd.f32 %v1572_v40, %v5626_v34 }
 0x1a7   : > { %v1820_v18 = vpop.f32.mrf.mxu2 }
 0x1a8   : > { %v1884_v32 = vadd.f32 %v1820_v18, %v1568_v7  ;;  %v4768_v18 = vld [vmem:[#allocation2 + $0x130] sm:$0xff] }
 0x1a9   : > { %v2109_v54 = vpop.f32.mrf.mxu3 }
 0x1aa   : > { %v2173_v14 = vadd.f32 %v2109_v54, %v1884_v32 }
 0x1ab   : > { %v2399_v25 = vpop.f32.mrf.mxu0 }
 0x1ac   : > { %4152 = vmatmul.msk.bf16.gmra.mxu2 %vm1258_vm2, %v4686_v37  ;;  %v5849_v16 = vadd.f32 %v2394_v10, %v2173_v14 }
 0x1ad   : > { %v1575_v52 = vpop.f32.mrf.mxu1 }
 0x1ae   : > { %4232 = vmatmul.msk.bf16.gmra.mxu3 %vm1258_vm2, %v4702_v4  ;;  %v1576_v36 = vadd.f32 %v1575_v52, %v5642_v39  ;;  %v4736_v39 = vld [vmem:[#allocation2 + $0x10] sm:$0xff] }
 0x1af   : > { %v1823_v26 = vpop.f32.mrf.mxu2 }
 0x1b0   : > { %v1885_v42 = vadd.f32 %v1823_v26, %v1571_v35  ;;  %4073 = vmatmul.msk.bf16.gmra.mxu1 %vm1258_vm2, %v4655_v58  ;;  %v4752_v35 = vld [vmem:[#allocation2 + $0xa0] sm:$0xff] }
 0x1b1   : > { %v2112_v8 = vpop.f32.mrf.mxu3 }
 0x1b2   : > { %v2174_v0 = vadd.f32 %v2112_v8, %v1885_v42  ;;  %v4721_v42 = vld [vmem:[#allocation2 + $0x130] sm:$0xff] }
 0x1b3   : > { %v2402_v57 = vpop.f32.mrf.mxu0 }
 0x1b4   : > { %v5854_v23 = vadd.f32 %v2397_v62, %v2174_v0 }
 0x1b5   : > { %v1577_v28 = vpop.f32.mrf.mxu1 }
 0x1b6   : > { %4313 = vmatmul.msk.bf16.gmra.mxu0 %vm1258_vm2, %v4719_v1  ;;  %v1578_v14 = vadd.f32 %v1577_v28, %v5660_v24 }
 0x1b7   : > { %v1825_v61 = vpop.f32.mrf.mxu2 }
 0x1b8   : > { %v1886_v10 = vadd.f32 %v1825_v61, %v1573_v50  ;;  %v4769_v61 = vld [vmem:[#allocation2 + $0x138] sm:$0xff] }
 0x1b9   : > { %v2114_v43 = vpop.f32.mrf.mxu3 }
 0x1ba   : > { %v2175_v21 = vadd.f32 %v2114_v43, %v1886_v10 }
 0x1bb   : > { %v2404_v9 = vpop.f32.mrf.mxu0 }
 0x1bc   : > { %4153 = vmatmul.msk.bf16.gmra.mxu2 %vm1258_vm2, %v4687_v41  ;;  %v5859_v2 = vadd.f32 %v2399_v25, %v2175_v21 }
 0x1bd   : > { %v1580_v13 = vpop.f32.mrf.mxu1 }
 0x1be   : > { %4233 = vmatmul.msk.bf16.gmra.mxu3 %vm1258_vm2, %v4703_v20  ;;  %v1581_v1 = vadd.f32 %v1580_v13, %v5577_v44  ;;  %v4737_v44 = vld [vmem:[#allocation2 + $0x18] sm:$0xff] }
 0x1bf   : > { %v1828_v34 = vpop.f32.mrf.mxu2 }
 0x1c0   : > { %v1887_v62 = vadd.f32 %v1828_v34, %v1576_v36  ;;  %4378 = vmatmul.msk.bf16.vlgmr.msra.gmra.mxu1 %vm1258_vm2, %v4720_v47  ;;  %v4753_v36 = vld [vmem:[#allocation2 + $0xa8] sm:$0xff] }
 0x1c1   : > { %v2117_v40 = vpop.f32.mrf.mxu3 }
 0x1c2   : > { %v2176_v7 = vadd.f32 %v2117_v40, %v1887_v62  ;;  %v4722_v62 = vld [vmem:[#allocation2 + $0x138] sm:$0xff] }
 0x1c3   : > { %v2407_v32 = vpop.f32.mrf.mxu0 }
 0x1c4   : > { %v5864_v37 = vadd.f32 %v2402_v57, %v2176_v7 }
 0x1c5   : > { %v1582_v54 = vpop.f32.mrf.mxu1 }
 0x1c6   : > { %4618 = vmatmul.msk.bf16.vlgmr.msra.gmra.mxu0 %vm1258_vm2, %v4768_v18  ;;  %v1583_v21 = vadd.f32 %v1582_v54, %v5598_v27 }
 0x1c7   : > { %v1830_v4 = vpop.f32.mrf.mxu2 }
 0x1c8   : > { %v1888_v25 = vadd.f32 %v1830_v4, %v1578_v14  ;;  %v4770_v4 = vld [vmem:[#allocation2 + $0x140] sm:$0xff] }
 0x1c9   : > { %v2119_v58 = vpop.f32.mrf.mxu3 }
 0x1ca   : > { %v2177_v52 = vadd.f32 %v2119_v58, %v1888_v25 }
 0x1cb   : > { %v2409_v26 = vpop.f32.mrf.mxu0 }
 0x1cc   : > { %4458 = vmatmul.msk.bf16.vlgmr.msra.gmra.mxu2 %vm1258_vm2, %v4736_v39  ;;  %v5869_v8 = vadd.f32 %v2404_v9, %v2177_v52 }
 0x1cd   : > { %v1585_v0 = vpop.f32.mrf.mxu1 }
 0x1ce   : > { %4538 = vmatmul.msk.bf16.vlgmr.msra.gmra.mxu3 %vm1258_vm2, %v4752_v35  ;;  %v1586_v18 = vadd.f32 %v1585_v0, %v5613_v49  ;;  %v4738_v49 = vld [vmem:[#allocation2 + $0x20] sm:$0xff] }
 0x1cf   : > { %v1833_v24 = vpop.f32.mrf.mxu2 }
 0x1d0   : > { %v1889_v57 = vadd.f32 %v1833_v24, %v1581_v1  ;;  %4379 = vmatmul.msk.bf16.gmra.mxu1 %vm1258_vm2, %v4721_v42  ;;  %v4754_v1 = vld [vmem:[#allocation2 + $0xb0] sm:$0xff] }
 0x1d1   : > { %v2122_v28 = vpop.f32.mrf.mxu3 }
 0x1d2   : > { %v2178_v50 = vadd.f32 %v2122_v28, %v1889_v57  ;;  %v4723_v57 = vld [vmem:[#allocation2 + $0x140] sm:$0xff] }
 0x1d3   : > { %v2412_v10 = vpop.f32.mrf.mxu0 }
 0x1d4   : > { %v5874_v41 = vadd.f32 %v2407_v32, %v2178_v50 }
 0x1d5   : > { %v1587_v43 = vpop.f32.mrf.mxu1 }
 0x1d6   : > { %4619 = vmatmul.msk.bf16.gmra.mxu0 %vm1258_vm2, %v4769_v61  ;;  %v1588_v52 = vadd.f32 %v1587_v43, %v5632_v11 }
 0x1d7   : > { %v1835_v20 = vpop.f32.mrf.mxu2 }
 0x1d8   : > { %v1890_v9 = vadd.f32 %v1835_v20, %v1583_v21  ;;  %v4771_v20 = vld [vmem:[#allocation2 + $0x148] sm:$0xff] }
 0x1d9   : > { %v2124_v47 = vpop.f32.mrf.mxu3 }
 0x1da   : > { %v2179_v13 = vadd.f32 %v2124_v47, %v1890_v9 }
 0x1db   : > { %v2414_v34 = vpop.f32.mrf.mxu0 }
 0x1dc   : > { %4459 = vmatmul.msk.bf16.gmra.mxu2 %vm1258_vm2, %v4737_v44  ;;  %v5879_v40 = vadd.f32 %v2409_v26, %v2179_v13 }
 0x1dd   : > { %v1590_v7 = vpop.f32.mrf.mxu1 }
 0x1de   : > { %4539 = vmatmul.msk.bf16.gmra.mxu3 %vm1258_vm2, %v4753_v36  ;;  %v1591_v61 = vadd.f32 %v1590_v7, %v5647_v55  ;;  %v4739_v55 = vld [vmem:[#allocation2 + $0x28] sm:$0xff] }
 0x1df   : > { %v1838_v27 = vpop.f32.mrf.mxu2 }
 0x1e0   : > { %v1891_v32 = vadd.f32 %v1838_v27, %v1586_v18  ;;  %4380 = vmatmul.msk.bf16.gmra.mxu1 %vm1258_vm2, %v4722_v62  ;;  %v4755_v18 = vld [vmem:[#allocation2 + $0xb8] sm:$0xff] }
 0x1e1   : > { %v2127_v54 = vpop.f32.mrf.mxu3 }
 0x1e2   : > { %v2180_v14 = vadd.f32 %v2127_v54, %v1891_v32  ;;  %v4724_v32 = vld [vmem:[#allocation2 + $0x148] sm:$0xff] }
 0x1e3   : > { %v2417_v25 = vpop.f32.mrf.mxu0 }
 0x1e4   : > { %v5884_v39 = vadd.f32 %v2412_v10, %v2180_v14 }
 0x1e5   : > { %v1592_v58 = vpop.f32.mrf.mxu1 }
 0x1e6   : > { %4620 = vmatmul.msk.bf16.gmra.mxu0 %vm1258_vm2, %v4770_v4  ;;  %v1593_v13 = vadd.f32 %v1592_v58, %v5666_v3 }
 0x1e7   : > { %v1840_v35 = vpop.f32.mrf.mxu2 }
 0x1e8   : > { %v1892_v26 = vadd.f32 %v1840_v35, %v1588_v52  ;;  %v4772_v35 = vld [vmem:[#allocation2 + $0x150] sm:$0xff] }
 0x1e9   : > { %v2129_v42 = vpop.f32.mrf.mxu3 }
 0x1ea   : > { %v2181_v0 = vadd.f32 %v2129_v42, %v1892_v26 }
 0x1eb   : > { %v2419_v24 = vpop.f32.mrf.mxu0 }
 0x1ec   : > { %4460 = vmatmul.msk.bf16.gmra.mxu2 %vm1258_vm2, %v4738_v49  ;;  %v5889_v28 = vadd.f32 %v2414_v34, %v2181_v0 }
 0x1ed   : > { %v1595_v50 = vpop.f32.mrf.mxu1 }
 0x1ee   : > { %4540 = vmatmul.msk.bf16.gmra.mxu3 %vm1258_vm2, %v4754_v1  ;;  %v1596_v4 = vadd.f32 %v1595_v50, %v5679_v56  ;;  %v4740_v56 = vld [vmem:[#allocation2 + $0x30] sm:$0xff] }
 0x1ef   : > { %v1843_v11 = vpop.f32.mrf.mxu2 }
 0x1f0   : > { %v1893_v10 = vadd.f32 %v1843_v11, %v1591_v61  ;;  %4381 = vmatmul.msk.bf16.gmra.mxu1 %vm1258_vm2, %v4723_v57  ;;  %v4756_v61 = vld [vmem:[#allocation2 + $0xc0] sm:$0xff] }
 0x1f1   : > { %v2132_v43 = vpop.f32.mrf.mxu3 }
 0x1f2   : > { %v2182_v21 = vadd.f32 %v2132_v43, %v1893_v10  ;;  %v4725_v10 = vld [vmem:[#allocation2 + $0x150] sm:$0xff] }
 0x1f3   : > { %v2422_v9 = vpop.f32.mrf.mxu0 }
 0x1f4   : > { %v5894_v44 = vadd.f32 %v2417_v25, %v2182_v21 }
 0x1f5   : > { %v1597_v47 = vpop.f32.mrf.mxu1 }
 0x1f6   : > { %4621 = vmatmul.msk.bf16.gmra.mxu0 %vm1258_vm2, %v4771_v20  ;;  %v1598_v0 = vadd.f32 %v1597_v47, %v5695_v60  ;;  %v6198_v20 = vld [vmem:[#allocation7_spill] sm:$0xff] }
 0x1f7   : > { %v1845_v36 = vpop.f32.mrf.mxu2 }
 0x1f8   : > { %v1894_v34 = vadd.f32 %v1845_v36, %v1593_v13 }
 0x1f9   : > { %v2134_v62 = vpop.f32.mrf.mxu3 }
 0x1fa   : > { %v2183_v7 = vadd.f32 %v2134_v62, %v1894_v34  ;;  %v4773_v34 = vld [vmem:[#allocation2 + $0x158] sm:$0xff] }
 0x1fb   : > { %v2424_v27 = vpop.f32.mrf.mxu0 }
 0x1fc   : > { %4461 = vmatmul.msk.bf16.gmra.mxu2 %vm1258_vm2, %v4739_v55  ;;  %v5899_v54 = vadd.f32 %v2419_v24, %v2183_v7 }
 0x1fd   : > { %v1600_v14 = vpop.f32.mrf.mxu1 }
 0x1fe   : > { %4541 = vmatmul.msk.bf16.gmra.mxu3 %vm1258_vm2, %v4755_v18  ;;  %v6199_v18 = vld [vmem:[#allocation8_spill] sm:$0xff] }
 0x1ff   : > { %v1848_v3 = vpop.f32.mrf.mxu2 }
 0x200   : > { %v1895_v25 = vadd.f32 %v1848_v3, %v1596_v4  ;;  %4382 = vmatmul.msk.bf16.gmra.mxu1 %vm1258_vm2, %v4724_v32 }
 0x201   : > { %v2137_v58 = vpop.f32.mrf.mxu3 }
 0x202   : > { %v2184_v52 = vadd.f32 %v2137_v58, %v1895_v25  ;;  %v4757_v58 = vld [vmem:[#allocation2 + $0xc8] sm:$0xff] }
 0x203   : > { %v2427_v26 = vpop.f32.mrf.mxu0 }
 0x204   : > { %v5904_v49 = vadd.f32 %v2422_v9, %v2184_v52  ;;  %v1601_v9 = vadd.f32 %v1600_v14, %v6198_v20  ;;  %v4741_v14 = vld [vmem:[#allocation2 + $0x38] sm:$0xff] }
 0x205   : > { %v1602_v42 = vpop.f32.mrf.mxu1 }
 0x206   : > { %4622 = vmatmul.msk.bf16.gmra.mxu0 %vm1258_vm2, %v4772_v35  ;;  %v1603_v32 = vadd.f32 %v1602_v42, %v6199_v18  ;;  %v4726_v35 = vld [vmem:[#allocation2 + $0x158] sm:$0xff]  ;;  %v4758_v18 = vld [vmem:[#allocation2 + $0xd0] sm:$0xff] }
 0x207   : > { %v1850_v1 = vpop.f32.mrf.mxu2 }
 0x208   : > { %v1896_v24 = vadd.f32 %v1850_v1, %v1598_v0 }
 0x209   : > { %v2139_v57 = vpop.f32.mrf.mxu3 }
 0x20a   : > { %v2185_v50 = vadd.f32 %v2139_v57, %v1896_v24 }
 0x20b   : > { %v2429_v11 = vpop.f32.mrf.mxu0 }
 0x20c   : > { %4462 = vmatmul.msk.bf16.gmra.mxu2 %vm1258_vm2, %v4740_v56  ;;  %v5909_v43 = vadd.f32 %v2424_v27, %v2185_v50 }
 0x20d   : > { %v1605_v21 = vpop.f32.mrf.mxu1 }
 0x20e   : > { %4542 = vmatmul.msk.bf16.gmra.mxu3 %vm1258_vm2, %v4756_v61  ;;  %v4774_v61 = vld [vmem:[#allocation2 + $0x160] sm:$0xff] }
 0x20f   : > { %v1853_v60 = vpop.f32.mrf.mxu2 }
 0x210   : > { %v1897_v47 = vadd.f32 %v1853_v60, %v1601_v9  ;;  %4383 = vmatmul.msk.bf16.gmra.mxu1 %vm1258_vm2, %v4725_v10  ;;  %v6201_v60 = vld [vmem:[#allocation10_spill] sm:$0xff] }
 0x211   : > { %v2142_v13 = vpop.f32.mrf.mxu3 }
 0x212   : > { %v2186_v36 = vadd.f32 %v2142_v13, %v1897_v47 }
 0x213   : > { %v2432_v55 = vpop.f32.mrf.mxu0 }
 0x214   : > { %v5914_v62 = vadd.f32 %v2427_v26, %v2186_v36  ;;  %v6200_v26 = vld [vmem:[#allocation9_spill] sm:$0xff] }
 0x215   : > { %v1607_v7 = vpop.f32.mrf.mxu1  ;;  %v1606_v24 = vadd.f32 %v1605_v21, %v6200_v26  ;;  %v4742_v21 = vld [vmem:[#allocation2 + $0x40] sm:$0xff]  ;;  %v4775_v26 = vld [vmem:[#allocation2 + $0x168] sm:$0xff] }
 0x216   : > { %4623 = vmatmul.msk.bf16.gmra.mxu0 %vm1258_vm2, %v4773_v34  ;;  %v1608_v47 = vadd.f32 %v1607_v7, %v6201_v60 }
 0x217   : > { %v1855_v27 = vpop.f32.mrf.mxu2 }
 0x218   : > { %v1898_v4 = vadd.f32 %v1855_v27, %v1603_v32  ;;  %v4727_v27 = vld [vmem:[#allocation2 + $0x160] sm:$0xff] }
 0x219   : > { %v2144_v3 = vpop.f32.mrf.mxu3 }
 0x21a   : > { %v2187_v25 = vadd.f32 %v2144_v3, %v1898_v4 }
 0x21b   : > { %v2434_v52 = vpop.f32.mrf.mxu0 }
 0x21c   : > { %4463 = vmatmul.msk.bf16.gmra.mxu2 %vm1258_vm2, %v4741_v14  ;;  %v5919_v0 = vadd.f32 %v2429_v11, %v2187_v25 }
 0x21d   : > { %v1610_v1 = vpop.f32.mrf.mxu1 }
 0x21e   : > { %4543 = vmatmul.msk.bf16.gmra.mxu3 %vm1258_vm2, %v4757_v58 }
 0x21f   : > { %v1858_v42 = vpop.f32.mrf.mxu2 }
 0x220   : > { %v1899_v56 = vadd.f32 %v1858_v42, %v1606_v24  ;;  %4384 = vmatmul.msk.bf16.gmra.mxu1 %vm1258_vm2, %v4726_v35 }
 0x221   : > { %v2147_v57 = vpop.f32.mrf.mxu3 }
 0x222   : > { %v2188_v50 = vadd.f32 %v2147_v57, %v1899_v56  ;;  %v6203_v57 = vld [vmem:[#allocation12_spill] sm:$0xff] }
 0x223   : > { %v2437_v10 = vpop.f32.mrf.mxu0 }
 0x224   : > { %v5924_v20 = vadd.f32 %v2432_v55, %v2188_v50  ;;  %v6202_v55 = vld [vmem:[#allocation11_spill] sm:$0xff] }
 0x225   : > { %v1612_v9 = vpop.f32.mrf.mxu1  ;;  %v1611_v3 = vadd.f32 %v1610_v1, %v6202_v55  ;;  %v4743_v1 = vld [vmem:[#allocation2 + $0x48] sm:$0xff] }
 0x226   : > { %4624 = vmatmul.msk.bf16.gmra.mxu0 %vm1258_vm2, %v4774_v61  ;;  %v1613_v50 = vadd.f32 %v1612_v9, %v6203_v57 }
 0x227   : > { %v1860_v11 = vpop.f32.mrf.mxu2 }
 0x228   : > { %v1900_v13 = vadd.f32 %v1860_v11, %v1608_v47  ;;  %v4759_v11 = vld [vmem:[#allocation2 + $0xd8] sm:$0xff] }
 0x229   : > { %v2149_v36 = vpop.f32.mrf.mxu3 }
 0x22a   : > { %v2189_v34 = vadd.f32 %v2149_v36, %v1900_v13 }
 0x22b   : > { %v2439_v32 = vpop.f32.mrf.mxu0 }
 0x22c   : > { %4464 = vmatmul.msk.bf16.gmra.mxu2 %vm1258_vm2, %v4742_v21  ;;  %v5929_v4 = vadd.f32 %v2434_v52, %v2189_v34  ;;  %v4728_v21 = vld [vmem:[#allocation2 + $0x168] sm:$0xff] }
 0x22d   : > { %v1615_v14 = vpop.f32.mrf.mxu1 }
 0x22e   : > { %4544 = vmatmul.msk.bf16.gmra.mxu3 %vm1258_vm2, %v4758_v18 }
 0x22f   : > { %v1863_v7 = vpop.f32.mrf.mxu2 }
 0x230   : > { %v1901_v25 = vadd.f32 %v1863_v7, %v1611_v3  ;;  %4385 = vmatmul.msk.bf16.gmra.mxu1 %vm1258_vm2, %v4727_v27  ;;  %v4776_v7 = vld [vmem:[#allocation2 + $0x170] sm:$0xff] }
 0x231   : > { %v2152_v58 = vpop.f32.mrf.mxu3 }
 0x232   : > { %v2190_v35 = vadd.f32 %v2152_v58, %v1901_v25 }
 0x233   : > { %v2442_v24 = vpop.f32.mrf.mxu0 }
 0x234   : > { %v5934_v42 = vadd.f32 %v2437_v10, %v2190_v35  ;;  %v6204_v10 = vld [vmem:[#allocation13_spill] sm:$0xff] }
 0x235   : > { %v1617_v56 = vpop.f32.mrf.mxu1  ;;  %v1616_v18 = vadd.f32 %v1615_v14, %v6204_v10  ;;  %v4744_v14 = vld [vmem:[#allocation2 + $0x50] sm:$0xff] }
 0x236   : > { %4625 = vmatmul.msk.bf16.gmra.mxu0 %vm1258_vm2, %v4775_v26  ;;  %v6205_v26 = vld [vmem:[#allocation14_spill] sm:$0xff] }
 0x237   : > { %v1865_v52 = vpop.f32.mrf.mxu2  ;;  %v1618_v57 = vadd.f32 %v1617_v56, %v6205_v26 }
 0x238   : > { %v1902_v61 = vadd.f32 %v1865_v52, %v1613_v50 }
 0x239   : > { %v2154_v60 = vpop.f32.mrf.mxu3 }
 0x23a   : > { %v2191_v47 = vadd.f32 %v2154_v60, %v1902_v61 }
 0x23b   : > { %v2444_v13 = vpop.f32.mrf.mxu0 }
 0x23c   : > { %4465 = vmatmul.msk.bf16.gmra.mxu2 %vm1258_vm2, %v4743_v1  ;;  %v5939_v36 = vadd.f32 %v2439_v32, %v2191_v47  ;;  %v4760_v1 = vld [vmem:[#allocation2 + $0xe0] sm:$0xff]  ;;  %v4729_v47 = vld [vmem:[#allocation2 + $0x170] sm:$0xff] }
 0x23d   : > { %v2656_v34 = vpop.f32.mrf.mxu1 }
 0x23e   : > { %4545 = vmatmul.msk.bf16.gmra.mxu3 %vm1258_vm2, %v4759_v11 }
 0x23f   : > { %v1868_v9 = vpop.f32.mrf.mxu2 }
 0x240   : > { %v1903_v27 = vadd.f32 %v1868_v9, %v1616_v18  ;;  %4386 = vmatmul.msk.bf16.gmra.mxu1 %vm1258_vm2, %v4728_v21  ;;  %v2736_v21 = vadd.f32 %v2656_v34, %v5715_v63  ;;  %v5963_v63 = vld [vmem:[%s6178_s3] ss:$0 sm:$0xff] }
 0x241   : > { %v2157_v55 = vpop.f32.mrf.mxu3 }
 0x242   : > { %v2192_v3 = vadd.f32 %v2157_v55, %v1903_v27  ;;  %v5957_v27 = vld [vmem:[%s6177_s2] ss:$0 sm:$0xff]  ;;  %v4777_v55 = vld [vmem:[#allocation2 + $0x178] sm:$0xff] }
 0x243   : > { %v3515_v25 = vpop.f32.mrf.mxu0 }
 0x244   : > { %v5944_v58 = vadd.f32 %v2442_v24, %v2192_v3 }
 0x245   : > { %v2658_v35 = vpop.f32.mrf.mxu1 }
 0x246   : > { %4626 = vmatmul.msk.bf16.gmra.mxu0 %vm1258_vm2, %v4776_v7  ;;  %v2737_v26 = vadd.f32 %v2658_v35, %v5726_v38  ;;  %v4730_v38 = vld [vmem:[#allocation2 + $0x178] sm:$0xff] }
 0x247   : > { %v1870_v32 = vpop.f32.mrf.mxu2 }
 0x248   : > { %v1904_v50 = vadd.f32 %v1870_v32, %v1618_v57 }
 0x249   : > { %v2159_v52 = vpop.f32.mrf.mxu3 }
 0x24a   : > { %v2193_v61 = vadd.f32 %v2159_v52, %v1904_v50 }
 0x24b   : > { %v3517_v60 = vpop.f32.mrf.mxu0 }
 0x24c   : > { %4466 = vmatmul.msk.bf16.gmra.mxu2 %vm1258_vm2, %v4744_v14  ;;  %v5949_v11 = vadd.f32 %v2444_v13, %v2193_v61  ;;  %v4745_v14 = vld [vmem:[#allocation2 + $0x58] sm:$0xff] }
 0x24d   : > { %v2661_v24 = vpop.f32.mrf.mxu1 }
 0x24e   : > { %4546 = vmatmul.msk.bf16.gmra.mxu3 %vm1258_vm2, %v4760_v1  ;;  %v4761_v1 = vld [vmem:[#allocation2 + $0xe8] sm:$0xff] }
 0x24f   : > { %v2941_v56 = vpop.f32.mrf.mxu2 }
 0x250   : > { %v3021_v10 = vadd.f32 %v2941_v56, %v2736_v21  ;;  %4387 = vmatmul.msk.bf16.gmra.mxu1 %vm1258_vm2, %v4729_v47 }
 0x251   : > { %v3230_v18 = vpop.f32.mrf.mxu3 }
 0x252   : > { %v3310_v9 = vadd.f32 %v3230_v18, %v3021_v10  ;;  %v2738_v10 = vadd.f32 %v2661_v24, %v5739_v29 }
 0x253   : > { %v3520_v13 = vpop.f32.mrf.mxu0 }
 0x254   : > { %v3595_v3 = vadd.f32 %v3515_v25, %v3310_v9 }
 0x255   : > { %v2663_v34 = vpop.f32.mrf.mxu1 }
 0x256   : > { %v3631_v7 = vmul.f32 %v5957_v27, %v3595_v3  ;;  %4627 = vmatmul.msk.bf16.gmra.mxu0 %vm1258_vm2, %v4777_v55  ;;  %v2739_v29 = vadd.f32 %v2663_v34, %v5750_v19 }
 0x257   : > { %v2943_v57 = vpop.f32.mrf.mxu2 }
 0x258   : > { %v3667_v32 = vadd.f32 %v5963_v63, %v3631_v7  ;;  %v3022_v50 = vadd.f32 %v2943_v57, %v2737_v26  ;;  %v4778_v26 = vld [vmem:[#allocation2 + $0x180] sm:$0xff] }
 0x259   : > { %v3232_v25 = vpop.f32.mrf.mxu3 }
 0x25a   : > { %v3699_v52 = vmax.f32 %v3667_v32, 0.0  ;;  %v3311_v61 = vadd.f32 %v3232_v25, %v3022_v50 }
 0x25b   : > { %v3522_v47 = vpop.f32.mrf.mxu0 }
 0x25c   : > { %3731 = vst [vmem:[%s5971_s8] sm:$0xff] %v3699_v52  ;;  %v3596_v21 = vadd.f32 %v3517_v60, %v3311_v61  ;;  %4467 = vmatmul.msk.bf16.gmra.mxu2 %vm1258_vm2, %v4745_v14  ;;  %v4746_v61 = vld [vmem:[#allocation2 + $0x60] sm:$0xff] }
 0x25d   : > { %v2666_v35 = vpop.f32.mrf.mxu1 }
 0x25e   : > { %v3632_v56 = vmul.f32 %v5957_v27, %v3596_v21  ;;  %4547 = vmatmul.msk.bf16.gmra.mxu3 %vm1258_vm2, %v4761_v1  ;;  %v2740_v34 = vadd.f32 %v2666_v35, %v5763_v53 }
 0x25f   : > { %v2946_v18 = vpop.f32.mrf.mxu2 }
 0x260   : > { %v3668_v9 = vadd.f32 %v5963_v63, %v3632_v56  ;;  %v3023_v55 = vadd.f32 %v2946_v18, %v2738_v10  ;;  %4388 = vmatmul.msk.bf16.gmra.mxu1 %vm1258_vm2, %v4730_v38  ;;  %v4762_v56 = vld [vmem:[#allocation2 + $0xf0] sm:$0xff] }
 0x261   : > { %v3235_v3 = vpop.f32.mrf.mxu3 }
 0x262   : > { %v3700_v7 = vmax.f32 %v3668_v9, 0.0  ;;  %v3312_v60 = vadd.f32 %v3235_v3, %v3023_v55 }
 0x263   : > { %v3525_v57 = vpop.f32.mrf.mxu0 }
 0x264   : > { %3732 = vst [vmem:[%s5971_s8 + $0x8] sm:$0xff] %v3700_v7  ;;  %v3597_v32 = vadd.f32 %v3520_v13, %v3312_v60  ;;  %v4731_v13 = vld [vmem:[#allocation2 + $0x180] sm:$0xff] }
 0x265   : > { %v2668_v50 = vpop.f32.mrf.mxu1 }
 0x266   : > { %v3633_v14 = vmul.f32 %v5957_v27, %v3597_v32  ;;  %4628 = vmatmul.msk.bf16.gmra.mxu0 %vm1258_vm2, %v4778_v26  ;;  %v4779_v32 = vld [vmem:[#allocation2 + $0x188] sm:$0xff]  ;;  %v2741_v53 = vadd.f32 %v2668_v50, %v5774_v48 }
 0x267   : > { %v2948_v24 = vpop.f32.mrf.mxu2 }
 0x268   : > { %v3669_v25 = vadd.f32 %v5963_v63, %v3633_v14  ;;  %v3024_v52 = vadd.f32 %v2948_v24, %v2739_v29 }
 0x269   : > { %v3237_v1 = vpop.f32.mrf.mxu3 }
 0x26a   : > { %v3701_v21 = vmax.f32 %v3669_v25, 0.0  ;;  %v3313_v38 = vadd.f32 %v3237_v1, %v3024_v52  ;;  %v4747_v1 = vld [vmem:[#allocation2 + $0x68] sm:$0xff] }
 0x26b   : > { %v3527_v10 = vpop.f32.mrf.mxu0 }
 0x26c   : > { %3733 = vst [vmem:[%s5971_s8 + $0x10] sm:$0xff] %v3701_v21  ;;  %v3598_v18 = vadd.f32 %v3522_v47, %v3313_v38  ;;  %4468 = vmatmul.msk.bf16.gmra.mxu2 %vm1258_vm2, %v4746_v61 }
 0x26d   : > { %v2671_v9 = vpop.f32.mrf.mxu1 }
 0x26e   : > { %v3634_v19 = vmul.f32 %v5957_v27, %v3598_v18  ;;  %4548 = vmatmul.msk.bf16.gmra.mxu3 %vm1258_vm2, %v4762_v56  ;;  %v4763_v18 = vld [vmem:[#allocation2 + $0xf8] sm:$0xff]  ;;  %v2742_v50 = vadd.f32 %v2671_v9, %v5788_v33  ;;  %v1003_v33 = vrot.slane %v752_v30, 4 }
 0x26f   : > { %v2951_v55 = vpop.f32.mrf.mxu2 }
 0x270   : > { %v3670_v3 = vadd.f32 %v5963_v63, %v3634_v19  ;;  %v3025_v7 = vadd.f32 %v2951_v55, %v2740_v34  ;;  %4389 = vmatmul.msk.bf16.gmra.mxu1 %vm1258_vm2, %v4731_v13 }
 0x271   : > { %v3240_v60 = vpop.f32.mrf.mxu3 }
 0x272   : > { %v3702_v26 = vmax.f32 %v3670_v3, 0.0  ;;  %v3314_v47 = vadd.f32 %v3240_v60, %v3025_v7  ;;  %v998_v60 = vrot.slane %v747_v59, 5 }
 0x273   : > { %v3530_v14 = vpop.f32.mrf.mxu0 }
 0x274   : > { %3734 = vst [vmem:[%s5971_s8 + $0x18] sm:$0xff] %v3702_v26  ;;  %v3599_v29 = vadd.f32 %v3525_v57, %v3314_v47  ;;  %v4732_v57 = vld [vmem:[#allocation2 + $0x188] sm:$0xff]  ;;  %v1001_v47 = vrot.slane %v755_v6, 5 }
 0x275   : > { %v2673_v24 = vpop.f32.mrf.mxu1 }
 0x276   : > { %v3635_v25 = vmul.f32 %v5957_v27, %v3599_v29  ;;  %4629 = vmatmul.msk.bf16.gmra.mxu0 %vm1258_vm2, %v4779_v32  ;;  %v4780_v29 = vld [vmem:[#allocation2 + $0x190] sm:$0xff]  ;;  %v2743_v6 = vadd.f32 %v2673_v24, %v5802_v5  ;;  %v4764_v5 = vld [vmem:[#allocation2 + $0x100] sm:$0xff] }
 0x277   : > { %v2953_v35 = vpop.f32.mrf.mxu2 }
 0x278   : > { %v3671_v52 = vadd.f32 %v5963_v63, %v3635_v25  ;;  %v3026_v61 = vadd.f32 %v2953_v35, %v2741_v53  ;;  %v1004_v35 = vor.u32 %v1003_v33, %v1001_v47 }
 0x279   : > { %v3242_v21 = vpop.f32.mrf.mxu3 }
 0x27a   : > { %v3703_v38 = vmax.f32 %v3671_v52, 0.0  ;;  %v3315_v56 = vadd.f32 %v3242_v21, %v3026_v61 }
 0x27b   : > { %v3532_v13 = vpop.f32.mrf.mxu0 }
 0x27c   : > { %3735 = vst [vmem:[%s5971_s8 + $0x20] sm:$0xff] %v3703_v38  ;;  %v3600_v19 = vadd.f32 %v3527_v10, %v3315_v56  ;;  %4469 = vmatmul.msk.bf16.gmra.mxu2 %vm1258_vm2, %v4747_v1  ;;  %v997_v10 = vrot.slane %v744_v12, 4  ;;  %v1005_v1 = vrot.slane %v1004_v35, 4  ;;  %v4748_v56 = vld [vmem:[#allocation2 + $0x70] sm:$0xff] }
 0x27d   : > { %v2676_v34 = vpop.f32.mrf.mxu1 }
 0x27e   : > { %v3636_v48 = vmul.f32 %v5957_v27, %v3600_v19  ;;  %4549 = vmatmul.msk.bf16.gmra.mxu3 %vm1258_vm2, %v4763_v18  ;;  %v999_v25 = vor.u32 %v998_v60, %v997_v10 }
 0x27f   : > { %v2956_v55 = vpop.f32.mrf.mxu2 }
 0x280   : > { %v3672_v3 = vadd.f32 %v5963_v63, %v3636_v48  ;;  %v3027_v7 = vadd.f32 %v2956_v55, %v2742_v50  ;;  %4390 = vmatmul.msk.bf16.gmra.mxu1 %vm1258_vm2, %v4732_v57  ;;  %v1000_v61 = vrot.slane %v999_v25, 4  ;;  %v2744_v55 = vadd.f32 %v2676_v34, %v5828_v45 }
 0x281   : > { %v3245_v26 = vpop.f32.mrf.mxu3 }
 0x282   : > { %v3704_v9 = vmax.f32 %v3672_v3, 0.0  ;;  %v3316_v32 = vadd.f32 %v3245_v26, %v3027_v7  ;;  %v1002_v51 = vsel %vm5450_vm10, %v1000_v61, %v1001_v47  ;;  %v4781_v47 = vld [vmem:[#allocation2 + $0x198] sm:$0xff] }
 0x283   : > { %v3535_v53 = vpop.f32.mrf.mxu0  ;;  %1100 = vst.msk [vmem:[#allocation2 + $0x1a0] sm:$0xf] %vm294_vm0, %v1002_v51 }
 0x284   : > { %3736 = vst [vmem:[%s5971_s8 + $0x28] sm:$0xff] %v3704_v9  ;;  %v3601_v52 = vadd.f32 %v3530_v14, %v3316_v32  ;;  %v1102_v14 = vsel %vm5457_vm11, %v1005_v1, %v1101_v17 }
 0x285   : > { %v2678_v12 = vpop.f32.mrf.mxu1  ;;  %1103 = vst [vmem:[#allocation2 + $0x1a4] sm:$0xf] %v1102_v14 }
 0x286   : > { %v3637_v59 = vmul.f32 %v5957_v27, %v3601_v52  ;;  %4630 = vmatmul.msk.bf16.gmra.mxu0 %vm1258_vm2, %v4780_v29  ;;  %v2745_v45 = vadd.f32 %v2678_v12, %v5839_v46  ;;  %v4749_v52 = vld [vmem:[#allocation2 + $0x78] sm:$0xff] }
 0x287   : > { %v2958_v30 = vpop.f32.mrf.mxu2 }
 0x288   : > { %v3673_v21 = vadd.f32 %v5963_v63, %v3637_v59  ;;  %v3028_v38 = vadd.f32 %v2958_v30, %v2743_v6  ;;  %v4765_v59 = vld [vmem:[#allocation2 + $0x108] sm:$0xff] }
 0x289   : > { %v3247_v18 = vpop.f32.mrf.mxu3 }
 0x28a   : > { %v3705_v19 = vmax.f32 %v3673_v21, 0.0  ;;  %v3317_v57 = vadd.f32 %v3247_v18, %v3028_v38 }
 0x28b   : > { %v3537_v24 = vpop.f32.mrf.mxu0 }
 0x28c   : > { %3737 = vst [vmem:[%s5971_s8 + $0x30] sm:$0xff] %v3705_v19  ;;  %v3602_v48 = vadd.f32 %v3532_v13, %v3317_v57  ;;  %4470 = vmatmul.msk.bf16.gmra.mxu2 %vm1258_vm2, %v4748_v56  ;;  %v4782_v57 = vld [vmem:[#allocation2 + $0x1a0] sm:$0xff] }
 0x28d   : > { %v2681_v50 = vpop.f32.mrf.mxu1 }
 0x28e   : > { %v3638_v22 = vmul.f32 %v5957_v27, %v3602_v48  ;;  %4550 = vmatmul.msk.bf16.gmra.mxu3 %vm1258_vm2, %v4764_v5  ;;  %v2746_v12 = vadd.f32 %v2681_v50, %v5844_v15 }
 0x28f   : > { %v2961_v3 = vpop.f32.mrf.mxu2 }
 0x290   : > { %v3674_v7 = vadd.f32 %v5963_v63, %v3638_v22  ;;  %v3029_v10 = vadd.f32 %v2961_v3, %v2744_v55  ;;  %4391 = vmatmul.msk.bf16.gmra.mxu1 %vm1258_vm2, %v4733_v31  ;;  %v4750_v3 = vld [vmem:[#allocation2 + $0x80] sm:$0xff] }
 0x291   : > { %v3250_v60 = vpop.f32.mrf.mxu3 }
 0x292   : > { %v3706_v26 = vmax.f32 %v3674_v7, 0.0  ;;  %v3318_v13 = vadd.f32 %v3250_v60, %v3029_v10 }
 0x293   : > { %v3540_v33 = vpop.f32.mrf.mxu0 }
 0x294   : > { %3738 = vst [vmem:[%s5971_s8 + $0x38] sm:$0xff] %v3706_v26  ;;  %v3603_v9 = vadd.f32 %v3535_v53, %v3318_v13  ;;  %v4734_v53 = vld [vmem:[#allocation2 + $0x198] sm:$0xff]  ;;  %v4766_v26 = vld [vmem:[#allocation2 + $0x110] sm:$0xff] }
 0x295   : > { %v2683_v32 = vpop.f32.mrf.mxu1 }
 0x296   : > { %v3639_v29 = vmul.f32 %v5957_v27, %v3603_v9  ;;  %4631 = vmatmul.msk.bf16.gmra.mxu0 %vm1258_vm2, %v4781_v47  ;;  %v2747_v15 = vadd.f32 %v2683_v32, %v5849_v16 }
 0x297   : > { %v2963_v34 = vpop.f32.mrf.mxu2 }
 0x298   : > { %v3675_v25 = vadd.f32 %v5963_v63, %v3639_v29  ;;  %v3030_v35 = vadd.f32 %v2963_v34, %v2745_v45 }
 0x299   : > { %v3252_v61 = vpop.f32.mrf.mxu3 }
 0x29a   : > { %v3707_v1 = vmax.f32 %v3675_v25, 0.0  ;;  %v3319_v17 = vadd.f32 %v3252_v61, %v3030_v35  ;;  %v4783_v61 = vld [vmem:[#allocation2 + $0x1a8] sm:$0xff] }
 0x29b   : > { %v3542_v6 = vpop.f32.mrf.mxu0 }
 0x29c   : > { %3739 = vst [vmem:[%s5971_s8 + $0x40] sm:$0xff] %v3707_v1  ;;  %v3604_v51 = vadd.f32 %v3537_v24, %v3319_v17  ;;  %4471 = vmatmul.msk.bf16.gmra.mxu2 %vm1258_vm2, %v4749_v52 }
 0x29d   : > { %v2686_v30 = vpop.f32.mrf.mxu1 }
 0x29e   : > { %v3640_v46 = vmul.f32 %v5957_v27, %v3604_v51  ;;  %4551 = vmatmul.msk.bf16.gmra.mxu3 %vm1258_vm2, %v4765_v59  ;;  %v2748_v32 = vadd.f32 %v2686_v30, %v5854_v23 }
 0x29f   : > { %v2966_v14 = vpop.f32.mrf.mxu2 }
 0x2a0   : > { %v3676_v21 = vadd.f32 %v5963_v63, %v3640_v46  ;;  %v3031_v38 = vadd.f32 %v2966_v14, %v2746_v12  ;;  %4392 = vmatmul.msk.bf16.gmra.mxu1 %vm1258_vm2, %v4734_v53  ;;  %v4751_v46 = vld [vmem:[#allocation2 + $0x88] sm:$0xff] }
 0x2a1   : > { %v3255_v56 = vpop.f32.mrf.mxu3 }
 0x2a2   : > { %v3708_v18 = vmax.f32 %v3676_v21, 0.0  ;;  %v3320_v19 = vadd.f32 %v3255_v56, %v3031_v38  ;;  %v4767_v38 = vld [vmem:[#allocation2 + $0x118] sm:$0xff] }
 0x2a3   : > { %v3545_v5 = vpop.f32.mrf.mxu0 }
 0x2a4   : > { %3740 = vst [vmem:[%s5971_s8 + $0x48] sm:$0xff] %v3708_v18  ;;  %v3605_v24 = vadd.f32 %v3540_v33, %v3320_v19  ;;  %v4735_v33 = vld [vmem:[#allocation2 + $0x1a0] sm:$0xff] }
 0x2a5   : > { %v2688_v48 = vpop.f32.mrf.mxu1 }
 0x2a6   : > { %v3641_v31 = vmul.f32 %v5957_v27, %v3605_v24  ;;  %4632 = vmatmul.msk.bf16.gmra.mxu0 %vm1258_vm2, %v4782_v57  ;;  %v2749_v23 = vadd.f32 %v2688_v48, %v5859_v2 }
 0x2a7   : > { %v2968_v50 = vpop.f32.mrf.mxu2 }
 0x2a8   : > { %v3677_v22 = vadd.f32 %v5963_v63, %v3641_v31  ;;  %v3032_v55 = vadd.f32 %v2968_v50, %v2747_v15 }
 0x2a9   : > { %v3257_v7 = vpop.f32.mrf.mxu3 }
 0x2aa   : > { %v3709_v10 = vmax.f32 %v3677_v22, 0.0  ;;  %v3321_v60 = vadd.f32 %v3257_v7, %v3032_v55 }
 0x2ab   : > { %v3547_v13 = vpop.f32.mrf.mxu0 }
 0x2ac   : > { %3741 = vst [vmem:[%s5971_s8 + $0x50] sm:$0xff] %v3709_v10  ;;  %v3606_v47 = vadd.f32 %v3542_v6, %v3321_v60  ;;  %4472 = vmatmul.msk.bf16.gmra.mxu2 %vm1258_vm2, %v4750_v3 }
 0x2ad   : > { %v2691_v9 = vpop.f32.mrf.mxu1 }
 0x2ae   : > { %v3642_v16 = vmul.f32 %v5957_v27, %v3606_v47  ;;  %4552 = vmatmul.msk.bf16.gmra.mxu3 %vm1258_vm2, %v4766_v26  ;;  %v2750_v57 = vadd.f32 %v2691_v9, %v5864_v37 }
 0x2af   : > { %v2971_v29 = vpop.f32.mrf.mxu2 }
 0x2b0   : > { %v3678_v45 = vadd.f32 %v5963_v63, %v3642_v16  ;;  %v3033_v34 = vadd.f32 %v2971_v29, %v2748_v32  ;;  %4393 = vmatmul.msk.bf16.gmra.mxu1 %vm1258_vm2, %v4735_v33 }
 0x2b1   : > { %v3260_v25 = vpop.f32.mrf.mxu3 }
 0x2b2   : > { %v3710_v35 = vmax.f32 %v3678_v45, 0.0  ;;  %v3322_v52 = vadd.f32 %v3260_v25, %v3033_v34 }
 0x2b3   : > { %v3550_v1 = vpop.f32.mrf.mxu0 }
 0x2b4   : > { %3742 = vst [vmem:[%s5971_s8 + $0x58] sm:$0xff] %v3710_v35  ;;  %v3607_v17 = vadd.f32 %v3545_v5, %v3322_v52 }
 0x2b5   : > { %v2693_v59 = vpop.f32.mrf.mxu1 }
 0x2b6   : > { %v3643_v6 = vmul.f32 %v5957_v27, %v3607_v17  ;;  %4633 = vmatmul.msk.bf16.gmra.mxu0 %vm1258_vm2, %v4783_v61  ;;  %v2751_v10 = vadd.f32 %v2693_v59, %v5869_v8 }
 0x2b7   : > { %v2973_v51 = vpop.f32.mrf.mxu2 }
 0x2b8   : > { %v3679_v53 = vadd.f32 %v5963_v63, %v3643_v6  ;;  %v3034_v30 = vadd.f32 %v2973_v51, %v2749_v23 }
 0x2b9   : > { %v3262_v12 = vpop.f32.mrf.mxu3 }
 0x2ba   : > { %v3711_v14 = vmax.f32 %v3679_v53, 0.0  ;;  %v3323_v21 = vadd.f32 %v3262_v12, %v3034_v30 }
 0x2bb   : > { %v3552_v56 = vpop.f32.mrf.mxu0 }
 0x2bc   : > { %3743 = vst [vmem:[%s5971_s8 + $0x60] sm:$0xff] %v3711_v14  ;;  %v3608_v18 = vadd.f32 %v3547_v13, %v3323_v21  ;;  %4473 = vmatmul.msk.bf16.gmra.mxu2 %vm1258_vm2, %v4751_v46 }
 0x2bd   : > { %v2696_v19 = vpop.f32.mrf.mxu1 }
 0x2be   : > { %v3644_v2 = vmul.f32 %v5957_v27, %v3608_v18  ;;  %4553 = vmatmul.msk.bf16.gmra.mxu3 %vm1258_vm2, %v4767_v38  ;;  %v2752_v45 = vadd.f32 %v2696_v19, %v5874_v41 }
 0x2bf   : > { %v2976_v5 = vpop.f32.mrf.mxu2 }
 0x2c0   : > { %v3680_v24 = vadd.f32 %v5963_v63, %v3644_v2  ;;  %v3035_v48 = vadd.f32 %v2976_v5, %v2750_v57 }
 0x2c1   : > { %v3265_v31 = vpop.f32.mrf.mxu3 }
 0x2c2   : > { %v3712_v15 = vmax.f32 %v3680_v24, 0.0  ;;  %v3324_v50 = vadd.f32 %v3265_v31, %v3035_v48 }
 0x2c3   : > { %v3555_v22 = vpop.f32.mrf.mxu0 }
 0x2c4   : > { %3744 = vst [vmem:[%s5971_s8 + $0x68] sm:$0xff] %v3712_v15  ;;  %v3609_v55 = vadd.f32 %v3550_v1, %v3324_v50 }
 0x2c5   : > { %v2698_v3 = vpop.f32.mrf.mxu1 }
 0x2c6   : > { %v3645_v7 = vmul.f32 %v5957_v27, %v3609_v55  ;;  %v2753_v23 = vadd.f32 %v2698_v3, %v5879_v40 }
 0x2c7   : > { %v2978_v60 = vpop.f32.mrf.mxu2 }
 0x2c8   : > { %v3681_v37 = vadd.f32 %v5963_v63, %v3645_v7  ;;  %v3036_v26 = vadd.f32 %v2978_v60, %v2751_v10 }
 0x2c9   : > { %v3267_v13 = vpop.f32.mrf.mxu3 }
 0x2ca   : > { %v3713_v47 = vmax.f32 %v3681_v37, 0.0  ;;  %v3325_v33 = vadd.f32 %v3267_v13, %v3036_v26 }
 0x2cb   : > { %v3557_v9 = vpop.f32.mrf.mxu0 }
 0x2cc   : > { %3745 = vst [vmem:[%s5971_s8 + $0x70] sm:$0xff] %v3713_v47  ;;  %v3610_v16 = vadd.f32 %v3552_v56, %v3325_v33 }
 0x2cd   : > { %v2701_v32 = vpop.f32.mrf.mxu1 }
 0x2ce   : > { %v3646_v29 = vmul.f32 %v5957_v27, %v3610_v16  ;;  %v2754_v18 = vadd.f32 %v2701_v32, %v5884_v39 }
 0x2cf   : > { %v2981_v34 = vpop.f32.mrf.mxu2 }
 0x2d0   : > { %v3682_v25 = vadd.f32 %v5963_v63, %v3646_v29  ;;  %v3037_v8 = vadd.f32 %v2981_v34, %v2752_v45 }
 0x2d1   : > { %v3270_v35 = vpop.f32.mrf.mxu3 }
 0x2d2   : > { %v3714_v52 = vmax.f32 %v3682_v25, 0.0  ;;  %v3326_v61 = vadd.f32 %v3270_v35, %v3037_v8 }
 0x2d3   : > { %v3560_v1 = vpop.f32.mrf.mxu0 }
 0x2d4   : > { %3746 = vst [vmem:[%s5971_s8 + $0x78] sm:$0xff] %v3714_v52  ;;  %v3611_v17 = vadd.f32 %v3555_v22, %v3326_v61 }
 0x2d5   : > { %v2703_v59 = vpop.f32.mrf.mxu1 }
 0x2d6   : > { %v3647_v6 = vmul.f32 %v5957_v27, %v3611_v17  ;;  %v2755_v22 = vadd.f32 %v2703_v59, %v5889_v28 }
 0x2d7   : > { %v2983_v51 = vpop.f32.mrf.mxu2 }
 0x2d8   : > { %v3683_v53 = vadd.f32 %v5963_v63, %v3647_v6  ;;  %v3038_v41 = vadd.f32 %v2983_v51, %v2753_v23 }
 0x2d9   : > { %v3272_v30 = vpop.f32.mrf.mxu3 }
 0x2da   : > { %v3715_v46 = vmax.f32 %v3683_v53, 0.0  ;;  %v3327_v12 = vadd.f32 %v3272_v30, %v3038_v41 }
 0x2db   : > { %v3562_v14 = vpop.f32.mrf.mxu0 }
 0x2dc   : > { %3747 = vst [vmem:[%s5971_s8 + $0x80] sm:$0xff] %v3715_v46  ;;  %v3612_v21 = vadd.f32 %v3557_v9, %v3327_v12 }
 0x2dd   : > { %v2706_v38 = vpop.f32.mrf.mxu1 }
 0x2de   : > { %v3648_v56 = vmul.f32 %v5957_v27, %v3612_v21  ;;  %v2756_v33 = vadd.f32 %v2706_v38, %v5894_v44 }
 0x2df   : > { %v2986_v19 = vpop.f32.mrf.mxu2 }
 0x2e0   : > { %v3684_v2 = vadd.f32 %v5963_v63, %v3648_v56  ;;  %v3039_v40 = vadd.f32 %v2986_v19, %v2754_v18 }
 0x2e1   : > { %v3275_v57 = vpop.f32.mrf.mxu3 }
 0x2e2   : > { %v3716_v5 = vmax.f32 %v3684_v2, 0.0  ;;  %v3328_v24 = vadd.f32 %v3275_v57, %v3039_v40 }
 0x2e3   : > { %v3565_v48 = vpop.f32.mrf.mxu0 }
 0x2e4   : > { %3748 = vst [vmem:[%s5971_s8 + $0x88] sm:$0xff] %v3716_v5  ;;  %v3613_v31 = vadd.f32 %v3560_v1, %v3328_v24 }
 0x2e5   : > { %v2708_v15 = vpop.f32.mrf.mxu1 }
 0x2e6   : > { %v3649_v50 = vmul.f32 %v5957_v27, %v3613_v31  ;;  %v2757_v52 = vadd.f32 %v2708_v15, %v5899_v54 }
 0x2e7   : > { %v2988_v55 = vpop.f32.mrf.mxu2 }
 0x2e8   : > { %v3685_v3 = vadd.f32 %v5963_v63, %v3649_v50  ;;  %v3040_v39 = vadd.f32 %v2988_v55, %v2755_v22 }
 0x2e9   : > { %v3277_v7 = vpop.f32.mrf.mxu3 }
 0x2ea   : > { %v3717_v10 = vmax.f32 %v3685_v3, 0.0  ;;  %v3329_v60 = vadd.f32 %v3277_v7, %v3040_v39 }
 0x2eb   : > { %v3567_v37 = vpop.f32.mrf.mxu0 }
 0x2ec   : > { %3749 = vst [vmem:[%s5971_s8 + $0x90] sm:$0xff] %v3717_v10  ;;  %v3614_v26 = vadd.f32 %v3562_v14, %v3329_v60 }
 0x2ed   : > { %v2711_v13 = vpop.f32.mrf.mxu1 }
 0x2ee   : > { %v3650_v47 = vmul.f32 %v5957_v27, %v3614_v26  ;;  %v2758_v30 = vadd.f32 %v2711_v13, %v5904_v49 }
 0x2ef   : > { %v2991_v9 = vpop.f32.mrf.mxu2 }
 0x2f0   : > { %v3686_v16 = vadd.f32 %v5963_v63, %v3650_v47  ;;  %v3041_v28 = vadd.f32 %v2991_v9, %v2756_v33 }
 0x2f1   : > { %v3280_v32 = vpop.f32.mrf.mxu3 }
 0x2f2   : > { %v3718_v29 = vmax.f32 %v3686_v16, 0.0  ;;  %v3330_v45 = vadd.f32 %v3280_v32, %v3041_v28 }
 0x2f3   : > { %v3570_v34 = vpop.f32.mrf.mxu0 }
 0x2f4   : > { %3750 = vst [vmem:[%s5971_s8 + $0x98] sm:$0xff] %v3718_v29  ;;  %v3615_v25 = vadd.f32 %v3565_v48, %v3330_v45 }
 0x2f5   : > { %v2713_v8 = vpop.f32.mrf.mxu1 }
 0x2f6   : > { %v3651_v35 = vmul.f32 %v5957_v27, %v3615_v25  ;;  %v2759_v2 = vadd.f32 %v2713_v8, %v5909_v43 }
 0x2f7   : > { %v2993_v61 = vpop.f32.mrf.mxu2 }
 0x2f8   : > { %v3687_v1 = vadd.f32 %v5963_v63, %v3651_v35  ;;  %v3042_v44 = vadd.f32 %v2993_v61, %v2757_v52 }
 0x2f9   : > { %v3282_v17 = vpop.f32.mrf.mxu3 }
 0x2fa   : > { %v3719_v59 = vmax.f32 %v3687_v1, 0.0  ;;  %v3331_v6 = vadd.f32 %v3282_v17, %v3042_v44 }
 0x2fb   : > { %v3572_v23 = vpop.f32.mrf.mxu0 }
 0x2fc   : > { %3751 = vst [vmem:[%s5971_s8 + $0xa0] sm:$0xff] %v3719_v59  ;;  %v3616_v51 = vadd.f32 %v3567_v37, %v3331_v6 }
 0x2fd   : > { %v2716_v53 = vpop.f32.mrf.mxu1 }
 0x2fe   : > { %v3652_v41 = vmul.f32 %v5957_v27, %v3616_v51  ;;  %v2760_v22 = vadd.f32 %v2716_v53, %v5914_v62 }
 0x2ff   : > { %v2996_v46 = vpop.f32.mrf.mxu2 }
 0x300   : > { %v3688_v12 = vadd.f32 %v5963_v63, %v3652_v41  ;;  %v3043_v54 = vadd.f32 %v2996_v46, %v2758_v30 }
 0x301   : > { %v3285_v14 = vpop.f32.mrf.mxu3 }
 0x302   : > { %v3720_v21 = vmax.f32 %v3688_v12, 0.0  ;;  %v3332_v38 = vadd.f32 %v3285_v14, %v3043_v54 }
 0x303   : > { %v3575_v18 = vpop.f32.mrf.mxu0 }
 0x304   : > { %3752 = vst [vmem:[%s5971_s8 + $0xa8] sm:$0xff] %v3720_v21  ;;  %v3617_v56 = vadd.f32 %v3570_v34, %v3332_v38 }
 0x305   : > { %v2718_v57 = vpop.f32.mrf.mxu1 }
 0x306   : > { %v3653_v19 = vmul.f32 %v5957_v27, %v3617_v56  ;;  %v2761_v47 = vadd.f32 %v2718_v57, %v5919_v0 }
 0x307   : > { %v2998_v40 = vpop.f32.mrf.mxu2 }
 0x308   : > { %v3689_v5 = vadd.f32 %v5963_v63, %v3653_v19  ;;  %v3044_v49 = vadd.f32 %v2998_v40, %v2759_v2 }
 0x309   : > { %v3287_v24 = vpop.f32.mrf.mxu3 }
 0x30a   : > { %v3721_v48 = vmax.f32 %v3689_v5, 0.0  ;;  %v3333_v31 = vadd.f32 %v3287_v24, %v3044_v49 }
 0x30b   : > { %v3577_v3 = vpop.f32.mrf.mxu0 }
 0x30c   : > { %3753 = vst [vmem:[%s5971_s8 + $0xb0] sm:$0xff] %v3721_v48  ;;  %v3618_v15 = vadd.f32 %v3572_v23, %v3333_v31 }
 0x30d   : > { %v2721_v10 = vpop.f32.mrf.mxu1 }
 0x30e   : > { %v3654_v50 = vmul.f32 %v5957_v27, %v3618_v15  ;;  %v2762_v8 = vadd.f32 %v2721_v10, %v5924_v20 }
 0x30f   : > { %v3001_v55 = vpop.f32.mrf.mxu2 }
 0x310   : > { %v3690_v39 = vadd.f32 %v5963_v63, %v3654_v50  ;;  %v3045_v43 = vadd.f32 %v3001_v55, %v2760_v22 }
 0x311   : > { %v3290_v7 = vpop.f32.mrf.mxu3 }
 0x312   : > { %v3722_v60 = vmax.f32 %v3690_v39, 0.0  ;;  %v3334_v37 = vadd.f32 %v3290_v7, %v3045_v43 }
 0x313   : > { %v3580_v28 = vpop.f32.mrf.mxu0 }
 0x314   : > { %3754 = vst [vmem:[%s5971_s8 + $0xb8] sm:$0xff] %v3722_v60  ;;  %v3619_v26 = vadd.f32 %v3575_v18, %v3334_v37 }
 0x315   : > { %v2723_v45 = vpop.f32.mrf.mxu1 }
 0x316   : > { %v3655_v13 = vmul.f32 %v5957_v27, %v3619_v26  ;;  %v2763_v51 = vadd.f32 %v2723_v45, %v5929_v4 }
 0x317   : > { %v3003_v33 = vpop.f32.mrf.mxu2 }
 0x318   : > { %v3691_v9 = vadd.f32 %v5963_v63, %v3655_v13  ;;  %v3046_v62 = vadd.f32 %v3003_v33, %v2761_v47 }
 0x319   : > { %v3292_v16 = vpop.f32.mrf.mxu3 }
 0x31a   : > { %v3723_v32 = vmax.f32 %v3691_v9, 0.0  ;;  %v3335_v29 = vadd.f32 %v3292_v16, %v3046_v62 }
 0x31b   : > { %v3582_v17 = vpop.f32.mrf.mxu0 }
 0x31c   : > { %3755 = vst [vmem:[%s5971_s8 + $0xc0] sm:$0xff] %v3723_v32  ;;  %v3620_v34 = vadd.f32 %v3577_v3, %v3335_v29 }
 0x31d   : > { %v2726_v6 = vpop.f32.mrf.mxu1 }
 0x31e   : > { %v3656_v25 = vmul.f32 %v5957_v27, %v3620_v34  ;;  %v2764_v38 = vadd.f32 %v2726_v6, %v5934_v42 }
 0x31f   : > { %v3006_v35 = vpop.f32.mrf.mxu2 }
 0x320   : > { %v3692_v52 = vadd.f32 %v5963_v63, %v3656_v25  ;;  %v3047_v0 = vadd.f32 %v3006_v35, %v2762_v8 }
 0x321   : > { %v3295_v61 = vpop.f32.mrf.mxu3 }
 0x322   : > { %v3724_v1 = vmax.f32 %v3692_v52, 0.0  ;;  %v3336_v44 = vadd.f32 %v3295_v61, %v3047_v0 }
 0x323   : > { %v3585_v14 = vpop.f32.mrf.mxu0 }
 0x324   : > { %3756 = vst [vmem:[%s5971_s8 + $0xc8] sm:$0xff] %v3724_v1  ;;  %v3621_v59 = vadd.f32 %v3580_v28, %v3336_v44 }
 0x325   : > { %v2728_v18 = vpop.f32.mrf.mxu1 }
 0x326   : > { %v3657_v23 = vmul.f32 %v5957_v27, %v3621_v59  ;;  %v2765_v24 = vadd.f32 %v2728_v18, %v5939_v36 }
 0x327   : > { %v3008_v53 = vpop.f32.mrf.mxu2 }
 0x328   : > { %v3693_v41 = vadd.f32 %v5963_v63, %v3657_v23  ;;  %v3048_v20 = vadd.f32 %v3008_v53, %v2763_v51 }
 0x329   : > { %v3297_v30 = vpop.f32.mrf.mxu3 }
 0x32a   : > { %v3725_v46 = vmax.f32 %v3693_v41, 0.0  ;;  %v3337_v12 = vadd.f32 %v3297_v30, %v3048_v20 }
 0x32b   : > { %v3587_v48 = vpop.f32.mrf.mxu0 }
 0x32c   : > { %3757 = vst [vmem:[%s5971_s8 + $0xd0] sm:$0xff] %v3725_v46  ;;  %v3622_v54 = vadd.f32 %v3582_v17, %v3337_v12 }
 0x32d   : > { %v2731_v22 = vpop.f32.mrf.mxu1 }
 0x32e   : > { %v3658_v21 = vmul.f32 %v5957_v27, %v3622_v54  ;;  %v2766_v7 = vadd.f32 %v2731_v22, %v5944_v58 }
 0x32f   : > { %v3011_v56 = vpop.f32.mrf.mxu2 }
 0x330   : > { %v3694_v19 = vadd.f32 %v5963_v63, %v3658_v21  ;;  %v3049_v4 = vadd.f32 %v3011_v56, %v2764_v38 }
 0x331   : > { %v3300_v2 = vpop.f32.mrf.mxu3 }
 0x332   : > { %v3726_v40 = vmax.f32 %v3694_v19, 0.0  ;;  %v3338_v57 = vadd.f32 %v3300_v2, %v3049_v4 }
 0x333   : > { %v3590_v37 = vpop.f32.mrf.mxu0 }
 0x334   : > { %3758 = vst [vmem:[%s5971_s8 + $0xd8] sm:$0xff] %v3726_v40  ;;  %v3623_v5 = vadd.f32 %v3585_v14, %v3338_v57 }
 0x335   : > { %v2733_v33 = vpop.f32.mrf.mxu1 }
 0x336   : > { %v3659_v49 = vmul.f32 %v5957_v27, %v3623_v5  ;;  %v2767_v16 = vadd.f32 %v2733_v33, %v5949_v11 }
 0x337   : > { %v3013_v31 = vpop.f32.mrf.mxu2 }
 0x338   : > { %v3695_v15 = vadd.f32 %v5963_v63, %v3659_v49  ;;  %v3050_v42 = vadd.f32 %v3013_v31, %v2765_v24 }
 0x339   : > { %v3302_v50 = vpop.f32.mrf.mxu3 }
 0x33a   : > { %v3727_v55 = vmax.f32 %v3695_v15, 0.0  ;;  %v3339_v3 = vadd.f32 %v3302_v50, %v3050_v42 }
 0x33b   : > { %v3592_v25 = vpop.f32.mrf.mxu0 }
 0x33c   : > { %3759 = vst [vmem:[%s5971_s8 + $0xe0] sm:$0xff] %v3727_v55  ;;  %v3624_v39 = vadd.f32 %v3587_v48, %v3339_v3 }
 0x33e   : > { %v3660_v43 = vmul.f32 %v5957_v27, %v3624_v39 }
 0x33f   : > { %v3016_v10 = vpop.f32.mrf.mxu2 }
 0x340   : > { %v3696_v36 = vadd.f32 %v5963_v63, %v3660_v43  ;;  %v3051_v60 = vadd.f32 %v3016_v10, %v2766_v7 }
 0x341   : > { %v3305_v26 = vpop.f32.mrf.mxu3 }
 0x342   : > { %v3728_v13 = vmax.f32 %v3696_v36, 0.0  ;;  %v3340_v47 = vadd.f32 %v3305_v26, %v3051_v60 }
 0x344   : > { %3760 = vst [vmem:[%s5971_s8 + $0xe8] sm:$0xff] %v3728_v13  ;;  %v3625_v9 = vadd.f32 %v3590_v37, %v3340_v47 }
 0x346   : > { %v3661_v62 = vmul.f32 %v5957_v27, %v3625_v9 }
 0x347   : > { %v3018_v28 = vpop.f32.mrf.mxu2 }
 0x348   : > { %v3697_v58 = vadd.f32 %v5963_v63, %v3661_v62  ;;  %v3052_v32 = vadd.f32 %v3018_v28, %v2767_v16 }
 0x349   : > { %v3307_v29 = vpop.f32.mrf.mxu3 }
 0x34a   : > { %v3729_v45 = vmax.f32 %v3697_v58, 0.0  ;;  %v3341_v34 = vadd.f32 %v3307_v29, %v3052_v32 }
 0x34c   : > { %3761 = vst [vmem:[%s5971_s8 + $0xf0] sm:$0xff] %v3729_v45  ;;  %v3626_v8 = vadd.f32 %v3592_v25, %v3341_v34 }
 0x34e   : > { %v3662_v11 = vmul.f32 %v5957_v27, %v3626_v8 }
 0x350   : > { %v3698_v35 = vadd.f32 %v5963_v63, %v3662_v11 }
 0x352   : > { %v3730_v52 = vmax.f32 %v3698_v35, 0.0 }
 0x354   : > { %3762 = vst [vmem:[%s5971_s8 + $0xf8] sm:$0xff] %v3730_v52 }
 0x355   : > { %4875 = shalt.err (!%p4872_p5)
}
 0x356   : > { %s4929_s30 = smov 128   ;;  %s4930_s7 = smov 8  }
 0x357   : > { %4788 = dma.vmem_to_hbm [thread:$0]  (%p4996_p4), %s3778_s13, 4096, %s3780_s14, %s3764_s18, %s4929_s30, %s4929_s30, %s4930_s7  }
 0x358 PF: > { %p4794_p6 = scmp.ge.s32.totalorder %s4926_s20, 2  ;;  %s3794_s8 = sand.u32 1, %s4906_s15  }
 0x359   : > { %s3795_s9 = scalar_lea.sflag [#allocation5], %s3794_s8 }
 0x35a   : > { %p4791_p7 = pnand %p4794_p6, %p5003_p8 }
 0x35c   : > { %p4792_p9 = pneg %p4791_p7 }
 0x35e   : > { %4901 = dma.done.wait (%p4792_p9), %s3795_s9, 4096  }
 0x35f   : > { %4903 = vsyncadd (%p4792_p9), %s3795_s9, 4294963200  ;;  %s17_s20 = sadd.s32 1, %s4926_s20   ;;  %s6206_s15 = smov %s4910_s16 }
 0x360   : > { %p14_p10 = scmp.ge.s32.totalorder %s17_s20, 4   ;;  %s6207_s16 = smov %s4914_s17 }
 0x361   : > { %s6208_s17 = smov %s5009_s28  ;;  %s6209_s18 = smov %s4922_s19 }
 0x362   : > { %s6210_s19 = smov %s6212_s23  ;;  %16 = sbr.rel (!%p14_p10) target bundleno = 4 (0x4), region = 95 }
 0x367   :  { %3801 = vsyncpa [#allocation5], 1 }
 0x368   :  { %3803 = vsyncpa [#allocation5 + $0x1], 1 }

</bundles_post_ra>
